<compile_context>
chip_gen: v7x
topology: tpu7x:2x2x1
jax: 0.10.0
libtpu: 0.0.40
codegen_flags: <defaults>
</compile_context>

<pallas_src>
import functools

import jax
import jax.numpy as jnp
from jax import lax
from jax.experimental import pallas as pl
from jax.experimental.pallas import tpu as pltpu


# Set to jnp.bfloat16 for the bf16 MXU fast path on v5e/v6e/v7x (accumulation stays
# f32 via preferred_element_type).  Kept f32 to match the PyTorch f32 reference.
MATMUL_OPERAND_DTYPE = jnp.float32


def _mm(a, b):
    """MXU matmul with f32 accumulation (operands optionally cast to bf16)."""
    return jnp.dot(a.astype(MATMUL_OPERAND_DTYPE), b.astype(MATMUL_OPERAND_DTYPE),
                   preferred_element_type=jnp.float32)


def _swap01(v):
    """(A, C, D) -> (C, A, D) using static slices + stack (safe in-VMEM relayout)."""
    return jnp.stack([v[:, j, :] for j in range(v.shape[1])], axis=0)


# ----------------------------------------------------------------------------
# The fused forward kernel.
#   args layout (after the 9 named conv refs):
#     [wih_0, whh_0, b_0, ..., wih_{L-1}, whh_{L-1}, b_{L-1},
#      wqkv, bqkv, wo, bo, ln_g, ln_b, fc1_w, fc1_b, fc2_w, fc2_b,
#      out_ref, gx_sc, of_sc, ob_sc]
# ----------------------------------------------------------------------------
def _fused_forward_kernel(x_ref,
                          c1w_ref, c1b_ref, s1_ref, t1_ref,
                          c2w_ref, c2b_ref, s2_ref, t2_ref,
                          *args, num_layers, H, K1, K2, C1, C2, nH, dH):
    B, T, Cin = x_ref.shape
    nl = num_layers
    lstm_refs = args[:3 * nl]
    (wqkv_ref, bqkv_ref, wo_ref, bo_ref, g_ref, beta_ref,
     w1_ref, b1_ref, w2_ref, b2_ref) = args[3 * nl:3 * nl + 10]
    out_ref = args[3 * nl + 10]
    gx_sc, of_sc, ob_sc = args[3 * nl + 11:3 * nl + 14]

    G = 4 * H          # per-direction gate width
    E = 2 * H          # attention embed dim

    # ------------------------- CNN block, (T, B, C) layout -------------------------
    # One im2col + one MXU matmul per conv over all T*B rows; BN folded; ReLU;
    # Dropout = identity (eval).
    x_tb = _swap01(x_ref[...])                                  # (T, B, Cin)

    def conv_bn_relu(inp, c_in, K, w, b, scale, shift, c_out):
        pad_l = (K - 1) // 2
        pad_r = (K - 1) - pad_l
        zl = jnp.zeros((pad_l, B, c_in), jnp.float32)
        zr = jnp.zeros((pad_r, B, c_in), jnp.float32)
        xp = jnp.concatenate([zl, inp, zr], axis=0)             # (T+K-1, B, c_in)
        cols = jnp.concatenate([xp[k:k + T] for k in range(K)], axis=-1)
        cols = cols.reshape(T * B, K * c_in)                    # im2col
        y = _mm(cols, w) + b
        y = y * scale + shift                                   # folded BatchNorm (eval)
        y = jnp.maximum(y, 0.0)                                 # ReLU
        return y.reshape(T, B, c_out)

    h1 = conv_bn_relu(x_tb, Cin, K1, c1w_ref[...], c1b_ref[...],
                      s1_ref[...], t1_ref[...], C1)
    cur = conv_bn_relu(h1, C1, K2, c2w_ref[...], c2b_ref[...],
                       s2_ref[...], t2_ref[...], C2)             # (T, B, 128)

    # --------------------- fused multi-layer bidirectional LSTM ---------------------
    # PyTorch gate order i, f, g, o; weights for fwd|bwd concatenated along N.
    for l in range(nl):
        wih_ref, whh_ref, b_ref = lstm_refs[3 * l:3 * l + 3]
        din = cur.shape[-1]

        # Hoisted input projection (both directions, one matmul) + combined biases.
        gx = _mm(cur.reshape(T * B, din), wih_ref[...]) + b_ref[...]
        gx_sc[...] = gx.reshape(T, B, 8 * H)                    # cols 0:4H fwd, 4H:8H bwd
        whh = whh_ref[...]                                      # (H, 8H) = [Whh_f | Whh_b]

        def step(s, carry):
            h, c = carry                                        # (2B, H): rows 0:B fwd, B:2B bwd
            tb = T - 1 - s
            gxf = gx_sc[s][:, 0:G]                              # fwd gates-from-input @ t=s
            gxb = gx_sc[tb][:, G:2 * G]                         # bwd gates-from-input @ t=T-1-s
            hh = jnp.dot(h, whh, preferred_element_type=jnp.float32)   # (2B, 8H), one push
            # keep each direction's own 4H half, discard cross-direction columns
            gates = jnp.concatenate([gxf + hh[0:B, 0:G],
                                     gxb + hh[B:2 * B, G:2 * G]], axis=0)   # (2B, 4H)
            sg = jax.nn.sigmoid(gates)                          # full 128-lane vreg
            tg = jnp.tanh(gates)
            i_g = sg[:, 0:H]
            f_g = sg[:, H:2 * H]
            g_g = tg[:, 2 * H:3 * H]
            o_g = sg[:, 3 * H:4 * H]
            c_new = f_g * c + i_g * g_g
            h_new = o_g * jnp.tanh(c_new)
            of_sc[s] = h_new[0:B]                               # fwd output @ t=s
            ob_sc[tb] = h_new[B:2 * B]                          # bwd output @ t=T-1-s
            return h_new, c_new

        z = jnp.zeros((2 * B, H), jnp.float32)
        lax.fori_loop(0, T, step, (z, z), unroll=True)
        cur = jnp.concatenate([of_sc[...], ob_sc[...]], axis=-1)    # (T, B, 2H), stays in VMEM

    # ----------- attention + residual + LayerNorm + MLP head, (B, T, .) layout -----------
    x_att = _swap01(cur)                                        # (B, T, E)
    x2 = x_att.reshape(B * T, E)

    qkv = _mm(x2, wqkv_ref[...]) + bqkv_ref[...]                # fused QKV projection
    q = qkv[:, 0:E].reshape(B, T, E)
    k = qkv[:, E:2 * E].reshape(B, T, E)
    v = qkv[:, 2 * E:3 * E].reshape(B, T, E)

    # Head-batched attention: stack heads on the batch axis -> 2 einsums total.
    qh = jnp.concatenate([q[..., h * dH:(h + 1) * dH] for h in range(nH)], axis=0)
    kh = jnp.concatenate([k[..., h * dH:(h + 1) * dH] for h in range(nH)], axis=0)
    vh = jnp.concatenate([v[..., h * dH:(h + 1) * dH] for h in range(nH)], axis=0)

    scale = 1.0 / jnp.sqrt(jnp.float32(dH))
    s_all = jnp.einsum('bqd,bkd->bqk', qh, kh,
                       preferred_element_type=jnp.float32) * scale       # (nH*B, T, T)
    p_all = jax.nn.softmax(s_all, axis=-1)                      # attn dropout = identity (eval)
    ctx = jnp.einsum('bqk,bkd->bqd', p_all, vh,
                     preferred_element_type=jnp.float32)                  # (nH*B, T, dH)

    # Merge heads back along E (head-major, matching PyTorch MultiheadAttention).
    o = jnp.concatenate([ctx[h * B:(h + 1) * B] for h in range(nH)], axis=-1)   # (B, T, E)
    o2 = o.reshape(B * T, E)

    attn = _mm(o2, wo_ref[...]) + bo_ref[...]                   # out_proj
    y = attn + x2                                               # residual
    mean = jnp.mean(y, axis=-1, keepdims=True)                  # LayerNorm (eps=1e-5)
    var = jnp.mean((y - mean) ** 2, axis=-1, keepdims=True)
    yn = (y - mean) * lax.rsqrt(var + 1e-5)
    yn = yn * g_ref[...] + beta_ref[...]

    h1f = jnp.maximum(_mm(yn, w1_ref[...]) + b1_ref[...], 0.0)  # fc1 + ReLU (dropout=id)
    out = _mm(h1f, w2_ref[...]) + b2_ref[...]                   # fc2 (zero-padded to 128 lanes)
    out_ref[...] = out.reshape(B, T, out.shape[-1])             # single lane-dense store


# ----------------------------------------------------------------------------
# Wrapper: one pallas_call for the whole network.
# ----------------------------------------------------------------------------
def cnn_lstm_attention_forward(params, x, *, hidden_dim, num_layers, attn_heads,
                               output_dim):
    """x: (B, T, input_dim) float32 -> (B, T, output_dim)."""
    B, T, Cin = x.shape
    H = hidden_dim
    E = 2 * H
    C1, C2, K1, K2 = 64, 128, 5, 3
    nH = attn_heads
    dH = E // nH
    Dp = params['fc2_w_pad'].shape[1]

    kern = functools.partial(_fused_forward_kernel, num_layers=num_layers, H=H,
                             K1=K1, K2=K2, C1=C1, C2=C2, nH=nH, dH=dH)

    def full(shape):
        n = len(shape)
        return pl.BlockSpec(shape, lambda i, n=n: (0,) * n)

    inputs = [x,
              params['conv1_w'], params['conv1_b'], params['bn1_scale'], params['bn1_shift'],
              params['conv2_w'], params['conv2_b'], params['bn2_scale'], params['bn2_shift']]
    for (wih, whh, b) in params['lstm']:
        inputs += [wih, whh, b]
    inputs += [params['attn_wqkv'], params['attn_bqkv'], params['attn_wo'], params['attn_bo'],
               params['ln_g'], params['ln_b'],
               params['fc1_w'], params['fc1_b'], params['fc2_w_pad'], params['fc2_b_pad']]

    out_pad = pl.pallas_call(
        kern,
        out_shape=jax.ShapeDtypeStruct((B, T, Dp), jnp.float32),
        grid=(1,),
        in_specs=[full(tuple(a.shape)) for a in inputs],
        out_specs=full((B, T, Dp)),
        scratch_shapes=[
            pltpu.VMEM((T, B, 8 * H), jnp.float32),   # hoisted input-projection gates (fwd|bwd)
            pltpu.VMEM((T, B, H), jnp.float32),       # forward-direction outputs
            pltpu.VMEM((T, B, H), jnp.float32),       # backward-direction outputs
        ],
        compiler_params=pltpu.CompilerParams(dimension_semantics=("arbitrary",)),
    )(*inputs)
    return out_pad[..., :output_dim]


# ----------------------------------------------------------------------------
# Parameter init (deterministic, synthetic), matching PyTorch parameter semantics.
# ----------------------------------------------------------------------------
def init_params(key, input_dim, hidden_dim, num_layers, output_dim, attn_heads):
    H = hidden_dim
    E = 2 * H
    keys = iter(jax.random.split(key, 64))

    def u(shape, scale=0.1):
        return jax.random.uniform(next(keys), shape, jnp.float32, -scale, scale)

    p = {}
    C1, C2, K1, K2 = 64, 128, 5, 3

    # conv1: PyTorch weight (64, Cin, 5) -> im2col layout (K*Cin, Cout)
    w1 = u((C1, input_dim, K1))
    p['conv1_w'] = jnp.transpose(w1, (2, 1, 0)).reshape(K1 * input_dim, C1)
    p['conv1_b'] = u((C1,)).reshape(1, C1)
    g1, be1, m1 = u((C1,)) + 1.0, u((C1,)), u((C1,))
    v1 = jnp.abs(u((C1,))) + 1.0
    s1 = g1 / jnp.sqrt(v1 + 1e-5)
    p['bn1_scale'] = s1.reshape(1, C1)
    p['bn1_shift'] = (be1 - m1 * s1).reshape(1, C1)

    # conv2: (128, 64, 3) -> (K*Cin, Cout)
    w2 = u((C2, C1, K2))
    p['conv2_w'] = jnp.transpose(w2, (2, 1, 0)).reshape(K2 * C1, C2)
    p['conv2_b'] = u((C2,)).reshape(1, C2)
    g2, be2, m2 = u((C2,)) + 1.0, u((C2,)), u((C2,))
    v2 = jnp.abs(u((C2,))) + 1.0
    s2 = g2 / jnp.sqrt(v2 + 1e-5)
    p['bn2_scale'] = s2.reshape(1, C2)
    p['bn2_shift'] = (be2 - m2 * s2).reshape(1, C2)

    # bidirectional LSTM stack (PyTorch gate order i,f,g,o); per layer the transposed
    # fwd/bwd weights are concatenated along N for the fused kernel: (Din, 8H), (H, 8H).
    p['lstm'] = []
    in_dim = C2
    for _ in range(num_layers):
        wih_dirs, whh_dirs, b_dirs = [], [], []
        for _d in range(2):                     # 0 = fwd, 1 = bwd
            w_ih = u((4 * H, in_dim))
            w_hh = u((4 * H, H))
            b_ih = u((4 * H,))
            b_hh = u((4 * H,))
            wih_dirs.append(jnp.transpose(w_ih))          # (in_dim, 4H)
            whh_dirs.append(jnp.transpose(w_hh))          # (H, 4H)
            b_dirs.append(b_ih + b_hh)                    # combined bias (4H,)
        p['lstm'].append((
            jnp.concatenate(wih_dirs, axis=1),            # (in_dim, 8H) [fwd | bwd]
            jnp.concatenate(whh_dirs, axis=1),            # (H, 8H)
            jnp.concatenate(b_dirs).reshape(1, 8 * H),    # (1, 8H)
        ))
        in_dim = 2 * H

    # MultiheadAttention: fused in_proj (3E, E) -> (E, 3E)  [columns: q | k | v]
    in_w = u((3 * E, E))
    in_b = u((3 * E,))
    p['attn_wqkv'] = jnp.transpose(in_w)
    p['attn_bqkv'] = in_b.reshape(1, 3 * E)
    p['attn_wo'] = jnp.transpose(u((E, E)))
    p['attn_bo'] = u((E,)).reshape(1, E)

    # LayerNorm
    p['ln_g'] = (u((E,)) + 1.0).reshape(1, E)
    p['ln_b'] = u((E,)).reshape(1, E)

    # fc head; last layer zero-padded to a 128-lane output for lane-dense stores.
    Dh = 128
    p['fc1_w'] = jnp.transpose(u((Dh, E)))
    p['fc1_b'] = u((Dh,)).reshape(1, Dh)
    Dp = max(128, ((output_dim + 127) // 128) * 128)
    w_fc2 = jnp.transpose(u((output_dim, Dh)))           # (Dh, output_dim)
    p['fc2_w_pad'] = jnp.concatenate(
        [w_fc2, jnp.zeros((Dh, Dp - output_dim), jnp.float32)], axis=-1)
    p['fc2_b_pad'] = jnp.concatenate(
        [u((output_dim,)), jnp.zeros((Dp - output_dim,), jnp.float32)]).reshape(1, Dp)
    return p


if __name__ == "__main__":
    INPUT_DIM, HIDDEN_DIM, NUM_LAYERS, OUTPUT_DIM, ATTN_HEADS = 4, 32, 2, 3, 8
    B, T = 2, 8

    key = jax.random.PRNGKey(0)
    pkey, xkey = jax.random.split(key)
    params = init_params(pkey, INPUT_DIM, HIDDEN_DIM, NUM_LAYERS, OUTPUT_DIM, ATTN_HEADS)
    x = jax.random.normal(xkey, (B, T, INPUT_DIM), jnp.float32)

    fwd = jax.jit(functools.partial(cnn_lstm_attention_forward,
                                    hidden_dim=HIDDEN_DIM,
                                    num_layers=NUM_LAYERS,
                                    attn_heads=ATTN_HEADS,
                                    output_dim=OUTPUT_DIM))
    y = fwd(params, x)
    jax.block_until_ready(y)
    assert y.shape == (B, T, OUTPUT_DIM), y.shape
    assert bool(jnp.all(jnp.isfinite(y)))
    print("KERNEL_OK")
</pallas_src>

<mosaic_0001>
module attributes {stable_mosaic.version = 11 : i64} {
  func.func @_fused_forward_kernel(%arg0: i32, %arg1: memref<2x8x4xf32, #tpu.memory_space<vmem>>, %arg2: memref<20x64xf32, #tpu.memory_space<vmem>>, %arg3: memref<1x64xf32, #tpu.memory_space<vmem>>, %arg4: memref<1x64xf32, #tpu.memory_space<vmem>>, %arg5: memref<1x64xf32, #tpu.memory_space<vmem>>, %arg6: memref<192x128xf32, #tpu.memory_space<vmem>>, %arg7: memref<1x128xf32, #tpu.memory_space<vmem>>, %arg8: memref<1x128xf32, #tpu.memory_space<vmem>>, %arg9: memref<1x128xf32, #tpu.memory_space<vmem>>, %arg10: memref<128x256xf32, #tpu.memory_space<vmem>>, %arg11: memref<32x256xf32, #tpu.memory_space<vmem>>, %arg12: memref<1x256xf32, #tpu.memory_space<vmem>>, %arg13: memref<64x256xf32, #tpu.memory_space<vmem>>, %arg14: memref<32x256xf32, #tpu.memory_space<vmem>>, %arg15: memref<1x256xf32, #tpu.memory_space<vmem>>, %arg16: memref<64x192xf32, #tpu.memory_space<vmem>>, %arg17: memref<1x192xf32, #tpu.memory_space<vmem>>, %arg18: memref<64x64xf32, #tpu.memory_space<vmem>>, %arg19: memref<1x64xf32, #tpu.memory_space<vmem>>, %arg20: memref<1x64xf32, #tpu.memory_space<vmem>>, %arg21: memref<1x64xf32, #tpu.memory_space<vmem>>, %arg22: memref<64x128xf32, #tpu.memory_space<vmem>>, %arg23: memref<1x128xf32, #tpu.memory_space<vmem>>, %arg24: memref<128x128xf32, #tpu.memory_space<vmem>>, %arg25: memref<1x128xf32, #tpu.memory_space<vmem>>, %arg26: memref<2x8x128xf32, #tpu.memory_space<vmem>>, %arg27: memref<8x2x256xf32, #tpu.memory_space<vmem>>, %arg28: memref<8x2x32xf32, #tpu.memory_space<vmem>>, %arg29: memref<8x2x32xf32, #tpu.memory_space<vmem>>) attributes {dimension_semantics = [#tpu.dimension_semantics<arbitrary>], iteration_bounds = array<i64: 1>, scalar_prefetch = 0 : i64, scratch_operands = 3 : i64, tpu.core_type = #tpu.core_type<tc>, window_params = [{pipeline_mode = #tpu.pipeline_mode<synchronous>, transform_indices = @transform_0, window_bounds = array<i64: 2, 8, 4>}, {pipeline_mode = #tpu.pipeline_mode<synchronous>, transform_indices = @transform_1, window_bounds = array<i64: 20, 64>}, {pipeline_mode = #tpu.pipeline_mode<synchronous>, transform_indices = @transform_2, window_bounds = array<i64: 1, 64>}, {pipeline_mode = #tpu.pipeline_mode<synchronous>, transform_indices = @transform_3, window_bounds = array<i64: 1, 64>}, {pipeline_mode = #tpu.pipeline_mode<synchronous>, transform_indices = @transform_4, window_bounds = array<i64: 1, 64>}, {pipeline_mode = #tpu.pipeline_mode<synchronous>, transform_indices = @transform_5, window_bounds = array<i64: 192, 128>}, {pipeline_mode = #tpu.pipeline_mode<synchronous>, transform_indices = @transform_6, window_bounds = array<i64: 1, 128>}, {pipeline_mode = #tpu.pipeline_mode<synchronous>, transform_indices = @transform_7, window_bounds = array<i64: 1, 128>}, {pipeline_mode = #tpu.pipeline_mode<synchronous>, transform_indices = @transform_8, window_bounds = array<i64: 1, 128>}, {pipeline_mode = #tpu.pipeline_mode<synchronous>, transform_indices = @transform_9, window_bounds = array<i64: 128, 256>}, {pipeline_mode = #tpu.pipeline_mode<synchronous>, transform_indices = @transform_10, window_bounds = array<i64: 32, 256>}, {pipeline_mode = #tpu.pipeline_mode<synchronous>, transform_indices = @transform_11, window_bounds = array<i64: 1, 256>}, {pipeline_mode = #tpu.pipeline_mode<synchronous>, transform_indices = @transform_12, window_bounds = array<i64: 64, 256>}, {pipeline_mode = #tpu.pipeline_mode<synchronous>, transform_indices = @transform_13, window_bounds = array<i64: 32, 256>}, {pipeline_mode = #tpu.pipeline_mode<synchronous>, transform_indices = @transform_14, window_bounds = array<i64: 1, 256>}, {pipeline_mode = #tpu.pipeline_mode<synchronous>, transform_indices = @transform_15, window_bounds = array<i64: 64, 192>}, {pipeline_mode = #tpu.pipeline_mode<synchronous>, transform_indices = @transform_16, window_bounds = array<i64: 1, 192>}, {pipeline_mode = #tpu.pipeline_mode<synchronous>, transform_indices = @transform_17, window_bounds = array<i64: 64, 64>}, {pipeline_mode = #tpu.pipeline_mode<synchronous>, transform_indices = @transform_18, window_bounds = array<i64: 1, 64>}, {pipeline_mode = #tpu.pipeline_mode<synchronous>, transform_indices = @transform_19, window_bounds = array<i64: 1, 64>}, {pipeline_mode = #tpu.pipeline_mode<synchronous>, transform_indices = @transform_20, window_bounds = array<i64: 1, 64>}, {pipeline_mode = #tpu.pipeline_mode<synchronous>, transform_indices = @transform_21, window_bounds = array<i64: 64, 128>}, {pipeline_mode = #tpu.pipeline_mode<synchronous>, transform_indices = @transform_22, window_bounds = array<i64: 1, 128>}, {pipeline_mode = #tpu.pipeline_mode<synchronous>, transform_indices = @transform_23, window_bounds = array<i64: 128, 128>}, {pipeline_mode = #tpu.pipeline_mode<synchronous>, transform_indices = @transform_24, window_bounds = array<i64: 1, 128>}, {pipeline_mode = #tpu.pipeline_mode<synchronous>, transform_indices = @transform_25, window_bounds = array<i64: 2, 8, 128>}]} {
    %c0 = arith.constant 0 : index
    %c0_0 = arith.constant 0 : index
    %c0_1 = arith.constant 0 : index
    %0 = vector.load %arg1[%c0, %c0_0, %c0_1] : memref<2x8x4xf32, #tpu.memory_space<vmem>>, vector<2x8x4xf32>
    %1 = vector.extract_strided_slice %0 {offsets = [0, 0, 0], sizes = [2, 1, 4], strides = [1, 1, 1]} : vector<2x8x4xf32> to vector<2x1x4xf32>
    %2 = vector.shape_cast %1 : vector<2x1x4xf32> to vector<2x4xf32>
    %3 = vector.extract_strided_slice %0 {offsets = [0, 1, 0], sizes = [2, 1, 4], strides = [1, 1, 1]} : vector<2x8x4xf32> to vector<2x1x4xf32>
    %4 = vector.shape_cast %3 : vector<2x1x4xf32> to vector<2x4xf32>
    %5 = vector.extract_strided_slice %0 {offsets = [0, 2, 0], sizes = [2, 1, 4], strides = [1, 1, 1]} : vector<2x8x4xf32> to vector<2x1x4xf32>
    %6 = vector.shape_cast %5 : vector<2x1x4xf32> to vector<2x4xf32>
    %7 = vector.extract_strided_slice %0 {offsets = [0, 3, 0], sizes = [2, 1, 4], strides = [1, 1, 1]} : vector<2x8x4xf32> to vector<2x1x4xf32>
    %8 = vector.shape_cast %7 : vector<2x1x4xf32> to vector<2x4xf32>
    %9 = vector.extract_strided_slice %0 {offsets = [0, 4, 0], sizes = [2, 1, 4], strides = [1, 1, 1]} : vector<2x8x4xf32> to vector<2x1x4xf32>
    %10 = vector.shape_cast %9 : vector<2x1x4xf32> to vector<2x4xf32>
    %11 = vector.extract_strided_slice %0 {offsets = [0, 5, 0], sizes = [2, 1, 4], strides = [1, 1, 1]} : vector<2x8x4xf32> to vector<2x1x4xf32>
    %12 = vector.shape_cast %11 : vector<2x1x4xf32> to vector<2x4xf32>
    %13 = vector.extract_strided_slice %0 {offsets = [0, 6, 0], sizes = [2, 1, 4], strides = [1, 1, 1]} : vector<2x8x4xf32> to vector<2x1x4xf32>
    %14 = vector.shape_cast %13 : vector<2x1x4xf32> to vector<2x4xf32>
    %15 = vector.extract_strided_slice %0 {offsets = [0, 7, 0], sizes = [2, 1, 4], strides = [1, 1, 1]} : vector<2x8x4xf32> to vector<2x1x4xf32>
    %16 = vector.shape_cast %15 : vector<2x1x4xf32> to vector<2x4xf32>
    %17 = vector.shape_cast %2 : vector<2x4xf32> to vector<1x2x4xf32>
    %18 = vector.shape_cast %4 : vector<2x4xf32> to vector<1x2x4xf32>
    %19 = vector.shape_cast %6 : vector<2x4xf32> to vector<1x2x4xf32>
    %20 = vector.shape_cast %8 : vector<2x4xf32> to vector<1x2x4xf32>
    %21 = vector.shape_cast %10 : vector<2x4xf32> to vector<1x2x4xf32>
    %22 = vector.shape_cast %12 : vector<2x4xf32> to vector<1x2x4xf32>
    %23 = vector.shape_cast %14 : vector<2x4xf32> to vector<1x2x4xf32>
    %24 = vector.shape_cast %16 : vector<2x4xf32> to vector<1x2x4xf32>
    %25 = tpu.concatenate %17, %18, %19, %20, %21, %22, %23, %24 in 0 : vector<1x2x4xf32>, vector<1x2x4xf32>, vector<1x2x4xf32>, vector<1x2x4xf32>, vector<1x2x4xf32>, vector<1x2x4xf32>, vector<1x2x4xf32>, vector<1x2x4xf32> -> vector<8x2x4xf32>
    %c0_2 = arith.constant 0 : index
    %c0_3 = arith.constant 0 : index
    %26 = vector.load %arg2[%c0_2, %c0_3] : memref<20x64xf32, #tpu.memory_space<vmem>>, vector<20x64xf32>
    %c0_4 = arith.constant 0 : index
    %c0_5 = arith.constant 0 : index
    %27 = vector.load %arg3[%c0_4, %c0_5] : memref<1x64xf32, #tpu.memory_space<vmem>>, vector<1x64xf32>
    %c0_6 = arith.constant 0 : index
    %c0_7 = arith.constant 0 : index
    %28 = vector.load %arg4[%c0_6, %c0_7] : memref<1x64xf32, #tpu.memory_space<vmem>>, vector<1x64xf32>
    %c0_8 = arith.constant 0 : index
    %c0_9 = arith.constant 0 : index
    %29 = vector.load %arg5[%c0_8, %c0_9] : memref<1x64xf32, #tpu.memory_space<vmem>>, vector<1x64xf32>
    %cst = arith.constant 0.000000e+00 : f32
    %30 = vector.broadcast %cst : f32 to vector<2x2x4xf32>
    %cst_10 = arith.constant 0.000000e+00 : f32
    %31 = vector.broadcast %cst_10 : f32 to vector<2x2x4xf32>
    %32 = tpu.concatenate %30, %25, %31 in 0 : vector<2x2x4xf32>, vector<8x2x4xf32>, vector<2x2x4xf32> -> vector<12x2x4xf32>
    %33 = vector.extract_strided_slice %32 {offsets = [0, 0, 0], sizes = [8, 2, 4], strides = [1, 1, 1]} : vector<12x2x4xf32> to vector<8x2x4xf32>
    %34 = vector.extract_strided_slice %32 {offsets = [1, 0, 0], sizes = [8, 2, 4], strides = [1, 1, 1]} : vector<12x2x4xf32> to vector<8x2x4xf32>
    %35 = vector.extract_strided_slice %32 {offsets = [2, 0, 0], sizes = [8, 2, 4], strides = [1, 1, 1]} : vector<12x2x4xf32> to vector<8x2x4xf32>
    %36 = vector.extract_strided_slice %32 {offsets = [3, 0, 0], sizes = [8, 2, 4], strides = [1, 1, 1]} : vector<12x2x4xf32> to vector<8x2x4xf32>
    %37 = vector.extract_strided_slice %32 {offsets = [4, 0, 0], sizes = [8, 2, 4], strides = [1, 1, 1]} : vector<12x2x4xf32> to vector<8x2x4xf32>
    %38 = tpu.concatenate %33, %34, %35, %36, %37 in 2 : vector<8x2x4xf32>, vector<8x2x4xf32>, vector<8x2x4xf32>, vector<8x2x4xf32>, vector<8x2x4xf32> -> vector<8x2x20xf32>
    %39 = vector.shape_cast %38 : vector<8x2x20xf32> to vector<16x20xf32>
    %cst_11 = arith.constant dense<0.000000e+00> : vector<16x64xf32>
    %40 = tpu.matmul %39, %26, %cst_11 {dimension_numbers = #tpu.dot_dimension_numbers<[1], [0], [0], [1], [0, 0, 1, 1], [], []>} : vector<16x20xf32>, vector<20x64xf32>, vector<16x64xf32> -> vector<16x64xf32>
    %41 = vector.broadcast %27 : vector<1x64xf32> to vector<16x64xf32>
    %42 = arith.addf %40, %41 : vector<16x64xf32>
    %43 = vector.broadcast %28 : vector<1x64xf32> to vector<16x64xf32>
    %44 = arith.mulf %42, %43 : vector<16x64xf32>
    %45 = vector.broadcast %29 : vector<1x64xf32> to vector<16x64xf32>
    %46 = arith.addf %44, %45 : vector<16x64xf32>
    %cst_12 = arith.constant 0.000000e+00 : f32
    %47 = vector.broadcast %cst_12 : f32 to vector<16x64xf32>
    %48 = arith.maximumf %46, %47 : vector<16x64xf32>
    %49 = vector.shape_cast %48 : vector<16x64xf32> to vector<8x2x64xf32>
    %c0_13 = arith.constant 0 : index
    %c0_14 = arith.constant 0 : index
    %50 = vector.load %arg6[%c0_13, %c0_14] : memref<192x128xf32, #tpu.memory_space<vmem>>, vector<192x128xf32>
    %c0_15 = arith.constant 0 : index
    %c0_16 = arith.constant 0 : index
    %51 = vector.load %arg7[%c0_15, %c0_16] : memref<1x128xf32, #tpu.memory_space<vmem>>, vector<1x128xf32>
    %c0_17 = arith.constant 0 : index
    %c0_18 = arith.constant 0 : index
    %52 = vector.load %arg8[%c0_17, %c0_18] : memref<1x128xf32, #tpu.memory_space<vmem>>, vector<1x128xf32>
    %c0_19 = arith.constant 0 : index
    %c0_20 = arith.constant 0 : index
    %53 = vector.load %arg9[%c0_19, %c0_20] : memref<1x128xf32, #tpu.memory_space<vmem>>, vector<1x128xf32>
    %cst_21 = arith.constant 0.000000e+00 : f32
    %54 = vector.broadcast %cst_21 : f32 to vector<1x2x64xf32>
    %cst_22 = arith.constant 0.000000e+00 : f32
    %55 = vector.broadcast %cst_22 : f32 to vector<1x2x64xf32>
    %56 = tpu.concatenate %54, %49, %55 in 0 : vector<1x2x64xf32>, vector<8x2x64xf32>, vector<1x2x64xf32> -> vector<10x2x64xf32>
    %57 = vector.extract_strided_slice %56 {offsets = [0, 0, 0], sizes = [8, 2, 64], strides = [1, 1, 1]} : vector<10x2x64xf32> to vector<8x2x64xf32>
    %58 = vector.extract_strided_slice %56 {offsets = [1, 0, 0], sizes = [8, 2, 64], strides = [1, 1, 1]} : vector<10x2x64xf32> to vector<8x2x64xf32>
    %59 = vector.extract_strided_slice %56 {offsets = [2, 0, 0], sizes = [8, 2, 64], strides = [1, 1, 1]} : vector<10x2x64xf32> to vector<8x2x64xf32>
    %60 = tpu.concatenate %57, %58, %59 in 2 : vector<8x2x64xf32>, vector<8x2x64xf32>, vector<8x2x64xf32> -> vector<8x2x192xf32>
    %61 = vector.shape_cast %60 : vector<8x2x192xf32> to vector<16x192xf32>
    %cst_23 = arith.constant dense<0.000000e+00> : vector<16x128xf32>
    %62 = tpu.matmul %61, %50, %cst_23 {dimension_numbers = #tpu.dot_dimension_numbers<[1], [0], [0], [1], [0, 0, 1, 1], [], []>} : vector<16x192xf32>, vector<192x128xf32>, vector<16x128xf32> -> vector<16x128xf32>
    %63 = vector.broadcast %51 : vector<1x128xf32> to vector<16x128xf32>
    %64 = arith.addf %62, %63 : vector<16x128xf32>
    %65 = vector.broadcast %52 : vector<1x128xf32> to vector<16x128xf32>
    %66 = arith.mulf %64, %65 : vector<16x128xf32>
    %67 = vector.broadcast %53 : vector<1x128xf32> to vector<16x128xf32>
    %68 = arith.addf %66, %67 : vector<16x128xf32>
    %cst_24 = arith.constant 0.000000e+00 : f32
    %69 = vector.broadcast %cst_24 : f32 to vector<16x128xf32>
    %70 = arith.maximumf %68, %69 : vector<16x128xf32>
    %71 = vector.shape_cast %70 : vector<16x128xf32> to vector<8x2x128xf32>
    %72 = vector.shape_cast %71 : vector<8x2x128xf32> to vector<16x128xf32>
    %c0_25 = arith.constant 0 : index
    %c0_26 = arith.constant 0 : index
    %73 = vector.load %arg10[%c0_25, %c0_26] : memref<128x256xf32, #tpu.memory_space<vmem>>, vector<128x256xf32>
    %cst_27 = arith.constant dense<0.000000e+00> : vector<16x256xf32>
    %74 = tpu.matmul %72, %73, %cst_27 {dimension_numbers = #tpu.dot_dimension_numbers<[1], [0], [0], [1], [0, 0, 1, 1], [], []>} : vector<16x128xf32>, vector<128x256xf32>, vector<16x256xf32> -> vector<16x256xf32>
    %c0_28 = arith.constant 0 : index
    %c0_29 = arith.constant 0 : index
    %75 = vector.load %arg12[%c0_28, %c0_29] : memref<1x256xf32, #tpu.memory_space<vmem>>, vector<1x256xf32>
    %76 = vector.broadcast %75 : vector<1x256xf32> to vector<16x256xf32>
    %77 = arith.addf %74, %76 : vector<16x256xf32>
    %78 = vector.shape_cast %77 : vector<16x256xf32> to vector<8x2x256xf32>
    %c0_30 = arith.constant 0 : index
    %c0_31 = arith.constant 0 : index
    %c0_32 = arith.constant 0 : index
    %79 = vector.load %arg27[%c0_30, %c0_31, %c0_32] : memref<8x2x256xf32, #tpu.memory_space<vmem>>, vector<8x2x256xf32>
    tpu.vector_store %arg27[%c0_30, %c0_31, %c0_32], %78 {strides = array<i32>} : memref<8x2x256xf32, #tpu.memory_space<vmem>>, vector<8x2x256xf32>,
    %c0_33 = arith.constant 0 : index
    %c0_34 = arith.constant 0 : index
    %80 = vector.load %arg11[%c0_33, %c0_34] : memref<32x256xf32, #tpu.memory_space<vmem>>, vector<32x256xf32>
    %cst_35 = arith.constant 0.000000e+00 : f32
    %81 = vector.broadcast %cst_35 : f32 to vector<4x32xf32>
    %c0_i32 = arith.constant 0 : i32
    %c7_i32 = arith.constant 7 : i32
    %82 = arith.subi %c7_i32, %c0_i32 : i32
    %83 = arith.index_cast %c0_i32 : i32 to index
    %c0_36 = arith.constant 0 : index
    %c0_37 = arith.constant 0 : index
    %84 = vector.load %arg27[%83, %c0_36, %c0_37] : memref<8x2x256xf32, #tpu.memory_space<vmem>>, vector<1x2x256xf32>
    %85 = vector.shape_cast %84 : vector<1x2x256xf32> to vector<2x256xf32>
    %86 = vector.extract_strided_slice %85 {offsets = [0, 0], sizes = [2, 128], strides = [1, 1]} : vector<2x256xf32> to vector<2x128xf32>
    %87 = arith.index_cast %82 : i32 to index
    %c0_38 = arith.constant 0 : index
    %c0_39 = arith.constant 0 : index
    %88 = vector.load %arg27[%87, %c0_38, %c0_39] : memref<8x2x256xf32, #tpu.memory_space<vmem>>, vector<1x2x256xf32>
    %89 = vector.shape_cast %88 : vector<1x2x256xf32> to vector<2x256xf32>
    %90 = vector.extract_strided_slice %89 {offsets = [0, 128], sizes = [2, 128], strides = [1, 1]} : vector<2x256xf32> to vector<2x128xf32>
    %cst_40 = arith.constant dense<0.000000e+00> : vector<4x256xf32>
    %91 = tpu.matmul %81, %80, %cst_40 {dimension_numbers = #tpu.dot_dimension_numbers<[1], [0], [0], [1], [0, 0, 1, 1], [], []>} : vector<4x32xf32>, vector<32x256xf32>, vector<4x256xf32> -> vector<4x256xf32>
    %92 = vector.extract_strided_slice %91 {offsets = [0, 0], sizes = [2, 128], strides = [1, 1]} : vector<4x256xf32> to vector<2x128xf32>
    %93 = arith.addf %86, %92 : vector<2x128xf32>
    %94 = vector.extract_strided_slice %91 {offsets = [2, 128], sizes = [2, 128], strides = [1, 1]} : vector<4x256xf32> to vector<2x128xf32>
    %95 = arith.addf %90, %94 : vector<2x128xf32>
    %96 = tpu.concatenate %93, %95 in 0 : vector<2x128xf32>, vector<2x128xf32> -> vector<4x128xf32>
    %97 = arith.negf %96 : vector<4x128xf32>
    %98 = math.exp %97 : vector<4x128xf32>
    %cst_41 = arith.constant 1.000000e+00 : f32
    %99 = vector.broadcast %cst_41 : f32 to vector<4x128xf32>
    %100 = arith.addf %99, %98 : vector<4x128xf32>
    %101 = arith.divf %99, %100 : vector<4x128xf32>
    %102 = math.tanh %96 : vector<4x128xf32>
    %103 = vector.extract_strided_slice %101 {offsets = [0, 0], sizes = [4, 32], strides = [1, 1]} : vector<4x128xf32> to vector<4x32xf32>
    %104 = vector.extract_strided_slice %101 {offsets = [0, 32], sizes = [4, 32], strides = [1, 1]} : vector<4x128xf32> to vector<4x32xf32>
    %105 = vector.extract_strided_slice %102 {offsets = [0, 64], sizes = [4, 32], strides = [1, 1]} : vector<4x128xf32> to vector<4x32xf32>
    %106 = vector.extract_strided_slice %101 {offsets = [0, 96], sizes = [4, 32], strides = [1, 1]} : vector<4x128xf32> to vector<4x32xf32>
    %107 = arith.mulf %104, %81 : vector<4x32xf32>
    %108 = arith.mulf %103, %105 : vector<4x32xf32>
    %109 = arith.addf %107, %108 : vector<4x32xf32>
    %110 = math.tanh %109 : vector<4x32xf32>
    %111 = arith.mulf %106, %110 : vector<4x32xf32>
    %112 = vector.extract_strided_slice %111 {offsets = [0, 0], sizes = [2, 32], strides = [1, 1]} : vector<4x32xf32> to vector<2x32xf32>
    %113 = arith.index_cast %c0_i32 : i32 to index
    %c0_42 = arith.constant 0 : index
    %c0_43 = arith.constant 0 : index
    %114 = vector.load %arg28[%113, %c0_42, %c0_43] : memref<8x2x32xf32, #tpu.memory_space<vmem>>, vector<1x2x32xf32>
    %115 = vector.shape_cast %114 : vector<1x2x32xf32> to vector<2x32xf32>
    %116 = vector.shape_cast %112 : vector<2x32xf32> to vector<1x2x32xf32>
    tpu.vector_store %arg28[%113, %c0_42, %c0_43], %116 {strides = array<i32>} : memref<8x2x32xf32, #tpu.memory_space<vmem>>, vector<1x2x32xf32>,
    %117 = vector.extract_strided_slice %111 {offsets = [2, 0], sizes = [2, 32], strides = [1, 1]} : vector<4x32xf32> to vector<2x32xf32>
    %118 = arith.index_cast %82 : i32 to index
    %c0_44 = arith.constant 0 : index
    %c0_45 = arith.constant 0 : index
    %119 = vector.load %arg29[%118, %c0_44, %c0_45] : memref<8x2x32xf32, #tpu.memory_space<vmem>>, vector<1x2x32xf32>
    %120 = vector.shape_cast %119 : vector<1x2x32xf32> to vector<2x32xf32>
    %121 = vector.shape_cast %117 : vector<2x32xf32> to vector<1x2x32xf32>
    tpu.vector_store %arg29[%118, %c0_44, %c0_45], %121 {strides = array<i32>} : memref<8x2x32xf32, #tpu.memory_space<vmem>>, vector<1x2x32xf32>,
    %c1_i32 = arith.constant 1 : i32
    %c7_i32_46 = arith.constant 7 : i32
    %122 = arith.subi %c7_i32_46, %c1_i32 : i32
    %123 = arith.index_cast %c1_i32 : i32 to index
    %c0_47 = arith.constant 0 : index
    %c0_48 = arith.constant 0 : index
    %124 = vector.load %arg27[%123, %c0_47, %c0_48] : memref<8x2x256xf32, #tpu.memory_space<vmem>>, vector<1x2x256xf32>
    %125 = vector.shape_cast %124 : vector<1x2x256xf32> to vector<2x256xf32>
    %126 = vector.extract_strided_slice %125 {offsets = [0, 0], sizes = [2, 128], strides = [1, 1]} : vector<2x256xf32> to vector<2x128xf32>
    %127 = arith.index_cast %122 : i32 to index
    %c0_49 = arith.constant 0 : index
    %c0_50 = arith.constant 0 : index
    %128 = vector.load %arg27[%127, %c0_49, %c0_50] : memref<8x2x256xf32, #tpu.memory_space<vmem>>, vector<1x2x256xf32>
    %129 = vector.shape_cast %128 : vector<1x2x256xf32> to vector<2x256xf32>
    %130 = vector.extract_strided_slice %129 {offsets = [0, 128], sizes = [2, 128], strides = [1, 1]} : vector<2x256xf32> to vector<2x128xf32>
    %cst_51 = arith.constant dense<0.000000e+00> : vector<4x256xf32>
    %131 = tpu.matmul %111, %80, %cst_51 {dimension_numbers = #tpu.dot_dimension_numbers<[1], [0], [0], [1], [0, 0, 1, 1], [], []>} : vector<4x32xf32>, vector<32x256xf32>, vector<4x256xf32> -> vector<4x256xf32>
    %132 = vector.extract_strided_slice %131 {offsets = [0, 0], sizes = [2, 128], strides = [1, 1]} : vector<4x256xf32> to vector<2x128xf32>
    %133 = arith.addf %126, %132 : vector<2x128xf32>
    %134 = vector.extract_strided_slice %131 {offsets = [2, 128], sizes = [2, 128], strides = [1, 1]} : vector<4x256xf32> to vector<2x128xf32>
    %135 = arith.addf %130, %134 : vector<2x128xf32>
    %136 = tpu.concatenate %133, %135 in 0 : vector<2x128xf32>, vector<2x128xf32> -> vector<4x128xf32>
    %137 = arith.negf %136 : vector<4x128xf32>
    %138 = math.exp %137 : vector<4x128xf32>
    %cst_52 = arith.constant 1.000000e+00 : f32
    %139 = vector.broadcast %cst_52 : f32 to vector<4x128xf32>
    %140 = arith.addf %139, %138 : vector<4x128xf32>
    %141 = arith.divf %139, %140 : vector<4x128xf32>
    %142 = math.tanh %136 : vector<4x128xf32>
    %143 = vector.extract_strided_slice %141 {offsets = [0, 0], sizes = [4, 32], strides = [1, 1]} : vector<4x128xf32> to vector<4x32xf32>
    %144 = vector.extract_strided_slice %141 {offsets = [0, 32], sizes = [4, 32], strides = [1, 1]} : vector<4x128xf32> to vector<4x32xf32>
    %145 = vector.extract_strided_slice %142 {offsets = [0, 64], sizes = [4, 32], strides = [1, 1]} : vector<4x128xf32> to vector<4x32xf32>
    %146 = vector.extract_strided_slice %141 {offsets = [0, 96], sizes = [4, 32], strides = [1, 1]} : vector<4x128xf32> to vector<4x32xf32>
    %147 = arith.mulf %144, %109 : vector<4x32xf32>
    %148 = arith.mulf %143, %145 : vector<4x32xf32>
    %149 = arith.addf %147, %148 : vector<4x32xf32>
    %150 = math.tanh %149 : vector<4x32xf32>
    %151 = arith.mulf %146, %150 : vector<4x32xf32>
    %152 = vector.extract_strided_slice %151 {offsets = [0, 0], sizes = [2, 32], strides = [1, 1]} : vector<4x32xf32> to vector<2x32xf32>
    %153 = arith.index_cast %c1_i32 : i32 to index
    %c0_53 = arith.constant 0 : index
    %c0_54 = arith.constant 0 : index
    %154 = vector.load %arg28[%153, %c0_53, %c0_54] : memref<8x2x32xf32, #tpu.memory_space<vmem>>, vector<1x2x32xf32>
    %155 = vector.shape_cast %154 : vector<1x2x32xf32> to vector<2x32xf32>
    %156 = vector.shape_cast %152 : vector<2x32xf32> to vector<1x2x32xf32>
    tpu.vector_store %arg28[%153, %c0_53, %c0_54], %156 {strides = array<i32>} : memref<8x2x32xf32, #tpu.memory_space<vmem>>, vector<1x2x32xf32>,
    %157 = vector.extract_strided_slice %151 {offsets = [2, 0], sizes = [2, 32], strides = [1, 1]} : vector<4x32xf32> to vector<2x32xf32>
    %158 = arith.index_cast %122 : i32 to index
    %c0_55 = arith.constant 0 : index
    %c0_56 = arith.constant 0 : index
    %159 = vector.load %arg29[%158, %c0_55, %c0_56] : memref<8x2x32xf32, #tpu.memory_space<vmem>>, vector<1x2x32xf32>
    %160 = vector.shape_cast %159 : vector<1x2x32xf32> to vector<2x32xf32>
    %161 = vector.shape_cast %157 : vector<2x32xf32> to vector<1x2x32xf32>
    tpu.vector_store %arg29[%158, %c0_55, %c0_56], %161 {strides = array<i32>} : memref<8x2x32xf32, #tpu.memory_space<vmem>>, vector<1x2x32xf32>,
    %c2_i32 = arith.constant 2 : i32
    %c7_i32_57 = arith.constant 7 : i32
    %162 = arith.subi %c7_i32_57, %c2_i32 : i32
    %163 = arith.index_cast %c2_i32 : i32 to index
    %c0_58 = arith.constant 0 : index
    %c0_59 = arith.constant 0 : index
    %164 = vector.load %arg27[%163, %c0_58, %c0_59] : memref<8x2x256xf32, #tpu.memory_space<vmem>>, vector<1x2x256xf32>
    %165 = vector.shape_cast %164 : vector<1x2x256xf32> to vector<2x256xf32>
    %166 = vector.extract_strided_slice %165 {offsets = [0, 0], sizes = [2, 128], strides = [1, 1]} : vector<2x256xf32> to vector<2x128xf32>
    %167 = arith.index_cast %162 : i32 to index
    %c0_60 = arith.constant 0 : index
    %c0_61 = arith.constant 0 : index
    %168 = vector.load %arg27[%167, %c0_60, %c0_61] : memref<8x2x256xf32, #tpu.memory_space<vmem>>, vector<1x2x256xf32>
    %169 = vector.shape_cast %168 : vector<1x2x256xf32> to vector<2x256xf32>
    %170 = vector.extract_strided_slice %169 {offsets = [0, 128], sizes = [2, 128], strides = [1, 1]} : vector<2x256xf32> to vector<2x128xf32>
    %cst_62 = arith.constant dense<0.000000e+00> : vector<4x256xf32>
    %171 = tpu.matmul %151, %80, %cst_62 {dimension_numbers = #tpu.dot_dimension_numbers<[1], [0], [0], [1], [0, 0, 1, 1], [], []>} : vector<4x32xf32>, vector<32x256xf32>, vector<4x256xf32> -> vector<4x256xf32>
    %172 = vector.extract_strided_slice %171 {offsets = [0, 0], sizes = [2, 128], strides = [1, 1]} : vector<4x256xf32> to vector<2x128xf32>
    %173 = arith.addf %166, %172 : vector<2x128xf32>
    %174 = vector.extract_strided_slice %171 {offsets = [2, 128], sizes = [2, 128], strides = [1, 1]} : vector<4x256xf32> to vector<2x128xf32>
    %175 = arith.addf %170, %174 : vector<2x128xf32>
    %176 = tpu.concatenate %173, %175 in 0 : vector<2x128xf32>, vector<2x128xf32> -> vector<4x128xf32>
    %177 = arith.negf %176 : vector<4x128xf32>
    %178 = math.exp %177 : vector<4x128xf32>
    %cst_63 = arith.constant 1.000000e+00 : f32
    %179 = vector.broadcast %cst_63 : f32 to vector<4x128xf32>
    %180 = arith.addf %179, %178 : vector<4x128xf32>
    %181 = arith.divf %179, %180 : vector<4x128xf32>
    %182 = math.tanh %176 : vector<4x128xf32>
    %183 = vector.extract_strided_slice %181 {offsets = [0, 0], sizes = [4, 32], strides = [1, 1]} : vector<4x128xf32> to vector<4x32xf32>
    %184 = vector.extract_strided_slice %181 {offsets = [0, 32], sizes = [4, 32], strides = [1, 1]} : vector<4x128xf32> to vector<4x32xf32>
    %185 = vector.extract_strided_slice %182 {offsets = [0, 64], sizes = [4, 32], strides = [1, 1]} : vector<4x128xf32> to vector<4x32xf32>
    %186 = vector.extract_strided_slice %181 {offsets = [0, 96], sizes = [4, 32], strides = [1, 1]} : vector<4x128xf32> to vector<4x32xf32>
    %187 = arith.mulf %184, %149 : vector<4x32xf32>
    %188 = arith.mulf %183, %185 : vector<4x32xf32>
    %189 = arith.addf %187, %188 : vector<4x32xf32>
    %190 = math.tanh %189 : vector<4x32xf32>
    %191 = arith.mulf %186, %190 : vector<4x32xf32>
    %192 = vector.extract_strided_slice %191 {offsets = [0, 0], sizes = [2, 32], strides = [1, 1]} : vector<4x32xf32> to vector<2x32xf32>
    %193 = arith.index_cast %c2_i32 : i32 to index
    %c0_64 = arith.constant 0 : index
    %c0_65 = arith.constant 0 : index
    %194 = vector.load %arg28[%193, %c0_64, %c0_65] : memref<8x2x32xf32, #tpu.memory_space<vmem>>, vector<1x2x32xf32>
    %195 = vector.shape_cast %194 : vector<1x2x32xf32> to vector<2x32xf32>
    %196 = vector.shape_cast %192 : vector<2x32xf32> to vector<1x2x32xf32>
    tpu.vector_store %arg28[%193, %c0_64, %c0_65], %196 {strides = array<i32>} : memref<8x2x32xf32, #tpu.memory_space<vmem>>, vector<1x2x32xf32>,
    %197 = vector.extract_strided_slice %191 {offsets = [2, 0], sizes = [2, 32], strides = [1, 1]} : vector<4x32xf32> to vector<2x32xf32>
    %198 = arith.index_cast %162 : i32 to index
    %c0_66 = arith.constant 0 : index
    %c0_67 = arith.constant 0 : index
    %199 = vector.load %arg29[%198, %c0_66, %c0_67] : memref<8x2x32xf32, #tpu.memory_space<vmem>>, vector<1x2x32xf32>
    %200 = vector.shape_cast %199 : vector<1x2x32xf32> to vector<2x32xf32>
    %201 = vector.shape_cast %197 : vector<2x32xf32> to vector<1x2x32xf32>
    tpu.vector_store %arg29[%198, %c0_66, %c0_67], %201 {strides = array<i32>} : memref<8x2x32xf32, #tpu.memory_space<vmem>>, vector<1x2x32xf32>,
    %c3_i32 = arith.constant 3 : i32
    %c7_i32_68 = arith.constant 7 : i32
    %202 = arith.subi %c7_i32_68, %c3_i32 : i32
    %203 = arith.index_cast %c3_i32 : i32 to index
    %c0_69 = arith.constant 0 : index
    %c0_70 = arith.constant 0 : index
    %204 = vector.load %arg27[%203, %c0_69, %c0_70] : memref<8x2x256xf32, #tpu.memory_space<vmem>>, vector<1x2x256xf32>
    %205 = vector.shape_cast %204 : vector<1x2x256xf32> to vector<2x256xf32>
    %206 = vector.extract_strided_slice %205 {offsets = [0, 0], sizes = [2, 128], strides = [1, 1]} : vector<2x256xf32> to vector<2x128xf32>
    %207 = arith.index_cast %202 : i32 to index
    %c0_71 = arith.constant 0 : index
    %c0_72 = arith.constant 0 : index
    %208 = vector.load %arg27[%207, %c0_71, %c0_72] : memref<8x2x256xf32, #tpu.memory_space<vmem>>, vector<1x2x256xf32>
    %209 = vector.shape_cast %208 : vector<1x2x256xf32> to vector<2x256xf32>
    %210 = vector.extract_strided_slice %209 {offsets = [0, 128], sizes = [2, 128], strides = [1, 1]} : vector<2x256xf32> to vector<2x128xf32>
    %cst_73 = arith.constant dense<0.000000e+00> : vector<4x256xf32>
    %211 = tpu.matmul %191, %80, %cst_73 {dimension_numbers = #tpu.dot_dimension_numbers<[1], [0], [0], [1], [0, 0, 1, 1], [], []>} : vector<4x32xf32>, vector<32x256xf32>, vector<4x256xf32> -> vector<4x256xf32>
    %212 = vector.extract_strided_slice %211 {offsets = [0, 0], sizes = [2, 128], strides = [1, 1]} : vector<4x256xf32> to vector<2x128xf32>
    %213 = arith.addf %206, %212 : vector<2x128xf32>
    %214 = vector.extract_strided_slice %211 {offsets = [2, 128], sizes = [2, 128], strides = [1, 1]} : vector<4x256xf32> to vector<2x128xf32>
    %215 = arith.addf %210, %214 : vector<2x128xf32>
    %216 = tpu.concatenate %213, %215 in 0 : vector<2x128xf32>, vector<2x128xf32> -> vector<4x128xf32>
    %217 = arith.negf %216 : vector<4x128xf32>
    %218 = math.exp %217 : vector<4x128xf32>
    %cst_74 = arith.constant 1.000000e+00 : f32
    %219 = vector.broadcast %cst_74 : f32 to vector<4x128xf32>
    %220 = arith.addf %219, %218 : vector<4x128xf32>
    %221 = arith.divf %219, %220 : vector<4x128xf32>
    %222 = math.tanh %216 : vector<4x128xf32>
    %223 = vector.extract_strided_slice %221 {offsets = [0, 0], sizes = [4, 32], strides = [1, 1]} : vector<4x128xf32> to vector<4x32xf32>
    %224 = vector.extract_strided_slice %221 {offsets = [0, 32], sizes = [4, 32], strides = [1, 1]} : vector<4x128xf32> to vector<4x32xf32>
    %225 = vector.extract_strided_slice %222 {offsets = [0, 64], sizes = [4, 32], strides = [1, 1]} : vector<4x128xf32> to vector<4x32xf32>
    %226 = vector.extract_strided_slice %221 {offsets = [0, 96], sizes = [4, 32], strides = [1, 1]} : vector<4x128xf32> to vector<4x32xf32>
    %227 = arith.mulf %224, %189 : vector<4x32xf32>
    %228 = arith.mulf %223, %225 : vector<4x32xf32>
    %229 = arith.addf %227, %228 : vector<4x32xf32>
    %230 = math.tanh %229 : vector<4x32xf32>
    %231 = arith.mulf %226, %230 : vector<4x32xf32>
    %232 = vector.extract_strided_slice %231 {offsets = [0, 0], sizes = [2, 32], strides = [1, 1]} : vector<4x32xf32> to vector<2x32xf32>
    %233 = arith.index_cast %c3_i32 : i32 to index
    %c0_75 = arith.constant 0 : index
    %c0_76 = arith.constant 0 : index
    %234 = vector.load %arg28[%233, %c0_75, %c0_76] : memref<8x2x32xf32, #tpu.memory_space<vmem>>, vector<1x2x32xf32>
    %235 = vector.shape_cast %234 : vector<1x2x32xf32> to vector<2x32xf32>
    %236 = vector.shape_cast %232 : vector<2x32xf32> to vector<1x2x32xf32>
    tpu.vector_store %arg28[%233, %c0_75, %c0_76], %236 {strides = array<i32>} : memref<8x2x32xf32, #tpu.memory_space<vmem>>, vector<1x2x32xf32>,
    %237 = vector.extract_strided_slice %231 {offsets = [2, 0], sizes = [2, 32], strides = [1, 1]} : vector<4x32xf32> to vector<2x32xf32>
    %238 = arith.index_cast %202 : i32 to index
    %c0_77 = arith.constant 0 : index
    %c0_78 = arith.constant 0 : index
    %239 = vector.load %arg29[%238, %c0_77, %c0_78] : memref<8x2x32xf32, #tpu.memory_space<vmem>>, vector<1x2x32xf32>
    %240 = vector.shape_cast %239 : vector<1x2x32xf32> to vector<2x32xf32>
    %241 = vector.shape_cast %237 : vector<2x32xf32> to vector<1x2x32xf32>
    tpu.vector_store %arg29[%238, %c0_77, %c0_78], %241 {strides = array<i32>} : memref<8x2x32xf32, #tpu.memory_space<vmem>>, vector<1x2x32xf32>,
    %c4_i32 = arith.constant 4 : i32
    %c7_i32_79 = arith.constant 7 : i32
    %242 = arith.subi %c7_i32_79, %c4_i32 : i32
    %243 = arith.index_cast %c4_i32 : i32 to index
    %c0_80 = arith.constant 0 : index
    %c0_81 = arith.constant 0 : index
    %244 = vector.load %arg27[%243, %c0_80, %c0_81] : memref<8x2x256xf32, #tpu.memory_space<vmem>>, vector<1x2x256xf32>
    %245 = vector.shape_cast %244 : vector<1x2x256xf32> to vector<2x256xf32>
    %246 = vector.extract_strided_slice %245 {offsets = [0, 0], sizes = [2, 128], strides = [1, 1]} : vector<2x256xf32> to vector<2x128xf32>
    %247 = arith.index_cast %242 : i32 to index
    %c0_82 = arith.constant 0 : index
    %c0_83 = arith.constant 0 : index
    %248 = vector.load %arg27[%247, %c0_82, %c0_83] : memref<8x2x256xf32, #tpu.memory_space<vmem>>, vector<1x2x256xf32>
    %249 = vector.shape_cast %248 : vector<1x2x256xf32> to vector<2x256xf32>
    %250 = vector.extract_strided_slice %249 {offsets = [0, 128], sizes = [2, 128], strides = [1, 1]} : vector<2x256xf32> to vector<2x128xf32>
    %cst_84 = arith.constant dense<0.000000e+00> : vector<4x256xf32>
    %251 = tpu.matmul %231, %80, %cst_84 {dimension_numbers = #tpu.dot_dimension_numbers<[1], [0], [0], [1], [0, 0, 1, 1], [], []>} : vector<4x32xf32>, vector<32x256xf32>, vector<4x256xf32> -> vector<4x256xf32>
    %252 = vector.extract_strided_slice %251 {offsets = [0, 0], sizes = [2, 128], strides = [1, 1]} : vector<4x256xf32> to vector<2x128xf32>
    %253 = arith.addf %246, %252 : vector<2x128xf32>
    %254 = vector.extract_strided_slice %251 {offsets = [2, 128], sizes = [2, 128], strides = [1, 1]} : vector<4x256xf32> to vector<2x128xf32>
    %255 = arith.addf %250, %254 : vector<2x128xf32>
    %256 = tpu.concatenate %253, %255 in 0 : vector<2x128xf32>, vector<2x128xf32> -> vector<4x128xf32>
    %257 = arith.negf %256 : vector<4x128xf32>
    %258 = math.exp %257 : vector<4x128xf32>
    %cst_85 = arith.constant 1.000000e+00 : f32
    %259 = vector.broadcast %cst_85 : f32 to vector<4x128xf32>
    %260 = arith.addf %259, %258 : vector<4x128xf32>
    %261 = arith.divf %259, %260 : vector<4x128xf32>
    %262 = math.tanh %256 : vector<4x128xf32>
    %263 = vector.extract_strided_slice %261 {offsets = [0, 0], sizes = [4, 32], strides = [1, 1]} : vector<4x128xf32> to vector<4x32xf32>
    %264 = vector.extract_strided_slice %261 {offsets = [0, 32], sizes = [4, 32], strides = [1, 1]} : vector<4x128xf32> to vector<4x32xf32>
    %265 = vector.extract_strided_slice %262 {offsets = [0, 64], sizes = [4, 32], strides = [1, 1]} : vector<4x128xf32> to vector<4x32xf32>
    %266 = vector.extract_strided_slice %261 {offsets = [0, 96], sizes = [4, 32], strides = [1, 1]} : vector<4x128xf32> to vector<4x32xf32>
    %267 = arith.mulf %264, %229 : vector<4x32xf32>
    %268 = arith.mulf %263, %265 : vector<4x32xf32>
    %269 = arith.addf %267, %268 : vector<4x32xf32>
    %270 = math.tanh %269 : vector<4x32xf32>
    %271 = arith.mulf %266, %270 : vector<4x32xf32>
    %272 = vector.extract_strided_slice %271 {offsets = [0, 0], sizes = [2, 32], strides = [1, 1]} : vector<4x32xf32> to vector<2x32xf32>
    %273 = arith.index_cast %c4_i32 : i32 to index
    %c0_86 = arith.constant 0 : index
    %c0_87 = arith.constant 0 : index
    %274 = vector.load %arg28[%273, %c0_86, %c0_87] : memref<8x2x32xf32, #tpu.memory_space<vmem>>, vector<1x2x32xf32>
    %275 = vector.shape_cast %274 : vector<1x2x32xf32> to vector<2x32xf32>
    %276 = vector.shape_cast %272 : vector<2x32xf32> to vector<1x2x32xf32>
    tpu.vector_store %arg28[%273, %c0_86, %c0_87], %276 {strides = array<i32>} : memref<8x2x32xf32, #tpu.memory_space<vmem>>, vector<1x2x32xf32>,
    %277 = vector.extract_strided_slice %271 {offsets = [2, 0], sizes = [2, 32], strides = [1, 1]} : vector<4x32xf32> to vector<2x32xf32>
    %278 = arith.index_cast %242 : i32 to index
    %c0_88 = arith.constant 0 : index
    %c0_89 = arith.constant 0 : index
    %279 = vector.load %arg29[%278, %c0_88, %c0_89] : memref<8x2x32xf32, #tpu.memory_space<vmem>>, vector<1x2x32xf32>
    %280 = vector.shape_cast %279 : vector<1x2x32xf32> to vector<2x32xf32>
    %281 = vector.shape_cast %277 : vector<2x32xf32> to vector<1x2x32xf32>
    tpu.vector_store %arg29[%278, %c0_88, %c0_89], %281 {strides = array<i32>} : memref<8x2x32xf32, #tpu.memory_space<vmem>>, vector<1x2x32xf32>,
    %c5_i32 = arith.constant 5 : i32
    %c7_i32_90 = arith.constant 7 : i32
    %282 = arith.subi %c7_i32_90, %c5_i32 : i32
    %283 = arith.index_cast %c5_i32 : i32 to index
    %c0_91 = arith.constant 0 : index
    %c0_92 = arith.constant 0 : index
    %284 = vector.load %arg27[%283, %c0_91, %c0_92] : memref<8x2x256xf32, #tpu.memory_space<vmem>>, vector<1x2x256xf32>
    %285 = vector.shape_cast %284 : vector<1x2x256xf32> to vector<2x256xf32>
    %286 = vector.extract_strided_slice %285 {offsets = [0, 0], sizes = [2, 128], strides = [1, 1]} : vector<2x256xf32> to vector<2x128xf32>
    %287 = arith.index_cast %282 : i32 to index
    %c0_93 = arith.constant 0 : index
    %c0_94 = arith.constant 0 : index
    %288 = vector.load %arg27[%287, %c0_93, %c0_94] : memref<8x2x256xf32, #tpu.memory_space<vmem>>, vector<1x2x256xf32>
    %289 = vector.shape_cast %288 : vector<1x2x256xf32> to vector<2x256xf32>
    %290 = vector.extract_strided_slice %289 {offsets = [0, 128], sizes = [2, 128], strides = [1, 1]} : vector<2x256xf32> to vector<2x128xf32>
    %cst_95 = arith.constant dense<0.000000e+00> : vector<4x256xf32>
    %291 = tpu.matmul %271, %80, %cst_95 {dimension_numbers = #tpu.dot_dimension_numbers<[1], [0], [0], [1], [0, 0, 1, 1], [], []>} : vector<4x32xf32>, vector<32x256xf32>, vector<4x256xf32> -> vector<4x256xf32>
    %292 = vector.extract_strided_slice %291 {offsets = [0, 0], sizes = [2, 128], strides = [1, 1]} : vector<4x256xf32> to vector<2x128xf32>
    %293 = arith.addf %286, %292 : vector<2x128xf32>
    %294 = vector.extract_strided_slice %291 {offsets = [2, 128], sizes = [2, 128], strides = [1, 1]} : vector<4x256xf32> to vector<2x128xf32>
    %295 = arith.addf %290, %294 : vector<2x128xf32>
    %296 = tpu.concatenate %293, %295 in 0 : vector<2x128xf32>, vector<2x128xf32> -> vector<4x128xf32>
    %297 = arith.negf %296 : vector<4x128xf32>
    %298 = math.exp %297 : vector<4x128xf32>
    %cst_96 = arith.constant 1.000000e+00 : f32
    %299 = vector.broadcast %cst_96 : f32 to vector<4x128xf32>
    %300 = arith.addf %299, %298 : vector<4x128xf32>
    %301 = arith.divf %299, %300 : vector<4x128xf32>
    %302 = math.tanh %296 : vector<4x128xf32>
    %303 = vector.extract_strided_slice %301 {offsets = [0, 0], sizes = [4, 32], strides = [1, 1]} : vector<4x128xf32> to vector<4x32xf32>
    %304 = vector.extract_strided_slice %301 {offsets = [0, 32], sizes = [4, 32], strides = [1, 1]} : vector<4x128xf32> to vector<4x32xf32>
    %305 = vector.extract_strided_slice %302 {offsets = [0, 64], sizes = [4, 32], strides = [1, 1]} : vector<4x128xf32> to vector<4x32xf32>
    %306 = vector.extract_strided_slice %301 {offsets = [0, 96], sizes = [4, 32], strides = [1, 1]} : vector<4x128xf32> to vector<4x32xf32>
    %307 = arith.mulf %304, %269 : vector<4x32xf32>
    %308 = arith.mulf %303, %305 : vector<4x32xf32>
    %309 = arith.addf %307, %308 : vector<4x32xf32>
    %310 = math.tanh %309 : vector<4x32xf32>
    %311 = arith.mulf %306, %310 : vector<4x32xf32>
    %312 = vector.extract_strided_slice %311 {offsets = [0, 0], sizes = [2, 32], strides = [1, 1]} : vector<4x32xf32> to vector<2x32xf32>
    %313 = arith.index_cast %c5_i32 : i32 to index
    %c0_97 = arith.constant 0 : index
    %c0_98 = arith.constant 0 : index
    %314 = vector.load %arg28[%313, %c0_97, %c0_98] : memref<8x2x32xf32, #tpu.memory_space<vmem>>, vector<1x2x32xf32>
    %315 = vector.shape_cast %314 : vector<1x2x32xf32> to vector<2x32xf32>
    %316 = vector.shape_cast %312 : vector<2x32xf32> to vector<1x2x32xf32>
    tpu.vector_store %arg28[%313, %c0_97, %c0_98], %316 {strides = array<i32>} : memref<8x2x32xf32, #tpu.memory_space<vmem>>, vector<1x2x32xf32>,
    %317 = vector.extract_strided_slice %311 {offsets = [2, 0], sizes = [2, 32], strides = [1, 1]} : vector<4x32xf32> to vector<2x32xf32>
    %318 = arith.index_cast %282 : i32 to index
    %c0_99 = arith.constant 0 : index
    %c0_100 = arith.constant 0 : index
    %319 = vector.load %arg29[%318, %c0_99, %c0_100] : memref<8x2x32xf32, #tpu.memory_space<vmem>>, vector<1x2x32xf32>
    %320 = vector.shape_cast %319 : vector<1x2x32xf32> to vector<2x32xf32>
    %321 = vector.shape_cast %317 : vector<2x32xf32> to vector<1x2x32xf32>
    tpu.vector_store %arg29[%318, %c0_99, %c0_100], %321 {strides = array<i32>} : memref<8x2x32xf32, #tpu.memory_space<vmem>>, vector<1x2x32xf32>,
    %c6_i32 = arith.constant 6 : i32
    %c7_i32_101 = arith.constant 7 : i32
    %322 = arith.subi %c7_i32_101, %c6_i32 : i32
    %323 = arith.index_cast %c6_i32 : i32 to index
    %c0_102 = arith.constant 0 : index
    %c0_103 = arith.constant 0 : index
    %324 = vector.load %arg27[%323, %c0_102, %c0_103] : memref<8x2x256xf32, #tpu.memory_space<vmem>>, vector<1x2x256xf32>
    %325 = vector.shape_cast %324 : vector<1x2x256xf32> to vector<2x256xf32>
    %326 = vector.extract_strided_slice %325 {offsets = [0, 0], sizes = [2, 128], strides = [1, 1]} : vector<2x256xf32> to vector<2x128xf32>
    %327 = arith.index_cast %322 : i32 to index
    %c0_104 = arith.constant 0 : index
    %c0_105 = arith.constant 0 : index
    %328 = vector.load %arg27[%327, %c0_104, %c0_105] : memref<8x2x256xf32, #tpu.memory_space<vmem>>, vector<1x2x256xf32>
    %329 = vector.shape_cast %328 : vector<1x2x256xf32> to vector<2x256xf32>
    %330 = vector.extract_strided_slice %329 {offsets = [0, 128], sizes = [2, 128], strides = [1, 1]} : vector<2x256xf32> to vector<2x128xf32>
    %cst_106 = arith.constant dense<0.000000e+00> : vector<4x256xf32>
    %331 = tpu.matmul %311, %80, %cst_106 {dimension_numbers = #tpu.dot_dimension_numbers<[1], [0], [0], [1], [0, 0, 1, 1], [], []>} : vector<4x32xf32>, vector<32x256xf32>, vector<4x256xf32> -> vector<4x256xf32>
    %332 = vector.extract_strided_slice %331 {offsets = [0, 0], sizes = [2, 128], strides = [1, 1]} : vector<4x256xf32> to vector<2x128xf32>
    %333 = arith.addf %326, %332 : vector<2x128xf32>
    %334 = vector.extract_strided_slice %331 {offsets = [2, 128], sizes = [2, 128], strides = [1, 1]} : vector<4x256xf32> to vector<2x128xf32>
    %335 = arith.addf %330, %334 : vector<2x128xf32>
    %336 = tpu.concatenate %333, %335 in 0 : vector<2x128xf32>, vector<2x128xf32> -> vector<4x128xf32>
    %337 = arith.negf %336 : vector<4x128xf32>
    %338 = math.exp %337 : vector<4x128xf32>
    %cst_107 = arith.constant 1.000000e+00 : f32
    %339 = vector.broadcast %cst_107 : f32 to vector<4x128xf32>
    %340 = arith.addf %339, %338 : vector<4x128xf32>
    %341 = arith.divf %339, %340 : vector<4x128xf32>
    %342 = math.tanh %336 : vector<4x128xf32>
    %343 = vector.extract_strided_slice %341 {offsets = [0, 0], sizes = [4, 32], strides = [1, 1]} : vector<4x128xf32> to vector<4x32xf32>
    %344 = vector.extract_strided_slice %341 {offsets = [0, 32], sizes = [4, 32], strides = [1, 1]} : vector<4x128xf32> to vector<4x32xf32>
    %345 = vector.extract_strided_slice %342 {offsets = [0, 64], sizes = [4, 32], strides = [1, 1]} : vector<4x128xf32> to vector<4x32xf32>
    %346 = vector.extract_strided_slice %341 {offsets = [0, 96], sizes = [4, 32], strides = [1, 1]} : vector<4x128xf32> to vector<4x32xf32>
    %347 = arith.mulf %344, %309 : vector<4x32xf32>
    %348 = arith.mulf %343, %345 : vector<4x32xf32>
    %349 = arith.addf %347, %348 : vector<4x32xf32>
    %350 = math.tanh %349 : vector<4x32xf32>
    %351 = arith.mulf %346, %350 : vector<4x32xf32>
    %352 = vector.extract_strided_slice %351 {offsets = [0, 0], sizes = [2, 32], strides = [1, 1]} : vector<4x32xf32> to vector<2x32xf32>
    %353 = arith.index_cast %c6_i32 : i32 to index
    %c0_108 = arith.constant 0 : index
    %c0_109 = arith.constant 0 : index
    %354 = vector.load %arg28[%353, %c0_108, %c0_109] : memref<8x2x32xf32, #tpu.memory_space<vmem>>, vector<1x2x32xf32>
    %355 = vector.shape_cast %354 : vector<1x2x32xf32> to vector<2x32xf32>
    %356 = vector.shape_cast %352 : vector<2x32xf32> to vector<1x2x32xf32>
    tpu.vector_store %arg28[%353, %c0_108, %c0_109], %356 {strides = array<i32>} : memref<8x2x32xf32, #tpu.memory_space<vmem>>, vector<1x2x32xf32>,
    %357 = vector.extract_strided_slice %351 {offsets = [2, 0], sizes = [2, 32], strides = [1, 1]} : vector<4x32xf32> to vector<2x32xf32>
    %358 = arith.index_cast %322 : i32 to index
    %c0_110 = arith.constant 0 : index
    %c0_111 = arith.constant 0 : index
    %359 = vector.load %arg29[%358, %c0_110, %c0_111] : memref<8x2x32xf32, #tpu.memory_space<vmem>>, vector<1x2x32xf32>
    %360 = vector.shape_cast %359 : vector<1x2x32xf32> to vector<2x32xf32>
    %361 = vector.shape_cast %357 : vector<2x32xf32> to vector<1x2x32xf32>
    tpu.vector_store %arg29[%358, %c0_110, %c0_111], %361 {strides = array<i32>} : memref<8x2x32xf32, #tpu.memory_space<vmem>>, vector<1x2x32xf32>,
    %c7_i32_112 = arith.constant 7 : i32
    %c7_i32_113 = arith.constant 7 : i32
    %362 = arith.subi %c7_i32_113, %c7_i32_112 : i32
    %363 = arith.index_cast %c7_i32_112 : i32 to index
    %c0_114 = arith.constant 0 : index
    %c0_115 = arith.constant 0 : index
    %364 = vector.load %arg27[%363, %c0_114, %c0_115] : memref<8x2x256xf32, #tpu.memory_space<vmem>>, vector<1x2x256xf32>
    %365 = vector.shape_cast %364 : vector<1x2x256xf32> to vector<2x256xf32>
    %366 = vector.extract_strided_slice %365 {offsets = [0, 0], sizes = [2, 128], strides = [1, 1]} : vector<2x256xf32> to vector<2x128xf32>
    %367 = arith.index_cast %362 : i32 to index
    %c0_116 = arith.constant 0 : index
    %c0_117 = arith.constant 0 : index
    %368 = vector.load %arg27[%367, %c0_116, %c0_117] : memref<8x2x256xf32, #tpu.memory_space<vmem>>, vector<1x2x256xf32>
    %369 = vector.shape_cast %368 : vector<1x2x256xf32> to vector<2x256xf32>
    %370 = vector.extract_strided_slice %369 {offsets = [0, 128], sizes = [2, 128], strides = [1, 1]} : vector<2x256xf32> to vector<2x128xf32>
    %cst_118 = arith.constant dense<0.000000e+00> : vector<4x256xf32>
    %371 = tpu.matmul %351, %80, %cst_118 {dimension_numbers = #tpu.dot_dimension_numbers<[1], [0], [0], [1], [0, 0, 1, 1], [], []>} : vector<4x32xf32>, vector<32x256xf32>, vector<4x256xf32> -> vector<4x256xf32>
    %372 = vector.extract_strided_slice %371 {offsets = [0, 0], sizes = [2, 128], strides = [1, 1]} : vector<4x256xf32> to vector<2x128xf32>
    %373 = arith.addf %366, %372 : vector<2x128xf32>
    %374 = vector.extract_strided_slice %371 {offsets = [2, 128], sizes = [2, 128], strides = [1, 1]} : vector<4x256xf32> to vector<2x128xf32>
    %375 = arith.addf %370, %374 : vector<2x128xf32>
    %376 = tpu.concatenate %373, %375 in 0 : vector<2x128xf32>, vector<2x128xf32> -> vector<4x128xf32>
    %377 = arith.negf %376 : vector<4x128xf32>
    %378 = math.exp %377 : vector<4x128xf32>
    %cst_119 = arith.constant 1.000000e+00 : f32
    %379 = vector.broadcast %cst_119 : f32 to vector<4x128xf32>
    %380 = arith.addf %379, %378 : vector<4x128xf32>
    %381 = arith.divf %379, %380 : vector<4x128xf32>
    %382 = math.tanh %376 : vector<4x128xf32>
    %383 = vector.extract_strided_slice %381 {offsets = [0, 0], sizes = [4, 32], strides = [1, 1]} : vector<4x128xf32> to vector<4x32xf32>
    %384 = vector.extract_strided_slice %381 {offsets = [0, 32], sizes = [4, 32], strides = [1, 1]} : vector<4x128xf32> to vector<4x32xf32>
    %385 = vector.extract_strided_slice %382 {offsets = [0, 64], sizes = [4, 32], strides = [1, 1]} : vector<4x128xf32> to vector<4x32xf32>
    %386 = vector.extract_strided_slice %381 {offsets = [0, 96], sizes = [4, 32], strides = [1, 1]} : vector<4x128xf32> to vector<4x32xf32>
    %387 = arith.mulf %384, %349 : vector<4x32xf32>
    %388 = arith.mulf %383, %385 : vector<4x32xf32>
    %389 = arith.addf %387, %388 : vector<4x32xf32>
    %390 = math.tanh %389 : vector<4x32xf32>
    %391 = arith.mulf %386, %390 : vector<4x32xf32>
    %392 = vector.extract_strided_slice %391 {offsets = [0, 0], sizes = [2, 32], strides = [1, 1]} : vector<4x32xf32> to vector<2x32xf32>
    %393 = arith.index_cast %c7_i32_112 : i32 to index
    %c0_120 = arith.constant 0 : index
    %c0_121 = arith.constant 0 : index
    %394 = vector.load %arg28[%393, %c0_120, %c0_121] : memref<8x2x32xf32, #tpu.memory_space<vmem>>, vector<1x2x32xf32>
    %395 = vector.shape_cast %394 : vector<1x2x32xf32> to vector<2x32xf32>
    %396 = vector.shape_cast %392 : vector<2x32xf32> to vector<1x2x32xf32>
    tpu.vector_store %arg28[%393, %c0_120, %c0_121], %396 {strides = array<i32>} : memref<8x2x32xf32, #tpu.memory_space<vmem>>, vector<1x2x32xf32>,
    %397 = vector.extract_strided_slice %391 {offsets = [2, 0], sizes = [2, 32], strides = [1, 1]} : vector<4x32xf32> to vector<2x32xf32>
    %398 = arith.index_cast %362 : i32 to index
    %c0_122 = arith.constant 0 : index
    %c0_123 = arith.constant 0 : index
    %399 = vector.load %arg29[%398, %c0_122, %c0_123] : memref<8x2x32xf32, #tpu.memory_space<vmem>>, vector<1x2x32xf32>
    %400 = vector.shape_cast %399 : vector<1x2x32xf32> to vector<2x32xf32>
    %401 = vector.shape_cast %397 : vector<2x32xf32> to vector<1x2x32xf32>
    tpu.vector_store %arg29[%398, %c0_122, %c0_123], %401 {strides = array<i32>} : memref<8x2x32xf32, #tpu.memory_space<vmem>>, vector<1x2x32xf32>,
    %c8_i32 = arith.constant 8 : i32
    %c0_124 = arith.constant 0 : index
    %c0_125 = arith.constant 0 : index
    %c0_126 = arith.constant 0 : index
    %402 = vector.load %arg28[%c0_124, %c0_125, %c0_126] : memref<8x2x32xf32, #tpu.memory_space<vmem>>, vector<8x2x32xf32>
    %c0_127 = arith.constant 0 : index
    %c0_128 = arith.constant 0 : index
    %c0_129 = arith.constant 0 : index
    %403 = vector.load %arg29[%c0_127, %c0_128, %c0_129] : memref<8x2x32xf32, #tpu.memory_space<vmem>>, vector<8x2x32xf32>
    %404 = tpu.concatenate %402, %403 in 2 : vector<8x2x32xf32>, vector<8x2x32xf32> -> vector<8x2x64xf32>
    %405 = vector.shape_cast %404 : vector<8x2x64xf32> to vector<16x64xf32>
    %c0_130 = arith.constant 0 : index
    %c0_131 = arith.constant 0 : index
    %406 = vector.load %arg13[%c0_130, %c0_131] : memref<64x256xf32, #tpu.memory_space<vmem>>, vector<64x256xf32>
    %cst_132 = arith.constant dense<0.000000e+00> : vector<16x256xf32>
    %407 = tpu.matmul %405, %406, %cst_132 {dimension_numbers = #tpu.dot_dimension_numbers<[1], [0], [0], [1], [0, 0, 1, 1], [], []>} : vector<16x64xf32>, vector<64x256xf32>, vector<16x256xf32> -> vector<16x256xf32>
    %c0_133 = arith.constant 0 : index
    %c0_134 = arith.constant 0 : index
    %408 = vector.load %arg15[%c0_133, %c0_134] : memref<1x256xf32, #tpu.memory_space<vmem>>, vector<1x256xf32>
    %409 = vector.broadcast %408 : vector<1x256xf32> to vector<16x256xf32>
    %410 = arith.addf %407, %409 : vector<16x256xf32>
    %411 = vector.shape_cast %410 : vector<16x256xf32> to vector<8x2x256xf32>
    %c0_135 = arith.constant 0 : index
    %c0_136 = arith.constant 0 : index
    %c0_137 = arith.constant 0 : index
    %412 = vector.load %arg27[%c0_135, %c0_136, %c0_137] : memref<8x2x256xf32, #tpu.memory_space<vmem>>, vector<8x2x256xf32>
    tpu.vector_store %arg27[%c0_135, %c0_136, %c0_137], %411 {strides = array<i32>} : memref<8x2x256xf32, #tpu.memory_space<vmem>>, vector<8x2x256xf32>,
    %c0_138 = arith.constant 0 : index
    %c0_139 = arith.constant 0 : index
    %413 = vector.load %arg14[%c0_138, %c0_139] : memref<32x256xf32, #tpu.memory_space<vmem>>, vector<32x256xf32>
    %cst_140 = arith.constant 0.000000e+00 : f32
    %414 = vector.broadcast %cst_140 : f32 to vector<4x32xf32>
    %c0_i32_141 = arith.constant 0 : i32
    %c7_i32_142 = arith.constant 7 : i32
    %415 = arith.subi %c7_i32_142, %c0_i32_141 : i32
    %416 = arith.index_cast %c0_i32_141 : i32 to index
    %c0_143 = arith.constant 0 : index
    %c0_144 = arith.constant 0 : index
    %417 = vector.load %arg27[%416, %c0_143, %c0_144] : memref<8x2x256xf32, #tpu.memory_space<vmem>>, vector<1x2x256xf32>
    %418 = vector.shape_cast %417 : vector<1x2x256xf32> to vector<2x256xf32>
    %419 = vector.extract_strided_slice %418 {offsets = [0, 0], sizes = [2, 128], strides = [1, 1]} : vector<2x256xf32> to vector<2x128xf32>
    %420 = arith.index_cast %415 : i32 to index
    %c0_145 = arith.constant 0 : index
    %c0_146 = arith.constant 0 : index
    %421 = vector.load %arg27[%420, %c0_145, %c0_146] : memref<8x2x256xf32, #tpu.memory_space<vmem>>, vector<1x2x256xf32>
    %422 = vector.shape_cast %421 : vector<1x2x256xf32> to vector<2x256xf32>
    %423 = vector.extract_strided_slice %422 {offsets = [0, 128], sizes = [2, 128], strides = [1, 1]} : vector<2x256xf32> to vector<2x128xf32>
    %cst_147 = arith.constant dense<0.000000e+00> : vector<4x256xf32>
    %424 = tpu.matmul %414, %413, %cst_147 {dimension_numbers = #tpu.dot_dimension_numbers<[1], [0], [0], [1], [0, 0, 1, 1], [], []>} : vector<4x32xf32>, vector<32x256xf32>, vector<4x256xf32> -> vector<4x256xf32>
    %425 = vector.extract_strided_slice %424 {offsets = [0, 0], sizes = [2, 128], strides = [1, 1]} : vector<4x256xf32> to vector<2x128xf32>
    %426 = arith.addf %419, %425 : vector<2x128xf32>
    %427 = vector.extract_strided_slice %424 {offsets = [2, 128], sizes = [2, 128], strides = [1, 1]} : vector<4x256xf32> to vector<2x128xf32>
    %428 = arith.addf %423, %427 : vector<2x128xf32>
    %429 = tpu.concatenate %426, %428 in 0 : vector<2x128xf32>, vector<2x128xf32> -> vector<4x128xf32>
    %430 = arith.negf %429 : vector<4x128xf32>
    %431 = math.exp %430 : vector<4x128xf32>
    %cst_148 = arith.constant 1.000000e+00 : f32
    %432 = vector.broadcast %cst_148 : f32 to vector<4x128xf32>
    %433 = arith.addf %432, %431 : vector<4x128xf32>
    %434 = arith.divf %432, %433 : vector<4x128xf32>
    %435 = math.tanh %429 : vector<4x128xf32>
    %436 = vector.extract_strided_slice %434 {offsets = [0, 0], sizes = [4, 32], strides = [1, 1]} : vector<4x128xf32> to vector<4x32xf32>
    %437 = vector.extract_strided_slice %434 {offsets = [0, 32], sizes = [4, 32], strides = [1, 1]} : vector<4x128xf32> to vector<4x32xf32>
    %438 = vector.extract_strided_slice %435 {offsets = [0, 64], sizes = [4, 32], strides = [1, 1]} : vector<4x128xf32> to vector<4x32xf32>
    %439 = vector.extract_strided_slice %434 {offsets = [0, 96], sizes = [4, 32], strides = [1, 1]} : vector<4x128xf32> to vector<4x32xf32>
    %440 = arith.mulf %437, %414 : vector<4x32xf32>
    %441 = arith.mulf %436, %438 : vector<4x32xf32>
    %442 = arith.addf %440, %441 : vector<4x32xf32>
    %443 = math.tanh %442 : vector<4x32xf32>
    %444 = arith.mulf %439, %443 : vector<4x32xf32>
    %445 = vector.extract_strided_slice %444 {offsets = [0, 0], sizes = [2, 32], strides = [1, 1]} : vector<4x32xf32> to vector<2x32xf32>
    %446 = arith.index_cast %c0_i32_141 : i32 to index
    %c0_149 = arith.constant 0 : index
    %c0_150 = arith.constant 0 : index
    %447 = vector.load %arg28[%446, %c0_149, %c0_150] : memref<8x2x32xf32, #tpu.memory_space<vmem>>, vector<1x2x32xf32>
    %448 = vector.shape_cast %447 : vector<1x2x32xf32> to vector<2x32xf32>
    %449 = vector.shape_cast %445 : vector<2x32xf32> to vector<1x2x32xf32>
    tpu.vector_store %arg28[%446, %c0_149, %c0_150], %449 {strides = array<i32>} : memref<8x2x32xf32, #tpu.memory_space<vmem>>, vector<1x2x32xf32>,
    %450 = vector.extract_strided_slice %444 {offsets = [2, 0], sizes = [2, 32], strides = [1, 1]} : vector<4x32xf32> to vector<2x32xf32>
    %451 = arith.index_cast %415 : i32 to index
    %c0_151 = arith.constant 0 : index
    %c0_152 = arith.constant 0 : index
    %452 = vector.load %arg29[%451, %c0_151, %c0_152] : memref<8x2x32xf32, #tpu.memory_space<vmem>>, vector<1x2x32xf32>
    %453 = vector.shape_cast %452 : vector<1x2x32xf32> to vector<2x32xf32>
    %454 = vector.shape_cast %450 : vector<2x32xf32> to vector<1x2x32xf32>
    tpu.vector_store %arg29[%451, %c0_151, %c0_152], %454 {strides = array<i32>} : memref<8x2x32xf32, #tpu.memory_space<vmem>>, vector<1x2x32xf32>,
    %c1_i32_153 = arith.constant 1 : i32
    %c7_i32_154 = arith.constant 7 : i32
    %455 = arith.subi %c7_i32_154, %c1_i32_153 : i32
    %456 = arith.index_cast %c1_i32_153 : i32 to index
    %c0_155 = arith.constant 0 : index
    %c0_156 = arith.constant 0 : index
    %457 = vector.load %arg27[%456, %c0_155, %c0_156] : memref<8x2x256xf32, #tpu.memory_space<vmem>>, vector<1x2x256xf32>
    %458 = vector.shape_cast %457 : vector<1x2x256xf32> to vector<2x256xf32>
    %459 = vector.extract_strided_slice %458 {offsets = [0, 0], sizes = [2, 128], strides = [1, 1]} : vector<2x256xf32> to vector<2x128xf32>
    %460 = arith.index_cast %455 : i32 to index
    %c0_157 = arith.constant 0 : index
    %c0_158 = arith.constant 0 : index
    %461 = vector.load %arg27[%460, %c0_157, %c0_158] : memref<8x2x256xf32, #tpu.memory_space<vmem>>, vector<1x2x256xf32>
    %462 = vector.shape_cast %461 : vector<1x2x256xf32> to vector<2x256xf32>
    %463 = vector.extract_strided_slice %462 {offsets = [0, 128], sizes = [2, 128], strides = [1, 1]} : vector<2x256xf32> to vector<2x128xf32>
    %cst_159 = arith.constant dense<0.000000e+00> : vector<4x256xf32>
    %464 = tpu.matmul %444, %413, %cst_159 {dimension_numbers = #tpu.dot_dimension_numbers<[1], [0], [0], [1], [0, 0, 1, 1], [], []>} : vector<4x32xf32>, vector<32x256xf32>, vector<4x256xf32> -> vector<4x256xf32>
    %465 = vector.extract_strided_slice %464 {offsets = [0, 0], sizes = [2, 128], strides = [1, 1]} : vector<4x256xf32> to vector<2x128xf32>
    %466 = arith.addf %459, %465 : vector<2x128xf32>
    %467 = vector.extract_strided_slice %464 {offsets = [2, 128], sizes = [2, 128], strides = [1, 1]} : vector<4x256xf32> to vector<2x128xf32>
    %468 = arith.addf %463, %467 : vector<2x128xf32>
    %469 = tpu.concatenate %466, %468 in 0 : vector<2x128xf32>, vector<2x128xf32> -> vector<4x128xf32>
    %470 = arith.negf %469 : vector<4x128xf32>
    %471 = math.exp %470 : vector<4x128xf32>
    %cst_160 = arith.constant 1.000000e+00 : f32
    %472 = vector.broadcast %cst_160 : f32 to vector<4x128xf32>
    %473 = arith.addf %472, %471 : vector<4x128xf32>
    %474 = arith.divf %472, %473 : vector<4x128xf32>
    %475 = math.tanh %469 : vector<4x128xf32>
    %476 = vector.extract_strided_slice %474 {offsets = [0, 0], sizes = [4, 32], strides = [1, 1]} : vector<4x128xf32> to vector<4x32xf32>
    %477 = vector.extract_strided_slice %474 {offsets = [0, 32], sizes = [4, 32], strides = [1, 1]} : vector<4x128xf32> to vector<4x32xf32>
    %478 = vector.extract_strided_slice %475 {offsets = [0, 64], sizes = [4, 32], strides = [1, 1]} : vector<4x128xf32> to vector<4x32xf32>
    %479 = vector.extract_strided_slice %474 {offsets = [0, 96], sizes = [4, 32], strides = [1, 1]} : vector<4x128xf32> to vector<4x32xf32>
    %480 = arith.mulf %477, %442 : vector<4x32xf32>
    %481 = arith.mulf %476, %478 : vector<4x32xf32>
    %482 = arith.addf %480, %481 : vector<4x32xf32>
    %483 = math.tanh %482 : vector<4x32xf32>
    %484 = arith.mulf %479, %483 : vector<4x32xf32>
    %485 = vector.extract_strided_slice %484 {offsets = [0, 0], sizes = [2, 32], strides = [1, 1]} : vector<4x32xf32> to vector<2x32xf32>
    %486 = arith.index_cast %c1_i32_153 : i32 to index
    %c0_161 = arith.constant 0 : index
    %c0_162 = arith.constant 0 : index
    %487 = vector.load %arg28[%486, %c0_161, %c0_162] : memref<8x2x32xf32, #tpu.memory_space<vmem>>, vector<1x2x32xf32>
    %488 = vector.shape_cast %487 : vector<1x2x32xf32> to vector<2x32xf32>
    %489 = vector.shape_cast %485 : vector<2x32xf32> to vector<1x2x32xf32>
    tpu.vector_store %arg28[%486, %c0_161, %c0_162], %489 {strides = array<i32>} : memref<8x2x32xf32, #tpu.memory_space<vmem>>, vector<1x2x32xf32>,
    %490 = vector.extract_strided_slice %484 {offsets = [2, 0], sizes = [2, 32], strides = [1, 1]} : vector<4x32xf32> to vector<2x32xf32>
    %491 = arith.index_cast %455 : i32 to index
    %c0_163 = arith.constant 0 : index
    %c0_164 = arith.constant 0 : index
    %492 = vector.load %arg29[%491, %c0_163, %c0_164] : memref<8x2x32xf32, #tpu.memory_space<vmem>>, vector<1x2x32xf32>
    %493 = vector.shape_cast %492 : vector<1x2x32xf32> to vector<2x32xf32>
    %494 = vector.shape_cast %490 : vector<2x32xf32> to vector<1x2x32xf32>
    tpu.vector_store %arg29[%491, %c0_163, %c0_164], %494 {strides = array<i32>} : memref<8x2x32xf32, #tpu.memory_space<vmem>>, vector<1x2x32xf32>,
    %c2_i32_165 = arith.constant 2 : i32
    %c7_i32_166 = arith.constant 7 : i32
    %495 = arith.subi %c7_i32_166, %c2_i32_165 : i32
    %496 = arith.index_cast %c2_i32_165 : i32 to index
    %c0_167 = arith.constant 0 : index
    %c0_168 = arith.constant 0 : index
    %497 = vector.load %arg27[%496, %c0_167, %c0_168] : memref<8x2x256xf32, #tpu.memory_space<vmem>>, vector<1x2x256xf32>
    %498 = vector.shape_cast %497 : vector<1x2x256xf32> to vector<2x256xf32>
    %499 = vector.extract_strided_slice %498 {offsets = [0, 0], sizes = [2, 128], strides = [1, 1]} : vector<2x256xf32> to vector<2x128xf32>
    %500 = arith.index_cast %495 : i32 to index
    %c0_169 = arith.constant 0 : index
    %c0_170 = arith.constant 0 : index
    %501 = vector.load %arg27[%500, %c0_169, %c0_170] : memref<8x2x256xf32, #tpu.memory_space<vmem>>, vector<1x2x256xf32>
    %502 = vector.shape_cast %501 : vector<1x2x256xf32> to vector<2x256xf32>
    %503 = vector.extract_strided_slice %502 {offsets = [0, 128], sizes = [2, 128], strides = [1, 1]} : vector<2x256xf32> to vector<2x128xf32>
    %cst_171 = arith.constant dense<0.000000e+00> : vector<4x256xf32>
    %504 = tpu.matmul %484, %413, %cst_171 {dimension_numbers = #tpu.dot_dimension_numbers<[1], [0], [0], [1], [0, 0, 1, 1], [], []>} : vector<4x32xf32>, vector<32x256xf32>, vector<4x256xf32> -> vector<4x256xf32>
    %505 = vector.extract_strided_slice %504 {offsets = [0, 0], sizes = [2, 128], strides = [1, 1]} : vector<4x256xf32> to vector<2x128xf32>
    %506 = arith.addf %499, %505 : vector<2x128xf32>
    %507 = vector.extract_strided_slice %504 {offsets = [2, 128], sizes = [2, 128], strides = [1, 1]} : vector<4x256xf32> to vector<2x128xf32>
    %508 = arith.addf %503, %507 : vector<2x128xf32>
    %509 = tpu.concatenate %506, %508 in 0 : vector<2x128xf32>, vector<2x128xf32> -> vector<4x128xf32>
    %510 = arith.negf %509 : vector<4x128xf32>
    %511 = math.exp %510 : vector<4x128xf32>
    %cst_172 = arith.constant 1.000000e+00 : f32
    %512 = vector.broadcast %cst_172 : f32 to vector<4x128xf32>
    %513 = arith.addf %512, %511 : vector<4x128xf32>
    %514 = arith.divf %512, %513 : vector<4x128xf32>
    %515 = math.tanh %509 : vector<4x128xf32>
    %516 = vector.extract_strided_slice %514 {offsets = [0, 0], sizes = [4, 32], strides = [1, 1]} : vector<4x128xf32> to vector<4x32xf32>
    %517 = vector.extract_strided_slice %514 {offsets = [0, 32], sizes = [4, 32], strides = [1, 1]} : vector<4x128xf32> to vector<4x32xf32>
    %518 = vector.extract_strided_slice %515 {offsets = [0, 64], sizes = [4, 32], strides = [1, 1]} : vector<4x128xf32> to vector<4x32xf32>
    %519 = vector.extract_strided_slice %514 {offsets = [0, 96], sizes = [4, 32], strides = [1, 1]} : vector<4x128xf32> to vector<4x32xf32>
    %520 = arith.mulf %517, %482 : vector<4x32xf32>
    %521 = arith.mulf %516, %518 : vector<4x32xf32>
    %522 = arith.addf %520, %521 : vector<4x32xf32>
    %523 = math.tanh %522 : vector<4x32xf32>
    %524 = arith.mulf %519, %523 : vector<4x32xf32>
    %525 = vector.extract_strided_slice %524 {offsets = [0, 0], sizes = [2, 32], strides = [1, 1]} : vector<4x32xf32> to vector<2x32xf32>
    %526 = arith.index_cast %c2_i32_165 : i32 to index
    %c0_173 = arith.constant 0 : index
    %c0_174 = arith.constant 0 : index
    %527 = vector.load %arg28[%526, %c0_173, %c0_174] : memref<8x2x32xf32, #tpu.memory_space<vmem>>, vector<1x2x32xf32>
    %528 = vector.shape_cast %527 : vector<1x2x32xf32> to vector<2x32xf32>
    %529 = vector.shape_cast %525 : vector<2x32xf32> to vector<1x2x32xf32>
    tpu.vector_store %arg28[%526, %c0_173, %c0_174], %529 {strides = array<i32>} : memref<8x2x32xf32, #tpu.memory_space<vmem>>, vector<1x2x32xf32>,
    %530 = vector.extract_strided_slice %524 {offsets = [2, 0], sizes = [2, 32], strides = [1, 1]} : vector<4x32xf32> to vector<2x32xf32>
    %531 = arith.index_cast %495 : i32 to index
    %c0_175 = arith.constant 0 : index
    %c0_176 = arith.constant 0 : index
    %532 = vector.load %arg29[%531, %c0_175, %c0_176] : memref<8x2x32xf32, #tpu.memory_space<vmem>>, vector<1x2x32xf32>
    %533 = vector.shape_cast %532 : vector<1x2x32xf32> to vector<2x32xf32>
    %534 = vector.shape_cast %530 : vector<2x32xf32> to vector<1x2x32xf32>
    tpu.vector_store %arg29[%531, %c0_175, %c0_176], %534 {strides = array<i32>} : memref<8x2x32xf32, #tpu.memory_space<vmem>>, vector<1x2x32xf32>,
    %c3_i32_177 = arith.constant 3 : i32
    %c7_i32_178 = arith.constant 7 : i32
    %535 = arith.subi %c7_i32_178, %c3_i32_177 : i32
    %536 = arith.index_cast %c3_i32_177 : i32 to index
    %c0_179 = arith.constant 0 : index
    %c0_180 = arith.constant 0 : index
    %537 = vector.load %arg27[%536, %c0_179, %c0_180] : memref<8x2x256xf32, #tpu.memory_space<vmem>>, vector<1x2x256xf32>
    %538 = vector.shape_cast %537 : vector<1x2x256xf32> to vector<2x256xf32>
    %539 = vector.extract_strided_slice %538 {offsets = [0, 0], sizes = [2, 128], strides = [1, 1]} : vector<2x256xf32> to vector<2x128xf32>
    %540 = arith.index_cast %535 : i32 to index
    %c0_181 = arith.constant 0 : index
    %c0_182 = arith.constant 0 : index
    %541 = vector.load %arg27[%540, %c0_181, %c0_182] : memref<8x2x256xf32, #tpu.memory_space<vmem>>, vector<1x2x256xf32>
    %542 = vector.shape_cast %541 : vector<1x2x256xf32> to vector<2x256xf32>
    %543 = vector.extract_strided_slice %542 {offsets = [0, 128], sizes = [2, 128], strides = [1, 1]} : vector<2x256xf32> to vector<2x128xf32>
    %cst_183 = arith.constant dense<0.000000e+00> : vector<4x256xf32>
    %544 = tpu.matmul %524, %413, %cst_183 {dimension_numbers = #tpu.dot_dimension_numbers<[1], [0], [0], [1], [0, 0, 1, 1], [], []>} : vector<4x32xf32>, vector<32x256xf32>, vector<4x256xf32> -> vector<4x256xf32>
    %545 = vector.extract_strided_slice %544 {offsets = [0, 0], sizes = [2, 128], strides = [1, 1]} : vector<4x256xf32> to vector<2x128xf32>
    %546 = arith.addf %539, %545 : vector<2x128xf32>
    %547 = vector.extract_strided_slice %544 {offsets = [2, 128], sizes = [2, 128], strides = [1, 1]} : vector<4x256xf32> to vector<2x128xf32>
    %548 = arith.addf %543, %547 : vector<2x128xf32>
    %549 = tpu.concatenate %546, %548 in 0 : vector<2x128xf32>, vector<2x128xf32> -> vector<4x128xf32>
    %550 = arith.negf %549 : vector<4x128xf32>
    %551 = math.exp %550 : vector<4x128xf32>
    %cst_184 = arith.constant 1.000000e+00 : f32
    %552 = vector.broadcast %cst_184 : f32 to vector<4x128xf32>
    %553 = arith.addf %552, %551 : vector<4x128xf32>
    %554 = arith.divf %552, %553 : vector<4x128xf32>
    %555 = math.tanh %549 : vector<4x128xf32>
    %556 = vector.extract_strided_slice %554 {offsets = [0, 0], sizes = [4, 32], strides = [1, 1]} : vector<4x128xf32> to vector<4x32xf32>
    %557 = vector.extract_strided_slice %554 {offsets = [0, 32], sizes = [4, 32], strides = [1, 1]} : vector<4x128xf32> to vector<4x32xf32>
    %558 = vector.extract_strided_slice %555 {offsets = [0, 64], sizes = [4, 32], strides = [1, 1]} : vector<4x128xf32> to vector<4x32xf32>
    %559 = vector.extract_strided_slice %554 {offsets = [0, 96], sizes = [4, 32], strides = [1, 1]} : vector<4x128xf32> to vector<4x32xf32>
    %560 = arith.mulf %557, %522 : vector<4x32xf32>
    %561 = arith.mulf %556, %558 : vector<4x32xf32>
    %562 = arith.addf %560, %561 : vector<4x32xf32>
    %563 = math.tanh %562 : vector<4x32xf32>
    %564 = arith.mulf %559, %563 : vector<4x32xf32>
    %565 = vector.extract_strided_slice %564 {offsets = [0, 0], sizes = [2, 32], strides = [1, 1]} : vector<4x32xf32> to vector<2x32xf32>
    %566 = arith.index_cast %c3_i32_177 : i32 to index
    %c0_185 = arith.constant 0 : index
    %c0_186 = arith.constant 0 : index
    %567 = vector.load %arg28[%566, %c0_185, %c0_186] : memref<8x2x32xf32, #tpu.memory_space<vmem>>, vector<1x2x32xf32>
    %568 = vector.shape_cast %567 : vector<1x2x32xf32> to vector<2x32xf32>
    %569 = vector.shape_cast %565 : vector<2x32xf32> to vector<1x2x32xf32>
    tpu.vector_store %arg28[%566, %c0_185, %c0_186], %569 {strides = array<i32>} : memref<8x2x32xf32, #tpu.memory_space<vmem>>, vector<1x2x32xf32>,
    %570 = vector.extract_strided_slice %564 {offsets = [2, 0], sizes = [2, 32], strides = [1, 1]} : vector<4x32xf32> to vector<2x32xf32>
    %571 = arith.index_cast %535 : i32 to index
    %c0_187 = arith.constant 0 : index
    %c0_188 = arith.constant 0 : index
    %572 = vector.load %arg29[%571, %c0_187, %c0_188] : memref<8x2x32xf32, #tpu.memory_space<vmem>>, vector<1x2x32xf32>
    %573 = vector.shape_cast %572 : vector<1x2x32xf32> to vector<2x32xf32>
    %574 = vector.shape_cast %570 : vector<2x32xf32> to vector<1x2x32xf32>
    tpu.vector_store %arg29[%571, %c0_187, %c0_188], %574 {strides = array<i32>} : memref<8x2x32xf32, #tpu.memory_space<vmem>>, vector<1x2x32xf32>,
    %c4_i32_189 = arith.constant 4 : i32
    %c7_i32_190 = arith.constant 7 : i32
    %575 = arith.subi %c7_i32_190, %c4_i32_189 : i32
    %576 = arith.index_cast %c4_i32_189 : i32 to index
    %c0_191 = arith.constant 0 : index
    %c0_192 = arith.constant 0 : index
    %577 = vector.load %arg27[%576, %c0_191, %c0_192] : memref<8x2x256xf32, #tpu.memory_space<vmem>>, vector<1x2x256xf32>
    %578 = vector.shape_cast %577 : vector<1x2x256xf32> to vector<2x256xf32>
    %579 = vector.extract_strided_slice %578 {offsets = [0, 0], sizes = [2, 128], strides = [1, 1]} : vector<2x256xf32> to vector<2x128xf32>
    %580 = arith.index_cast %575 : i32 to index
    %c0_193 = arith.constant 0 : index
    %c0_194 = arith.constant 0 : index
    %581 = vector.load %arg27[%580, %c0_193, %c0_194] : memref<8x2x256xf32, #tpu.memory_space<vmem>>, vector<1x2x256xf32>
    %582 = vector.shape_cast %581 : vector<1x2x256xf32> to vector<2x256xf32>
    %583 = vector.extract_strided_slice %582 {offsets = [0, 128], sizes = [2, 128], strides = [1, 1]} : vector<2x256xf32> to vector<2x128xf32>
    %cst_195 = arith.constant dense<0.000000e+00> : vector<4x256xf32>
    %584 = tpu.matmul %564, %413, %cst_195 {dimension_numbers = #tpu.dot_dimension_numbers<[1], [0], [0], [1], [0, 0, 1, 1], [], []>} : vector<4x32xf32>, vector<32x256xf32>, vector<4x256xf32> -> vector<4x256xf32>
    %585 = vector.extract_strided_slice %584 {offsets = [0, 0], sizes = [2, 128], strides = [1, 1]} : vector<4x256xf32> to vector<2x128xf32>
    %586 = arith.addf %579, %585 : vector<2x128xf32>
    %587 = vector.extract_strided_slice %584 {offsets = [2, 128], sizes = [2, 128], strides = [1, 1]} : vector<4x256xf32> to vector<2x128xf32>
    %588 = arith.addf %583, %587 : vector<2x128xf32>
    %589 = tpu.concatenate %586, %588 in 0 : vector<2x128xf32>, vector<2x128xf32> -> vector<4x128xf32>
    %590 = arith.negf %589 : vector<4x128xf32>
    %591 = math.exp %590 : vector<4x128xf32>
    %cst_196 = arith.constant 1.000000e+00 : f32
    %592 = vector.broadcast %cst_196 : f32 to vector<4x128xf32>
    %593 = arith.addf %592, %591 : vector<4x128xf32>
    %594 = arith.divf %592, %593 : vector<4x128xf32>
    %595 = math.tanh %589 : vector<4x128xf32>
    %596 = vector.extract_strided_slice %594 {offsets = [0, 0], sizes = [4, 32], strides = [1, 1]} : vector<4x128xf32> to vector<4x32xf32>
    %597 = vector.extract_strided_slice %594 {offsets = [0, 32], sizes = [4, 32], strides = [1, 1]} : vector<4x128xf32> to vector<4x32xf32>
    %598 = vector.extract_strided_slice %595 {offsets = [0, 64], sizes = [4, 32], strides = [1, 1]} : vector<4x128xf32> to vector<4x32xf32>
    %599 = vector.extract_strided_slice %594 {offsets = [0, 96], sizes = [4, 32], strides = [1, 1]} : vector<4x128xf32> to vector<4x32xf32>
    %600 = arith.mulf %597, %562 : vector<4x32xf32>
    %601 = arith.mulf %596, %598 : vector<4x32xf32>
    %602 = arith.addf %600, %601 : vector<4x32xf32>
    %603 = math.tanh %602 : vector<4x32xf32>
    %604 = arith.mulf %599, %603 : vector<4x32xf32>
    %605 = vector.extract_strided_slice %604 {offsets = [0, 0], sizes = [2, 32], strides = [1, 1]} : vector<4x32xf32> to vector<2x32xf32>
    %606 = arith.index_cast %c4_i32_189 : i32 to index
    %c0_197 = arith.constant 0 : index
    %c0_198 = arith.constant 0 : index
    %607 = vector.load %arg28[%606, %c0_197, %c0_198] : memref<8x2x32xf32, #tpu.memory_space<vmem>>, vector<1x2x32xf32>
    %608 = vector.shape_cast %607 : vector<1x2x32xf32> to vector<2x32xf32>
    %609 = vector.shape_cast %605 : vector<2x32xf32> to vector<1x2x32xf32>
    tpu.vector_store %arg28[%606, %c0_197, %c0_198], %609 {strides = array<i32>} : memref<8x2x32xf32, #tpu.memory_space<vmem>>, vector<1x2x32xf32>,
    %610 = vector.extract_strided_slice %604 {offsets = [2, 0], sizes = [2, 32], strides = [1, 1]} : vector<4x32xf32> to vector<2x32xf32>
    %611 = arith.index_cast %575 : i32 to index
    %c0_199 = arith.constant 0 : index
    %c0_200 = arith.constant 0 : index
    %612 = vector.load %arg29[%611, %c0_199, %c0_200] : memref<8x2x32xf32, #tpu.memory_space<vmem>>, vector<1x2x32xf32>
    %613 = vector.shape_cast %612 : vector<1x2x32xf32> to vector<2x32xf32>
    %614 = vector.shape_cast %610 : vector<2x32xf32> to vector<1x2x32xf32>
    tpu.vector_store %arg29[%611, %c0_199, %c0_200], %614 {strides = array<i32>} : memref<8x2x32xf32, #tpu.memory_space<vmem>>, vector<1x2x32xf32>,
    %c5_i32_201 = arith.constant 5 : i32
    %c7_i32_202 = arith.constant 7 : i32
    %615 = arith.subi %c7_i32_202, %c5_i32_201 : i32
    %616 = arith.index_cast %c5_i32_201 : i32 to index
    %c0_203 = arith.constant 0 : index
    %c0_204 = arith.constant 0 : index
    %617 = vector.load %arg27[%616, %c0_203, %c0_204] : memref<8x2x256xf32, #tpu.memory_space<vmem>>, vector<1x2x256xf32>
    %618 = vector.shape_cast %617 : vector<1x2x256xf32> to vector<2x256xf32>
    %619 = vector.extract_strided_slice %618 {offsets = [0, 0], sizes = [2, 128], strides = [1, 1]} : vector<2x256xf32> to vector<2x128xf32>
    %620 = arith.index_cast %615 : i32 to index
    %c0_205 = arith.constant 0 : index
    %c0_206 = arith.constant 0 : index
    %621 = vector.load %arg27[%620, %c0_205, %c0_206] : memref<8x2x256xf32, #tpu.memory_space<vmem>>, vector<1x2x256xf32>
    %622 = vector.shape_cast %621 : vector<1x2x256xf32> to vector<2x256xf32>
    %623 = vector.extract_strided_slice %622 {offsets = [0, 128], sizes = [2, 128], strides = [1, 1]} : vector<2x256xf32> to vector<2x128xf32>
    %cst_207 = arith.constant dense<0.000000e+00> : vector<4x256xf32>
    %624 = tpu.matmul %604, %413, %cst_207 {dimension_numbers = #tpu.dot_dimension_numbers<[1], [0], [0], [1], [0, 0, 1, 1], [], []>} : vector<4x32xf32>, vector<32x256xf32>, vector<4x256xf32> -> vector<4x256xf32>
    %625 = vector.extract_strided_slice %624 {offsets = [0, 0], sizes = [2, 128], strides = [1, 1]} : vector<4x256xf32> to vector<2x128xf32>
    %626 = arith.addf %619, %625 : vector<2x128xf32>
    %627 = vector.extract_strided_slice %624 {offsets = [2, 128], sizes = [2, 128], strides = [1, 1]} : vector<4x256xf32> to vector<2x128xf32>
    %628 = arith.addf %623, %627 : vector<2x128xf32>
    %629 = tpu.concatenate %626, %628 in 0 : vector<2x128xf32>, vector<2x128xf32> -> vector<4x128xf32>
    %630 = arith.negf %629 : vector<4x128xf32>
    %631 = math.exp %630 : vector<4x128xf32>
    %cst_208 = arith.constant 1.000000e+00 : f32
    %632 = vector.broadcast %cst_208 : f32 to vector<4x128xf32>
    %633 = arith.addf %632, %631 : vector<4x128xf32>
    %634 = arith.divf %632, %633 : vector<4x128xf32>
    %635 = math.tanh %629 : vector<4x128xf32>
    %636 = vector.extract_strided_slice %634 {offsets = [0, 0], sizes = [4, 32], strides = [1, 1]} : vector<4x128xf32> to vector<4x32xf32>
    %637 = vector.extract_strided_slice %634 {offsets = [0, 32], sizes = [4, 32], strides = [1, 1]} : vector<4x128xf32> to vector<4x32xf32>
    %638 = vector.extract_strided_slice %635 {offsets = [0, 64], sizes = [4, 32], strides = [1, 1]} : vector<4x128xf32> to vector<4x32xf32>
    %639 = vector.extract_strided_slice %634 {offsets = [0, 96], sizes = [4, 32], strides = [1, 1]} : vector<4x128xf32> to vector<4x32xf32>
    %640 = arith.mulf %637, %602 : vector<4x32xf32>
    %641 = arith.mulf %636, %638 : vector<4x32xf32>
    %642 = arith.addf %640, %641 : vector<4x32xf32>
    %643 = math.tanh %642 : vector<4x32xf32>
    %644 = arith.mulf %639, %643 : vector<4x32xf32>
    %645 = vector.extract_strided_slice %644 {offsets = [0, 0], sizes = [2, 32], strides = [1, 1]} : vector<4x32xf32> to vector<2x32xf32>
    %646 = arith.index_cast %c5_i32_201 : i32 to index
    %c0_209 = arith.constant 0 : index
    %c0_210 = arith.constant 0 : index
    %647 = vector.load %arg28[%646, %c0_209, %c0_210] : memref<8x2x32xf32, #tpu.memory_space<vmem>>, vector<1x2x32xf32>
    %648 = vector.shape_cast %647 : vector<1x2x32xf32> to vector<2x32xf32>
    %649 = vector.shape_cast %645 : vector<2x32xf32> to vector<1x2x32xf32>
    tpu.vector_store %arg28[%646, %c0_209, %c0_210], %649 {strides = array<i32>} : memref<8x2x32xf32, #tpu.memory_space<vmem>>, vector<1x2x32xf32>,
    %650 = vector.extract_strided_slice %644 {offsets = [2, 0], sizes = [2, 32], strides = [1, 1]} : vector<4x32xf32> to vector<2x32xf32>
    %651 = arith.index_cast %615 : i32 to index
    %c0_211 = arith.constant 0 : index
    %c0_212 = arith.constant 0 : index
    %652 = vector.load %arg29[%651, %c0_211, %c0_212] : memref<8x2x32xf32, #tpu.memory_space<vmem>>, vector<1x2x32xf32>
    %653 = vector.shape_cast %652 : vector<1x2x32xf32> to vector<2x32xf32>
    %654 = vector.shape_cast %650 : vector<2x32xf32> to vector<1x2x32xf32>
    tpu.vector_store %arg29[%651, %c0_211, %c0_212], %654 {strides = array<i32>} : memref<8x2x32xf32, #tpu.memory_space<vmem>>, vector<1x2x32xf32>,
    %c6_i32_213 = arith.constant 6 : i32
    %c7_i32_214 = arith.constant 7 : i32
    %655 = arith.subi %c7_i32_214, %c6_i32_213 : i32
    %656 = arith.index_cast %c6_i32_213 : i32 to index
    %c0_215 = arith.constant 0 : index
    %c0_216 = arith.constant 0 : index
    %657 = vector.load %arg27[%656, %c0_215, %c0_216] : memref<8x2x256xf32, #tpu.memory_space<vmem>>, vector<1x2x256xf32>
    %658 = vector.shape_cast %657 : vector<1x2x256xf32> to vector<2x256xf32>
    %659 = vector.extract_strided_slice %658 {offsets = [0, 0], sizes = [2, 128], strides = [1, 1]} : vector<2x256xf32> to vector<2x128xf32>
    %660 = arith.index_cast %655 : i32 to index
    %c0_217 = arith.constant 0 : index
    %c0_218 = arith.constant 0 : index
    %661 = vector.load %arg27[%660, %c0_217, %c0_218] : memref<8x2x256xf32, #tpu.memory_space<vmem>>, vector<1x2x256xf32>
    %662 = vector.shape_cast %661 : vector<1x2x256xf32> to vector<2x256xf32>
    %663 = vector.extract_strided_slice %662 {offsets = [0, 128], sizes = [2, 128], strides = [1, 1]} : vector<2x256xf32> to vector<2x128xf32>
    %cst_219 = arith.constant dense<0.000000e+00> : vector<4x256xf32>
    %664 = tpu.matmul %644, %413, %cst_219 {dimension_numbers = #tpu.dot_dimension_numbers<[1], [0], [0], [1], [0, 0, 1, 1], [], []>} : vector<4x32xf32>, vector<32x256xf32>, vector<4x256xf32> -> vector<4x256xf32>
    %665 = vector.extract_strided_slice %664 {offsets = [0, 0], sizes = [2, 128], strides = [1, 1]} : vector<4x256xf32> to vector<2x128xf32>
    %666 = arith.addf %659, %665 : vector<2x128xf32>
    %667 = vector.extract_strided_slice %664 {offsets = [2, 128], sizes = [2, 128], strides = [1, 1]} : vector<4x256xf32> to vector<2x128xf32>
    %668 = arith.addf %663, %667 : vector<2x128xf32>
    %669 = tpu.concatenate %666, %668 in 0 : vector<2x128xf32>, vector<2x128xf32> -> vector<4x128xf32>
    %670 = arith.negf %669 : vector<4x128xf32>
    %671 = math.exp %670 : vector<4x128xf32>
    %cst_220 = arith.constant 1.000000e+00 : f32
    %672 = vector.broadcast %cst_220 : f32 to vector<4x128xf32>
    %673 = arith.addf %672, %671 : vector<4x128xf32>
    %674 = arith.divf %672, %673 : vector<4x128xf32>
    %675 = math.tanh %669 : vector<4x128xf32>
    %676 = vector.extract_strided_slice %674 {offsets = [0, 0], sizes = [4, 32], strides = [1, 1]} : vector<4x128xf32> to vector<4x32xf32>
    %677 = vector.extract_strided_slice %674 {offsets = [0, 32], sizes = [4, 32], strides = [1, 1]} : vector<4x128xf32> to vector<4x32xf32>
    %678 = vector.extract_strided_slice %675 {offsets = [0, 64], sizes = [4, 32], strides = [1, 1]} : vector<4x128xf32> to vector<4x32xf32>
    %679 = vector.extract_strided_slice %674 {offsets = [0, 96], sizes = [4, 32], strides = [1, 1]} : vector<4x128xf32> to vector<4x32xf32>
    %680 = arith.mulf %677, %642 : vector<4x32xf32>
    %681 = arith.mulf %676, %678 : vector<4x32xf32>
    %682 = arith.addf %680, %681 : vector<4x32xf32>
    %683 = math.tanh %682 : vector<4x32xf32>
    %684 = arith.mulf %679, %683 : vector<4x32xf32>
    %685 = vector.extract_strided_slice %684 {offsets = [0, 0], sizes = [2, 32], strides = [1, 1]} : vector<4x32xf32> to vector<2x32xf32>
    %686 = arith.index_cast %c6_i32_213 : i32 to index
    %c0_221 = arith.constant 0 : index
    %c0_222 = arith.constant 0 : index
    %687 = vector.load %arg28[%686, %c0_221, %c0_222] : memref<8x2x32xf32, #tpu.memory_space<vmem>>, vector<1x2x32xf32>
    %688 = vector.shape_cast %687 : vector<1x2x32xf32> to vector<2x32xf32>
    %689 = vector.shape_cast %685 : vector<2x32xf32> to vector<1x2x32xf32>
    tpu.vector_store %arg28[%686, %c0_221, %c0_222], %689 {strides = array<i32>} : memref<8x2x32xf32, #tpu.memory_space<vmem>>, vector<1x2x32xf32>,
    %690 = vector.extract_strided_slice %684 {offsets = [2, 0], sizes = [2, 32], strides = [1, 1]} : vector<4x32xf32> to vector<2x32xf32>
    %691 = arith.index_cast %655 : i32 to index
    %c0_223 = arith.constant 0 : index
    %c0_224 = arith.constant 0 : index
    %692 = vector.load %arg29[%691, %c0_223, %c0_224] : memref<8x2x32xf32, #tpu.memory_space<vmem>>, vector<1x2x32xf32>
    %693 = vector.shape_cast %692 : vector<1x2x32xf32> to vector<2x32xf32>
    %694 = vector.shape_cast %690 : vector<2x32xf32> to vector<1x2x32xf32>
    tpu.vector_store %arg29[%691, %c0_223, %c0_224], %694 {strides = array<i32>} : memref<8x2x32xf32, #tpu.memory_space<vmem>>, vector<1x2x32xf32>,
    %c7_i32_225 = arith.constant 7 : i32
    %c7_i32_226 = arith.constant 7 : i32
    %695 = arith.subi %c7_i32_226, %c7_i32_225 : i32
    %696 = arith.index_cast %c7_i32_225 : i32 to index
    %c0_227 = arith.constant 0 : index
    %c0_228 = arith.constant 0 : index
    %697 = vector.load %arg27[%696, %c0_227, %c0_228] : memref<8x2x256xf32, #tpu.memory_space<vmem>>, vector<1x2x256xf32>
    %698 = vector.shape_cast %697 : vector<1x2x256xf32> to vector<2x256xf32>
    %699 = vector.extract_strided_slice %698 {offsets = [0, 0], sizes = [2, 128], strides = [1, 1]} : vector<2x256xf32> to vector<2x128xf32>
    %700 = arith.index_cast %695 : i32 to index
    %c0_229 = arith.constant 0 : index
    %c0_230 = arith.constant 0 : index
    %701 = vector.load %arg27[%700, %c0_229, %c0_230] : memref<8x2x256xf32, #tpu.memory_space<vmem>>, vector<1x2x256xf32>
    %702 = vector.shape_cast %701 : vector<1x2x256xf32> to vector<2x256xf32>
    %703 = vector.extract_strided_slice %702 {offsets = [0, 128], sizes = [2, 128], strides = [1, 1]} : vector<2x256xf32> to vector<2x128xf32>
    %cst_231 = arith.constant dense<0.000000e+00> : vector<4x256xf32>
    %704 = tpu.matmul %684, %413, %cst_231 {dimension_numbers = #tpu.dot_dimension_numbers<[1], [0], [0], [1], [0, 0, 1, 1], [], []>} : vector<4x32xf32>, vector<32x256xf32>, vector<4x256xf32> -> vector<4x256xf32>
    %705 = vector.extract_strided_slice %704 {offsets = [0, 0], sizes = [2, 128], strides = [1, 1]} : vector<4x256xf32> to vector<2x128xf32>
    %706 = arith.addf %699, %705 : vector<2x128xf32>
    %707 = vector.extract_strided_slice %704 {offsets = [2, 128], sizes = [2, 128], strides = [1, 1]} : vector<4x256xf32> to vector<2x128xf32>
    %708 = arith.addf %703, %707 : vector<2x128xf32>
    %709 = tpu.concatenate %706, %708 in 0 : vector<2x128xf32>, vector<2x128xf32> -> vector<4x128xf32>
    %710 = arith.negf %709 : vector<4x128xf32>
    %711 = math.exp %710 : vector<4x128xf32>
    %cst_232 = arith.constant 1.000000e+00 : f32
    %712 = vector.broadcast %cst_232 : f32 to vector<4x128xf32>
    %713 = arith.addf %712, %711 : vector<4x128xf32>
    %714 = arith.divf %712, %713 : vector<4x128xf32>
    %715 = math.tanh %709 : vector<4x128xf32>
    %716 = vector.extract_strided_slice %714 {offsets = [0, 0], sizes = [4, 32], strides = [1, 1]} : vector<4x128xf32> to vector<4x32xf32>
    %717 = vector.extract_strided_slice %714 {offsets = [0, 32], sizes = [4, 32], strides = [1, 1]} : vector<4x128xf32> to vector<4x32xf32>
    %718 = vector.extract_strided_slice %715 {offsets = [0, 64], sizes = [4, 32], strides = [1, 1]} : vector<4x128xf32> to vector<4x32xf32>
    %719 = vector.extract_strided_slice %714 {offsets = [0, 96], sizes = [4, 32], strides = [1, 1]} : vector<4x128xf32> to vector<4x32xf32>
    %720 = arith.mulf %717, %682 : vector<4x32xf32>
    %721 = arith.mulf %716, %718 : vector<4x32xf32>
    %722 = arith.addf %720, %721 : vector<4x32xf32>
    %723 = math.tanh %722 : vector<4x32xf32>
    %724 = arith.mulf %719, %723 : vector<4x32xf32>
    %725 = vector.extract_strided_slice %724 {offsets = [0, 0], sizes = [2, 32], strides = [1, 1]} : vector<4x32xf32> to vector<2x32xf32>
    %726 = arith.index_cast %c7_i32_225 : i32 to index
    %c0_233 = arith.constant 0 : index
    %c0_234 = arith.constant 0 : index
    %727 = vector.load %arg28[%726, %c0_233, %c0_234] : memref<8x2x32xf32, #tpu.memory_space<vmem>>, vector<1x2x32xf32>
    %728 = vector.shape_cast %727 : vector<1x2x32xf32> to vector<2x32xf32>
    %729 = vector.shape_cast %725 : vector<2x32xf32> to vector<1x2x32xf32>
    tpu.vector_store %arg28[%726, %c0_233, %c0_234], %729 {strides = array<i32>} : memref<8x2x32xf32, #tpu.memory_space<vmem>>, vector<1x2x32xf32>,
    %730 = vector.extract_strided_slice %724 {offsets = [2, 0], sizes = [2, 32], strides = [1, 1]} : vector<4x32xf32> to vector<2x32xf32>
    %731 = arith.index_cast %695 : i32 to index
    %c0_235 = arith.constant 0 : index
    %c0_236 = arith.constant 0 : index
    %732 = vector.load %arg29[%731, %c0_235, %c0_236] : memref<8x2x32xf32, #tpu.memory_space<vmem>>, vector<1x2x32xf32>
    %733 = vector.shape_cast %732 : vector<1x2x32xf32> to vector<2x32xf32>
    %734 = vector.shape_cast %730 : vector<2x32xf32> to vector<1x2x32xf32>
    tpu.vector_store %arg29[%731, %c0_235, %c0_236], %734 {strides = array<i32>} : memref<8x2x32xf32, #tpu.memory_space<vmem>>, vector<1x2x32xf32>,
    %c8_i32_237 = arith.constant 8 : i32
    %c0_238 = arith.constant 0 : index
    %c0_239 = arith.constant 0 : index
    %c0_240 = arith.constant 0 : index
    %735 = vector.load %arg28[%c0_238, %c0_239, %c0_240] : memref<8x2x32xf32, #tpu.memory_space<vmem>>, vector<8x2x32xf32>
    %c0_241 = arith.constant 0 : index
    %c0_242 = arith.constant 0 : index
    %c0_243 = arith.constant 0 : index
    %736 = vector.load %arg29[%c0_241, %c0_242, %c0_243] : memref<8x2x32xf32, #tpu.memory_space<vmem>>, vector<8x2x32xf32>
    %737 = tpu.concatenate %735, %736 in 2 : vector<8x2x32xf32>, vector<8x2x32xf32> -> vector<8x2x64xf32>
    %738 = vector.extract_strided_slice %737 {offsets = [0, 0, 0], sizes = [8, 1, 64], strides = [1, 1, 1]} : vector<8x2x64xf32> to vector<8x1x64xf32>
    %739 = vector.shape_cast %738 : vector<8x1x64xf32> to vector<8x64xf32>
    %740 = vector.extract_strided_slice %737 {offsets = [0, 1, 0], sizes = [8, 1, 64], strides = [1, 1, 1]} : vector<8x2x64xf32> to vector<8x1x64xf32>
    %741 = vector.shape_cast %740 : vector<8x1x64xf32> to vector<8x64xf32>
    %742 = vector.shape_cast %739 : vector<8x64xf32> to vector<1x8x64xf32>
    %743 = vector.shape_cast %741 : vector<8x64xf32> to vector<1x8x64xf32>
    %744 = tpu.concatenate %742, %743 in 0 : vector<1x8x64xf32>, vector<1x8x64xf32> -> vector<2x8x64xf32>
    %745 = vector.shape_cast %744 : vector<2x8x64xf32> to vector<16x64xf32>
    %c0_244 = arith.constant 0 : index
    %c0_245 = arith.constant 0 : index
    %746 = vector.load %arg16[%c0_244, %c0_245] : memref<64x192xf32, #tpu.memory_space<vmem>>, vector<64x192xf32>
    %cst_246 = arith.constant dense<0.000000e+00> : vector<16x192xf32>
    %747 = tpu.matmul %745, %746, %cst_246 {dimension_numbers = #tpu.dot_dimension_numbers<[1], [0], [0], [1], [0, 0, 1, 1], [], []>} : vector<16x64xf32>, vector<64x192xf32>, vector<16x192xf32> -> vector<16x192xf32>
    %c0_247 = arith.constant 0 : index
    %c0_248 = arith.constant 0 : index
    %748 = vector.load %arg17[%c0_247, %c0_248] : memref<1x192xf32, #tpu.memory_space<vmem>>, vector<1x192xf32>
    %749 = vector.broadcast %748 : vector<1x192xf32> to vector<16x192xf32>
    %750 = arith.addf %747, %749 : vector<16x192xf32>
    %751 = vector.extract_strided_slice %750 {offsets = [0, 0], sizes = [16, 64], strides = [1, 1]} : vector<16x192xf32> to vector<16x64xf32>
    %752 = vector.shape_cast %751 : vector<16x64xf32> to vector<2x8x64xf32>
    %753 = vector.extract_strided_slice %750 {offsets = [0, 64], sizes = [16, 64], strides = [1, 1]} : vector<16x192xf32> to vector<16x64xf32>
    %754 = vector.shape_cast %753 : vector<16x64xf32> to vector<2x8x64xf32>
    %755 = vector.extract_strided_slice %750 {offsets = [0, 128], sizes = [16, 64], strides = [1, 1]} : vector<16x192xf32> to vector<16x64xf32>
    %756 = vector.shape_cast %755 : vector<16x64xf32> to vector<2x8x64xf32>
    %757 = vector.extract_strided_slice %752 {offsets = [0, 0, 0], sizes = [2, 8, 8], strides = [1, 1, 1]} : vector<2x8x64xf32> to vector<2x8x8xf32>
    %758 = vector.extract_strided_slice %752 {offsets = [0, 0, 8], sizes = [2, 8, 8], strides = [1, 1, 1]} : vector<2x8x64xf32> to vector<2x8x8xf32>
    %759 = vector.extract_strided_slice %752 {offsets = [0, 0, 16], sizes = [2, 8, 8], strides = [1, 1, 1]} : vector<2x8x64xf32> to vector<2x8x8xf32>
    %760 = vector.extract_strided_slice %752 {offsets = [0, 0, 24], sizes = [2, 8, 8], strides = [1, 1, 1]} : vector<2x8x64xf32> to vector<2x8x8xf32>
    %761 = vector.extract_strided_slice %752 {offsets = [0, 0, 32], sizes = [2, 8, 8], strides = [1, 1, 1]} : vector<2x8x64xf32> to vector<2x8x8xf32>
    %762 = vector.extract_strided_slice %752 {offsets = [0, 0, 40], sizes = [2, 8, 8], strides = [1, 1, 1]} : vector<2x8x64xf32> to vector<2x8x8xf32>
    %763 = vector.extract_strided_slice %752 {offsets = [0, 0, 48], sizes = [2, 8, 8], strides = [1, 1, 1]} : vector<2x8x64xf32> to vector<2x8x8xf32>
    %764 = vector.extract_strided_slice %752 {offsets = [0, 0, 56], sizes = [2, 8, 8], strides = [1, 1, 1]} : vector<2x8x64xf32> to vector<2x8x8xf32>
    %765 = tpu.concatenate %757, %758, %759, %760, %761, %762, %763, %764 in 0 : vector<2x8x8xf32>, vector<2x8x8xf32>, vector<2x8x8xf32>, vector<2x8x8xf32>, vector<2x8x8xf32>, vector<2x8x8xf32>, vector<2x8x8xf32>, vector<2x8x8xf32> -> vector<16x8x8xf32>
    %766 = vector.extract_strided_slice %754 {offsets = [0, 0, 0], sizes = [2, 8, 8], strides = [1, 1, 1]} : vector<2x8x64xf32> to vector<2x8x8xf32>
    %767 = vector.extract_strided_slice %754 {offsets = [0, 0, 8], sizes = [2, 8, 8], strides = [1, 1, 1]} : vector<2x8x64xf32> to vector<2x8x8xf32>
    %768 = vector.extract_strided_slice %754 {offsets = [0, 0, 16], sizes = [2, 8, 8], strides = [1, 1, 1]} : vector<2x8x64xf32> to vector<2x8x8xf32>
    %769 = vector.extract_strided_slice %754 {offsets = [0, 0, 24], sizes = [2, 8, 8], strides = [1, 1, 1]} : vector<2x8x64xf32> to vector<2x8x8xf32>
    %770 = vector.extract_strided_slice %754 {offsets = [0, 0, 32], sizes = [2, 8, 8], strides = [1, 1, 1]} : vector<2x8x64xf32> to vector<2x8x8xf32>
    %771 = vector.extract_strided_slice %754 {offsets = [0, 0, 40], sizes = [2, 8, 8], strides = [1, 1, 1]} : vector<2x8x64xf32> to vector<2x8x8xf32>
    %772 = vector.extract_strided_slice %754 {offsets = [0, 0, 48], sizes = [2, 8, 8], strides = [1, 1, 1]} : vector<2x8x64xf32> to vector<2x8x8xf32>
    %773 = vector.extract_strided_slice %754 {offsets = [0, 0, 56], sizes = [2, 8, 8], strides = [1, 1, 1]} : vector<2x8x64xf32> to vector<2x8x8xf32>
    %774 = tpu.concatenate %766, %767, %768, %769, %770, %771, %772, %773 in 0 : vector<2x8x8xf32>, vector<2x8x8xf32>, vector<2x8x8xf32>, vector<2x8x8xf32>, vector<2x8x8xf32>, vector<2x8x8xf32>, vector<2x8x8xf32>, vector<2x8x8xf32> -> vector<16x8x8xf32>
    %775 = vector.extract_strided_slice %756 {offsets = [0, 0, 0], sizes = [2, 8, 8], strides = [1, 1, 1]} : vector<2x8x64xf32> to vector<2x8x8xf32>
    %776 = vector.extract_strided_slice %756 {offsets = [0, 0, 8], sizes = [2, 8, 8], strides = [1, 1, 1]} : vector<2x8x64xf32> to vector<2x8x8xf32>
    %777 = vector.extract_strided_slice %756 {offsets = [0, 0, 16], sizes = [2, 8, 8], strides = [1, 1, 1]} : vector<2x8x64xf32> to vector<2x8x8xf32>
    %778 = vector.extract_strided_slice %756 {offsets = [0, 0, 24], sizes = [2, 8, 8], strides = [1, 1, 1]} : vector<2x8x64xf32> to vector<2x8x8xf32>
    %779 = vector.extract_strided_slice %756 {offsets = [0, 0, 32], sizes = [2, 8, 8], strides = [1, 1, 1]} : vector<2x8x64xf32> to vector<2x8x8xf32>
    %780 = vector.extract_strided_slice %756 {offsets = [0, 0, 40], sizes = [2, 8, 8], strides = [1, 1, 1]} : vector<2x8x64xf32> to vector<2x8x8xf32>
    %781 = vector.extract_strided_slice %756 {offsets = [0, 0, 48], sizes = [2, 8, 8], strides = [1, 1, 1]} : vector<2x8x64xf32> to vector<2x8x8xf32>
    %782 = vector.extract_strided_slice %756 {offsets = [0, 0, 56], sizes = [2, 8, 8], strides = [1, 1, 1]} : vector<2x8x64xf32> to vector<2x8x8xf32>
    %783 = tpu.concatenate %775, %776, %777, %778, %779, %780, %781, %782 in 0 : vector<2x8x8xf32>, vector<2x8x8xf32>, vector<2x8x8xf32>, vector<2x8x8xf32>, vector<2x8x8xf32>, vector<2x8x8xf32>, vector<2x8x8xf32>, vector<2x8x8xf32> -> vector<16x8x8xf32>
    %cst_249 = arith.constant 8.000000e+00 : f32
    %784 = math.sqrt %cst_249 : f32
    %cst_250 = arith.constant 1.000000e+00 : f32
    %785 = arith.divf %cst_250, %784 : f32
    "tpu.trace_start"() <{level = 10 : i32, message = "bqd,bkd->bqk"}> : () -> ()
    %cst_251 = arith.constant dense<0.000000e+00> : vector<16x8x8xf32>
    %786 = tpu.matmul %765, %774, %cst_251 {dimension_numbers = #tpu.dot_dimension_numbers<[2], [2], [1], [1], [0, 0, 0, 1, 1, 1], [0], [0]>} : vector<16x8x8xf32>, vector<16x8x8xf32>, vector<16x8x8xf32> -> vector<16x8x8xf32>
    "tpu.trace_stop"() : () -> ()
    %787 = vector.broadcast %785 : f32 to vector<16x8x8xf32>
    %788 = arith.mulf %786, %787 : vector<16x8x8xf32>
    %cst_252 = arith.constant dense<0xFF800000> : vector<16x8xf32>
    %789 = vector.multi_reduction <maximumf>, %788, %cst_252 [2] : vector<16x8x8xf32> to vector<16x8xf32>
    %cst_253 = arith.constant 0xFF800000 : f32
    %790 = vector.broadcast %cst_253 : f32 to vector<16x8xf32>
    %791 = arith.maximumf %790, %789 : vector<16x8xf32>
    %792 = vector.shape_cast %791 : vector<16x8xf32> to vector<16x8x1xf32>
    %793 = vector.broadcast %792 : vector<16x8x1xf32> to vector<16x8x8xf32>
    %794 = arith.subf %788, %793 : vector<16x8x8xf32>
    %795 = math.exp %794 : vector<16x8x8xf32>
    %cst_254 = arith.constant dense<0.000000e+00> : vector<16x8xf32>
    %796 = vector.multi_reduction <add>, %795, %cst_254 [2] : vector<16x8x8xf32> to vector<16x8xf32>
    %797 = vector.shape_cast %796 : vector<16x8xf32> to vector<16x8x1xf32>
    %798 = vector.broadcast %797 : vector<16x8x1xf32> to vector<16x8x8xf32>
    %799 = arith.divf %795, %798 : vector<16x8x8xf32>
    "tpu.trace_start"() <{level = 10 : i32, message = "bqk,bkd->bqd"}> : () -> ()
    %cst_255 = arith.constant dense<0.000000e+00> : vector<16x8x8xf32>
    %800 = tpu.matmul %799, %783, %cst_255 {dimension_numbers = #tpu.dot_dimension_numbers<[2], [1], [1], [2], [0, 0, 0, 1, 1, 2], [0], [0]>} : vector<16x8x8xf32>, vector<16x8x8xf32>, vector<16x8x8xf32> -> vector<16x8x8xf32>
    "tpu.trace_stop"() : () -> ()
    %801 = vector.extract_strided_slice %800 {offsets = [0, 0, 0], sizes = [2, 8, 8], strides = [1, 1, 1]} : vector<16x8x8xf32> to vector<2x8x8xf32>
    %802 = vector.extract_strided_slice %800 {offsets = [2, 0, 0], sizes = [2, 8, 8], strides = [1, 1, 1]} : vector<16x8x8xf32> to vector<2x8x8xf32>
    %803 = vector.extract_strided_slice %800 {offsets = [4, 0, 0], sizes = [2, 8, 8], strides = [1, 1, 1]} : vector<16x8x8xf32> to vector<2x8x8xf32>
    %804 = vector.extract_strided_slice %800 {offsets = [6, 0, 0], sizes = [2, 8, 8], strides = [1, 1, 1]} : vector<16x8x8xf32> to vector<2x8x8xf32>
    %805 = vector.extract_strided_slice %800 {offsets = [8, 0, 0], sizes = [2, 8, 8], strides = [1, 1, 1]} : vector<16x8x8xf32> to vector<2x8x8xf32>
    %806 = vector.extract_strided_slice %800 {offsets = [10, 0, 0], sizes = [2, 8, 8], strides = [1, 1, 1]} : vector<16x8x8xf32> to vector<2x8x8xf32>
    %807 = vector.extract_strided_slice %800 {offsets = [12, 0, 0], sizes = [2, 8, 8], strides = [1, 1, 1]} : vector<16x8x8xf32> to vector<2x8x8xf32>
    %808 = vector.extract_strided_slice %800 {offsets = [14, 0, 0], sizes = [2, 8, 8], strides = [1, 1, 1]} : vector<16x8x8xf32> to vector<2x8x8xf32>
    %809 = tpu.concatenate %801, %802, %803, %804, %805, %806, %807, %808 in 2 : vector<2x8x8xf32>, vector<2x8x8xf32>, vector<2x8x8xf32>, vector<2x8x8xf32>, vector<2x8x8xf32>, vector<2x8x8xf32>, vector<2x8x8xf32>, vector<2x8x8xf32> -> vector<2x8x64xf32>
    %810 = vector.shape_cast %809 : vector<2x8x64xf32> to vector<16x64xf32>
    %c0_256 = arith.constant 0 : index
    %c0_257 = arith.constant 0 : index
    %811 = vector.load %arg18[%c0_256, %c0_257] : memref<64x64xf32, #tpu.memory_space<vmem>>, vector<64x64xf32>
    %cst_258 = arith.constant dense<0.000000e+00> : vector<16x64xf32>
    %812 = tpu.matmul %810, %811, %cst_258 {dimension_numbers = #tpu.dot_dimension_numbers<[1], [0], [0], [1], [0, 0, 1, 1], [], []>} : vector<16x64xf32>, vector<64x64xf32>, vector<16x64xf32> -> vector<16x64xf32>
    %c0_259 = arith.constant 0 : index
    %c0_260 = arith.constant 0 : index
    %813 = vector.load %arg19[%c0_259, %c0_260] : memref<1x64xf32, #tpu.memory_space<vmem>>, vector<1x64xf32>
    %814 = vector.broadcast %813 : vector<1x64xf32> to vector<16x64xf32>
    %815 = arith.addf %812, %814 : vector<16x64xf32>
    %816 = arith.addf %815, %745 : vector<16x64xf32>
    %cst_261 = arith.constant dense<0.000000e+00> : vector<16xf32>
    %817 = vector.multi_reduction <add>, %816, %cst_261 [1] : vector<16x64xf32> to vector<16xf32>
    %818 = vector.shape_cast %817 : vector<16xf32> to vector<16x1xf32>
    %cst_262 = arith.constant 6.400000e+01 : f32
    %819 = vector.broadcast %cst_262 : f32 to vector<16x1xf32>
    %820 = arith.divf %818, %819 : vector<16x1xf32>
    %821 = vector.broadcast %820 : vector<16x1xf32> to vector<16x64xf32>
    %822 = arith.subf %816, %821 : vector<16x64xf32>
    %823 = arith.mulf %822, %822 : vector<16x64xf32>
    %cst_263 = arith.constant dense<0.000000e+00> : vector<16xf32>
    %824 = vector.multi_reduction <add>, %823, %cst_263 [1] : vector<16x64xf32> to vector<16xf32>
    %825 = vector.shape_cast %824 : vector<16xf32> to vector<16x1xf32>
    %cst_264 = arith.constant 6.400000e+01 : f32
    %826 = vector.broadcast %cst_264 : f32 to vector<16x1xf32>
    %827 = arith.divf %825, %826 : vector<16x1xf32>
    %828 = vector.broadcast %820 : vector<16x1xf32> to vector<16x64xf32>
    %829 = arith.subf %816, %828 : vector<16x64xf32>
    %cst_265 = arith.constant 9.99999974E-6 : f32
    %830 = vector.broadcast %cst_265 : f32 to vector<16x1xf32>
    %831 = arith.addf %827, %830 : vector<16x1xf32>
    %832 = math.rsqrt %831 : vector<16x1xf32>
    %833 = vector.broadcast %832 : vector<16x1xf32> to vector<16x64xf32>
    %834 = arith.mulf %829, %833 : vector<16x64xf32>
    %c0_266 = arith.constant 0 : index
    %c0_267 = arith.constant 0 : index
    %835 = vector.load %arg20[%c0_266, %c0_267] : memref<1x64xf32, #tpu.memory_space<vmem>>, vector<1x64xf32>
    %836 = vector.broadcast %835 : vector<1x64xf32> to vector<16x64xf32>
    %837 = arith.mulf %834, %836 : vector<16x64xf32>
    %c0_268 = arith.constant 0 : index
    %c0_269 = arith.constant 0 : index
    %838 = vector.load %arg21[%c0_268, %c0_269] : memref<1x64xf32, #tpu.memory_space<vmem>>, vector<1x64xf32>
    %839 = vector.broadcast %838 : vector<1x64xf32> to vector<16x64xf32>
    %840 = arith.addf %837, %839 : vector<16x64xf32>
    %c0_270 = arith.constant 0 : index
    %c0_271 = arith.constant 0 : index
    %841 = vector.load %arg22[%c0_270, %c0_271] : memref<64x128xf32, #tpu.memory_space<vmem>>, vector<64x128xf32>
    %cst_272 = arith.constant dense<0.000000e+00> : vector<16x128xf32>
    %842 = tpu.matmul %840, %841, %cst_272 {dimension_numbers = #tpu.dot_dimension_numbers<[1], [0], [0], [1], [0, 0, 1, 1], [], []>} : vector<16x64xf32>, vector<64x128xf32>, vector<16x128xf32> -> vector<16x128xf32>
    %c0_273 = arith.constant 0 : index
    %c0_274 = arith.constant 0 : index
    %843 = vector.load %arg23[%c0_273, %c0_274] : memref<1x128xf32, #tpu.memory_space<vmem>>, vector<1x128xf32>
    %844 = vector.broadcast %843 : vector<1x128xf32> to vector<16x128xf32>
    %845 = arith.addf %842, %844 : vector<16x128xf32>
    %cst_275 = arith.constant 0.000000e+00 : f32
    %846 = vector.broadcast %cst_275 : f32 to vector<16x128xf32>
    %847 = arith.maximumf %845, %846 : vector<16x128xf32>
    %c0_276 = arith.constant 0 : index
    %c0_277 = arith.constant 0 : index
    %848 = vector.load %arg24[%c0_276, %c0_277] : memref<128x128xf32, #tpu.memory_space<vmem>>, vector<128x128xf32>
    %cst_278 = arith.constant dense<0.000000e+00> : vector<16x128xf32>
    %849 = tpu.matmul %847, %848, %cst_278 {dimension_numbers = #tpu.dot_dimension_numbers<[1], [0], [0], [1], [0, 0, 1, 1], [], []>} : vector<16x128xf32>, vector<128x128xf32>, vector<16x128xf32> -> vector<16x128xf32>
    %c0_279 = arith.constant 0 : index
    %c0_280 = arith.constant 0 : index
    %850 = vector.load %arg25[%c0_279, %c0_280] : memref<1x128xf32, #tpu.memory_space<vmem>>, vector<1x128xf32>
    %851 = vector.broadcast %850 : vector<1x128xf32> to vector<16x128xf32>
    %852 = arith.addf %849, %851 : vector<16x128xf32>
    %853 = vector.shape_cast %852 : vector<16x128xf32> to vector<2x8x128xf32>
    %c0_281 = arith.constant 0 : index
    %c0_282 = arith.constant 0 : index
    %c0_283 = arith.constant 0 : index
    %854 = vector.load %arg26[%c0_281, %c0_282, %c0_283] : memref<2x8x128xf32, #tpu.memory_space<vmem>>, vector<2x8x128xf32>
    tpu.vector_store %arg26[%c0_281, %c0_282, %c0_283], %853 {strides = array<i32>} : memref<2x8x128xf32, #tpu.memory_space<vmem>>, vector<2x8x128xf32>,
    return
  }
  func.func @transform_0(%arg0: i32) -> (i32, i32, i32) {
    %c0_i32 = arith.constant 0 : i32
    %c0_i32_0 = arith.constant 0 : i32
    %c0_i32_1 = arith.constant 0 : i32
    %c0_i32_2 = arith.constant 0 : i32
    return %c0_i32, %c0_i32_0, %c0_i32_1 : i32, i32, i32
  }
  func.func @transform_1(%arg0: i32) -> (i32, i32) {
    %c0_i32 = arith.constant 0 : i32
    %c0_i32_0 = arith.constant 0 : i32
    %c0_i32_1 = arith.constant 0 : i32
    return %c0_i32, %c0_i32_0 : i32, i32
  }
  func.func @transform_2(%arg0: i32) -> (i32, i32) {
    %c0_i32 = arith.constant 0 : i32
    %c0_i32_0 = arith.constant 0 : i32
    %c0_i32_1 = arith.constant 0 : i32
    return %c0_i32, %c0_i32_0 : i32, i32
  }
  func.func @transform_3(%arg0: i32) -> (i32, i32) {
    %c0_i32 = arith.constant 0 : i32
    %c0_i32_0 = arith.constant 0 : i32
    %c0_i32_1 = arith.constant 0 : i32
    return %c0_i32, %c0_i32_0 : i32, i32
  }
  func.func @transform_4(%arg0: i32) -> (i32, i32) {
    %c0_i32 = arith.constant 0 : i32
    %c0_i32_0 = arith.constant 0 : i32
    %c0_i32_1 = arith.constant 0 : i32
    return %c0_i32, %c0_i32_0 : i32, i32
  }
  func.func @transform_5(%arg0: i32) -> (i32, i32) {
    %c0_i32 = arith.constant 0 : i32
    %c0_i32_0 = arith.constant 0 : i32
    %c0_i32_1 = arith.constant 0 : i32
    return %c0_i32, %c0_i32_0 : i32, i32
  }
  func.func @transform_6(%arg0: i32) -> (i32, i32) {
    %c0_i32 = arith.constant 0 : i32
    %c0_i32_0 = arith.constant 0 : i32
    %c0_i32_1 = arith.constant 0 : i32
    return %c0_i32, %c0_i32_0 : i32, i32
  }
  func.func @transform_7(%arg0: i32) -> (i32, i32) {
    %c0_i32 = arith.constant 0 : i32
    %c0_i32_0 = arith.constant 0 : i32
    %c0_i32_1 = arith.constant 0 : i32
    return %c0_i32, %c0_i32_0 : i32, i32
  }
  func.func @transform_8(%arg0: i32) -> (i32, i32) {
    %c0_i32 = arith.constant 0 : i32
    %c0_i32_0 = arith.constant 0 : i32
    %c0_i32_1 = arith.constant 0 : i32
    return %c0_i32, %c0_i32_0 : i32, i32
  }
  func.func @transform_9(%arg0: i32) -> (i32, i32) {
    %c0_i32 = arith.constant 0 : i32
    %c0_i32_0 = arith.constant 0 : i32
    %c0_i32_1 = arith.constant 0 : i32
    return %c0_i32, %c0_i32_0 : i32, i32
  }
  func.func @transform_10(%arg0: i32) -> (i32, i32) {
    %c0_i32 = arith.constant 0 : i32
    %c0_i32_0 = arith.constant 0 : i32
    %c0_i32_1 = arith.constant 0 : i32
    return %c0_i32, %c0_i32_0 : i32, i32
  }
  func.func @transform_11(%arg0: i32) -> (i32, i32) {
    %c0_i32 = arith.constant 0 : i32
    %c0_i32_0 = arith.constant 0 : i32
    %c0_i32_1 = arith.constant 0 : i32
    return %c0_i32, %c0_i32_0 : i32, i32
  }
  func.func @transform_12(%arg0: i32) -> (i32, i32) {
    %c0_i32 = arith.constant 0 : i32
    %c0_i32_0 = arith.constant 0 : i32
    %c0_i32_1 = arith.constant 0 : i32
    return %c0_i32, %c0_i32_0 : i32, i32
  }
  func.func @transform_13(%arg0: i32) -> (i32, i32) {
    %c0_i32 = arith.constant 0 : i32
    %c0_i32_0 = arith.constant 0 : i32
    %c0_i32_1 = arith.constant 0 : i32
    return %c0_i32, %c0_i32_0 : i32, i32
  }
  func.func @transform_14(%arg0: i32) -> (i32, i32) {
    %c0_i32 = arith.constant 0 : i32
    %c0_i32_0 = arith.constant 0 : i32
    %c0_i32_1 = arith.constant 0 : i32
    return %c0_i32, %c0_i32_0 : i32, i32
  }
  func.func @transform_15(%arg0: i32) -> (i32, i32) {
    %c0_i32 = arith.constant 0 : i32
    %c0_i32_0 = arith.constant 0 : i32
    %c0_i32_1 = arith.constant 0 : i32
    return %c0_i32, %c0_i32_0 : i32, i32
  }
  func.func @transform_16(%arg0: i32) -> (i32, i32) {
    %c0_i32 = arith.constant 0 : i32
    %c0_i32_0 = arith.constant 0 : i32
    %c0_i32_1 = arith.constant 0 : i32
    return %c0_i32, %c0_i32_0 : i32, i32
  }
  func.func @transform_17(%arg0: i32) -> (i32, i32) {
    %c0_i32 = arith.constant 0 : i32
    %c0_i32_0 = arith.constant 0 : i32
    %c0_i32_1 = arith.constant 0 : i32
    return %c0_i32, %c0_i32_0 : i32, i32
  }
  func.func @transform_18(%arg0: i32) -> (i32, i32) {
    %c0_i32 = arith.constant 0 : i32
    %c0_i32_0 = arith.constant 0 : i32
    %c0_i32_1 = arith.constant 0 : i32
    return %c0_i32, %c0_i32_0 : i32, i32
  }
  func.func @transform_19(%arg0: i32) -> (i32, i32) {
    %c0_i32 = arith.constant 0 : i32
    %c0_i32_0 = arith.constant 0 : i32
    %c0_i32_1 = arith.constant 0 : i32
    return %c0_i32, %c0_i32_0 : i32, i32
  }
  func.func @transform_20(%arg0: i32) -> (i32, i32) {
    %c0_i32 = arith.constant 0 : i32
    %c0_i32_0 = arith.constant 0 : i32
    %c0_i32_1 = arith.constant 0 : i32
    return %c0_i32, %c0_i32_0 : i32, i32
  }
  func.func @transform_21(%arg0: i32) -> (i32, i32) {
    %c0_i32 = arith.constant 0 : i32
    %c0_i32_0 = arith.constant 0 : i32
    %c0_i32_1 = arith.constant 0 : i32
    return %c0_i32, %c0_i32_0 : i32, i32
  }
  func.func @transform_22(%arg0: i32) -> (i32, i32) {
    %c0_i32 = arith.constant 0 : i32
    %c0_i32_0 = arith.constant 0 : i32
    %c0_i32_1 = arith.constant 0 : i32
    return %c0_i32, %c0_i32_0 : i32, i32
  }
  func.func @transform_23(%arg0: i32) -> (i32, i32) {
    %c0_i32 = arith.constant 0 : i32
    %c0_i32_0 = arith.constant 0 : i32
    %c0_i32_1 = arith.constant 0 : i32
    return %c0_i32, %c0_i32_0 : i32, i32
  }
  func.func @transform_24(%arg0: i32) -> (i32, i32) {
    %c0_i32 = arith.constant 0 : i32
    %c0_i32_0 = arith.constant 0 : i32
    %c0_i32_1 = arith.constant 0 : i32
    return %c0_i32, %c0_i32_0 : i32, i32
  }
  func.func @transform_25(%arg0: i32) -> (i32, i32, i32) {
    %c0_i32 = arith.constant 0 : i32
    %c0_i32_0 = arith.constant 0 : i32
    %c0_i32_1 = arith.constant 0 : i32
    %c0_i32_2 = arith.constant 0 : i32
    return %c0_i32, %c0_i32_0, %c0_i32_1 : i32, i32, i32
  }
}

</mosaic_0001>

<bundles_post_ra>
// kernel: cnn_lstm_attention_forward.1
= control target key start
LH: loop header
LB: loop body
LE: loop exit
PB: predicated region body
PF: predicated region fallthrough
CT: control target
= control target key end

     0   :  { %s9814_s0 = inlined_call_operand.vmem [shape: f32[2,8,4], index: 0, kind: input, shape index: {}]   ;;  %s9815_s1 = inlined_call_operand.vmem [shape: f32[20,64], index: 1, kind: input, shape index: {}]   ;;  %s9816_s2 = inlined_call_operand.vmem [shape: f32[1,64], index: 2, kind: input, shape index: {}]   ;;  %s9817_s3 = inlined_call_operand.hbm [shape: f32[1,64], index: 3, kind: input, shape index: {}]   ;;  %s9818_s4 = inlined_call_operand.hbm [shape: f32[1,64], index: 4, kind: input, shape index: {}]   ;;  %s9819_s5 = inlined_call_operand.hbm [shape: f32[192,128], index: 5, kind: input, shape index: {}]   ;;  %s9820_s6 = inlined_call_operand.hbm [shape: f32[1,128], index: 6, kind: input, shape index: {}]   ;;  %s9821_s7 = inlined_call_operand.hbm [shape: f32[1,128], index: 7, kind: input, shape index: {}]   ;;  %s9822_s8 = inlined_call_operand.hbm [shape: f32[1,128], index: 8, kind: input, shape index: {}]   ;;  %s9823_s9 = inlined_call_operand.hbm [shape: f32[128,256], index: 9, kind: input, shape index: {}]   ;;  %s9824_s10 = inlined_call_operand.vmem [shape: f32[32,256], index: 10, kind: input, shape index: {}]   ;;  %s9825_s11 = inlined_call_operand.vmem [shape: f32[1,256], index: 11, kind: input, shape index: {}]   ;;  %s9826_s12 = inlined_call_operand.hbm [shape: f32[64,256], index: 12, kind: input, shape index: {}]   ;;  %s9827_s13 = inlined_call_operand.hbm [shape: f32[32,256], index: 13, kind: input, shape index: {}]   ;;  %s9828_s14 = inlined_call_operand.vmem [shape: f32[1,256], index: 14, kind: input, shape index: {}]   ;;  %s9829_s15 = inlined_call_operand.hbm [shape: f32[64,192], index: 15, kind: input, shape index: {}]   ;;  %s9830_s16 = inlined_call_operand.hbm [shape: f32[1,192], index: 16, kind: input, shape index: {}]   ;;  %s9831_s17 = inlined_call_operand.hbm [shape: f32[64,64], index: 17, kind: input, shape index: {}]   ;;  %s9832_s18 = inlined_call_operand.hbm [shape: f32[1,64], index: 18, kind: input, shape index: {}]   ;;  %s9833_s19 = inlined_call_operand.hbm [shape: f32[1,64], index: 19, kind: input, shape index: {}]   ;;  %s9834_s20 = inlined_call_operand.hbm [shape: f32[1,64], index: 20, kind: input, shape index: {}]   ;;  %s9835_s21 = inlined_call_operand.hbm [shape: f32[64,128], index: 21, kind: input, shape index: {}]   ;;  %s9836_s22 = inlined_call_operand.hbm [shape: f32[1,128], index: 22, kind: input, shape index: {}]   ;;  %s9837_s23 = inlined_call_operand.hbm [shape: f32[128,128], index: 23, kind: input, shape index: {}]   ;;  %s9838_s24 = inlined_call_operand.hbm [shape: f32[1,128], index: 24, kind: input, shape index: {}]   ;;  %s9839_s25 = inlined_call_operand.vmem [shape: f32[2,8,128], index: 25, kind: output, shape index: {}]  }
   0x1   :  { %9849 = sst [smem:[#allocation44_spill]] %s9814_s0 }
   0x2   :  { %9850 = sst [smem:[#allocation45_spill]] %s9815_s1 }
   0x3   :  { %9851 = sst [smem:[#allocation46_spill]] %s9816_s2 }
   0x4   :  { %9852 = sst [smem:[#allocation47_spill]] %s9817_s3 }
   0x5   :  { %9853 = sst [smem:[#allocation48_spill]] %s9818_s4 }
   0x6   :  { %9854 = sst [smem:[#allocation49_spill]] %s9819_s5 }
   0x7   :  { %9855 = sst [smem:[#allocation50_spill]] %s9820_s6 }
   0x8   :  { %9856 = sst [smem:[#allocation51_spill]] %s9821_s7 }
   0x9   :  { %9857 = sst [smem:[#allocation52_spill]] %s9822_s8 }
   0xa   :  { %9858 = sst [smem:[#allocation53_spill]] %s9823_s9 }
   0xb   :  { %30 = vsyncpa [#allocation6], 0 }
   0xc   :  { %31 = vsyncpa [#allocation8], 0 }
   0xd   :  { %32 = vsyncpa [#allocation11], 0 }
   0xe   :  { %33 = vsyncpa [#allocation14], 0 }
   0xf   :  { %34 = vsyncpa [#allocation17], 0 }
  0x10   :  { %35 = vsyncpa [#allocation20], 0 }
  0x11   :  { %36 = vsyncpa [#allocation23], 0 }
  0x12   :  { %37 = vsyncpa [#allocation26], 0 }
  0x13   :  { %38 = vsyncpa [#allocation29], 0 }
  0x14   :  { %39 = vsyncpa [#allocation32], 0  ;;  %s8270_s29 = smov [#allocation7]   ;;  %s8271_s6 = smov [#allocation10]  }
  0x15   :  { %s62_s2 = sshll.u32 %s8270_s29, 4  ;;  %s84_s30 = sshll.u32 %s8271_s6, 4  ;;  %s63_s2 = int_to_ptr.vmem [resolvable:$true] %s62_s2  ;;  %s85_s30 = int_to_ptr.vmem [resolvable:$true] %s84_s30 }
  0x16   :  { %s9859_s26 = sld [smem:[#allocation48_spill]] }
  0x1c   :  { %s7832_s1 = scalar_lea.hbm %s9859_s26, 16 }
  0x1d   :  { %p7833_p0 = scmp.ne.s32.totalorder %s9859_s26, %s7832_s1  ;;  %p7836_p1 = scmp.lt.u32.totalorder %s7832_s1, %s9859_s26 }
  0x1f   :  { %p7838_p2 = pnand %p7836_p1, %p7833_p0 }
  0x21   :  { %7841 = shalt.err (!%p7838_p2)
}
  0x22   :  { %s7842_s9 = scalar_lea.vmem %s63_s2, 16  ;;  %s7846_s5 = scalar_lea.vmem %s63_s2, 32 }
  0x23   :  { %p7843_p3 = scmp.ne.s32.totalorder %s63_s2, %s7842_s9  ;;  %p7847_p4 = scmp.lt.s32.totalorder %s63_s2, %s63_s2 }
  0x24   :  { %p7848_p5 = scmp.lt.s32.totalorder %s7846_s5, %s7842_s9 }
  0x26   :  { %p7849_p6 = por %p7848_p5, %p7847_p4 }
  0x28   :  { %p7850_p7 = pnand %p7849_p6, %p7843_p3 }
  0x2a   :  { %7853 = shalt.err (!%p7850_p7)
}
  0x2b   :  { %65 = dma.hbm_to_vmem [thread:$0]  %s9859_s26, 16, %s63_s2, [#allocation8]  }
  0x2c   :  { %s9860_s3 = sld [smem:[#allocation50_spill]] }
  0x32   :  { %s7854_s8 = scalar_lea.hbm %s9860_s3, 16 }
  0x33   :  { %p7855_p8 = scmp.ne.s32.totalorder %s9860_s3, %s7854_s8  ;;  %p7858_p9 = scmp.lt.u32.totalorder %s7854_s8, %s9860_s3 }
  0x35   :  { %p7860_p10 = pnand %p7858_p9, %p7855_p8 }
  0x37   :  { %7863 = shalt.err (!%p7860_p10)
}
  0x38   :  { %s7864_s9 = scalar_lea.vmem %s85_s30, 16  ;;  %s7868_s5 = scalar_lea.vmem %s85_s30, 32 }
  0x39   :  { %p7865_p11 = scmp.ne.s32.totalorder %s85_s30, %s7864_s9  ;;  %p7869_p12 = scmp.lt.s32.totalorder %s85_s30, %s85_s30 }
  0x3a   :  { %p7870_p13 = scmp.lt.s32.totalorder %s7868_s5, %s7864_s9 }
  0x3c   :  { %p7871_p0 = por %p7870_p13, %p7869_p12 }
  0x3e   :  { %p7872_p1 = pnand %p7871_p0, %p7865_p11 }
  0x40   :  { %7875 = shalt.err (!%p7872_p1)
}
  0x41   :  { %87 = dma.hbm_to_vmem [thread:$0]  %s9860_s3, 16, %s85_s30, [#allocation11]  }
  0x42   :  { %s8272_s0 = smov [#allocation13]   ;;  %s9861_s8 = sld [smem:[#allocation52_spill]] }
  0x43   :  { %s104_s29 = sshll.u32 %s8272_s0, 4  ;;  %s105_s29 = int_to_ptr.vmem [resolvable:$true] %s104_s29 }
  0x48   :  { %s7876_s27 = scalar_lea.hbm %s9861_s8, 16 }
  0x49   :  { %p7877_p2 = scmp.ne.s32.totalorder %s9861_s8, %s7876_s27  ;;  %p7880_p3 = scmp.lt.u32.totalorder %s7876_s27, %s9861_s8 }
  0x4b   :  { %p7882_p4 = pnand %p7880_p3, %p7877_p2 }
  0x4d   :  { %7885 = shalt.err (!%p7882_p4)
}
  0x4e   :  { %s7886_s5 = scalar_lea.vmem %s105_s29, 16  ;;  %s7890_s30 = scalar_lea.vmem %s105_s29, 32 }
  0x4f   :  { %p7887_p5 = scmp.ne.s32.totalorder %s105_s29, %s7886_s5  ;;  %p7891_p6 = scmp.lt.s32.totalorder %s105_s29, %s105_s29 }
  0x50   :  { %p7892_p7 = scmp.lt.s32.totalorder %s7890_s30, %s7886_s5 }
  0x52   :  { %p7893_p8 = por %p7892_p7, %p7891_p6 }
  0x54   :  { %p7894_p9 = pnand %p7893_p8, %p7887_p5 }
  0x56   :  { %7897 = shalt.err (!%p7894_p9)
}
  0x57   :  { %107 = dma.hbm_to_vmem [thread:$0]  %s9861_s8, 16, %s105_s29, [#allocation14]  }
  0x58   :  { %s8273_s26 = smov [#allocation16]   ;;  %s8274_s6 = smov [#allocation19]  }
  0x59   :  { %s129_s0 = sshll.u32 %s8273_s26, 4  ;;  %s155_s7 = sshll.u32 %s8274_s6, 4  ;;  %s130_s0 = int_to_ptr.vmem [resolvable:$true] %s129_s0  ;;  %s156_s7 = int_to_ptr.vmem [resolvable:$true] %s155_s7 }
  0x5a   :  { %s7898_s4 = scalar_lea.hbm %s9826_s12, 2048 }
  0x5b   :  { %p7899_p10 = scmp.ne.s32.totalorder %s9826_s12, %s7898_s4  ;;  %p7902_p11 = scmp.lt.u32.totalorder %s7898_s4, %s9826_s12 }
  0x5d   :  { %p7904_p12 = pnand %p7902_p11, %p7899_p10 }
  0x5f   :  { %7907 = shalt.err (!%p7904_p12)
}
  0x60   :  { %s7908_s29 = scalar_lea.vmem %s130_s0, 2048  ;;  %p7913_p0 = scmp.lt.s32.totalorder %s130_s0, %s130_s0 }
  0x61   :  { %p7909_p13 = scmp.ne.s32.totalorder %s130_s0, %s7908_s29  ;;  %p7914_p1 = scmp.lt.s32.totalorder %s7908_s29, %s7908_s29 }
  0x63   :  { %p7915_p2 = por %p7914_p1, %p7913_p0 }
  0x65   :  { %p7916_p3 = pnand %p7915_p2, %p7909_p13 }
  0x67   :  { %7919 = shalt.err (!%p7916_p3)
}
  0x68   :  { %s8275_s8 = smov 256   ;;  %s8276_s3 = smov 16  }
  0x69   :  { %135 = dma.hbm_to_vmem [thread:$0]  %s9826_s12, 2048, %s130_s0, [#allocation17], %s8275_s8, %s8275_s8, %s8276_s3  }
  0x6a   :  { %s7920_s1 = scalar_lea.hbm %s9829_s15, 2048 }
  0x6b   :  { %p7921_p4 = scmp.ne.s32.totalorder %s9829_s15, %s7920_s1  ;;  %p7924_p5 = scmp.lt.u32.totalorder %s7920_s1, %s9829_s15 }
  0x6d   :  { %p7926_p6 = pnand %p7924_p5, %p7921_p4 }
  0x6f   :  { %7929 = shalt.err (!%p7926_p6)
}
  0x70   :  { %s7930_s30 = scalar_lea.vmem %s156_s7, 2048  ;;  %p7935_p8 = scmp.lt.s32.totalorder %s156_s7, %s156_s7 }
  0x71   :  { %p7931_p7 = scmp.ne.s32.totalorder %s156_s7, %s7930_s30  ;;  %p7936_p9 = scmp.lt.s32.totalorder %s7930_s30, %s7930_s30 }
  0x73   :  { %p7937_p10 = por %p7936_p9, %p7935_p8 }
  0x75   :  { %p7938_p11 = pnand %p7937_p10, %p7931_p7 }
  0x77   :  { %7941 = shalt.err (!%p7938_p11)
}
  0x78   :  { %161 = dma.hbm_to_vmem [thread:$0]  %s9829_s15, 2048, %s156_s7, [#allocation20], %s8275_s8, %s8275_s8, %s8276_s3  }
  0x79   :  { %s8277_s29 = smov [#allocation22]   ;;  %s8278_s26 = smov [#allocation25]  }
  0x7a   :  { %s177_s2 = sshll.u32 %s8277_s29, 4  ;;  %s200_s6 = sshll.u32 %s8278_s26, 4  ;;  %s178_s2 = int_to_ptr.vmem [resolvable:$true] %s177_s2  ;;  %s201_s6 = int_to_ptr.vmem [resolvable:$true] %s200_s6 }
  0x7b   :  { %s7942_s4 = scalar_lea.hbm %s9831_s17, 1024 }
  0x7c   :  { %p7943_p12 = scmp.ne.s32.totalorder %s9831_s17, %s7942_s4  ;;  %p7946_p13 = scmp.lt.u32.totalorder %s7942_s4, %s9831_s17 }
  0x7e   :  { %p7948_p0 = pnand %p7946_p13, %p7943_p12 }
  0x80   :  { %7951 = shalt.err (!%p7948_p0)
}
  0x81   :  { %s7952_s15 = scalar_lea.vmem %s178_s2, 1024  ;;  %p7957_p2 = scmp.lt.s32.totalorder %s178_s2, %s178_s2 }
  0x82   :  { %p7953_p1 = scmp.ne.s32.totalorder %s178_s2, %s7952_s15  ;;  %p7958_p3 = scmp.lt.s32.totalorder %s7952_s15, %s7952_s15 }
  0x84   :  { %p7959_p4 = por %p7958_p3, %p7957_p2 }
  0x86   :  { %p7960_p5 = pnand %p7959_p4, %p7953_p1 }
  0x88   :  { %7963 = shalt.err (!%p7960_p5)
}
  0x89   :  { %s8279_s7 = smov 128   ;;  %s8280_s12 = smov 8  }
  0x8a   :  { %183 = dma.hbm_to_vmem [thread:$0]  %s9831_s17, 1024, %s178_s2, [#allocation23], %s8279_s7, %s8279_s7, %s8280_s12  }
  0x8b   :  { %s7964_s1 = scalar_lea.hbm %s9833_s19, 16 }
  0x8c   :  { %p7965_p6 = scmp.ne.s32.totalorder %s9833_s19, %s7964_s1  ;;  %p7968_p7 = scmp.lt.u32.totalorder %s7964_s1, %s9833_s19 }
  0x8e   :  { %p7970_p8 = pnand %p7968_p7, %p7965_p6 }
  0x90   :  { %7973 = shalt.err (!%p7970_p8)
}
  0x91   :  { %s7974_s30 = scalar_lea.vmem %s201_s6, 16  ;;  %s7978_s15 = scalar_lea.vmem %s201_s6, 32 }
  0x92   :  { %p7975_p9 = scmp.ne.s32.totalorder %s201_s6, %s7974_s30  ;;  %p7979_p10 = scmp.lt.s32.totalorder %s201_s6, %s201_s6 }
  0x93   :  { %p7980_p11 = scmp.lt.s32.totalorder %s7978_s15, %s7974_s30 }
  0x95   :  { %p7981_p12 = por %p7980_p11, %p7979_p10 }
  0x97   :  { %p7982_p13 = pnand %p7981_p12, %p7975_p9 }
  0x99   :  { %7985 = shalt.err (!%p7982_p13)
}
  0x9a   :  { %203 = dma.hbm_to_vmem [thread:$0]  %s9833_s19, 16, %s201_s6, [#allocation26]  }
  0x9b   :  { %s8281_s0 = smov [#allocation28]   ;;  %s8282_s26 = smov [#allocation31]  }
  0x9c   :  { %s219_s29 = sshll.u32 %s8281_s0, 4  ;;  %s241_s27 = sshll.u32 %s8282_s26, 4  ;;  %s220_s29 = int_to_ptr.vmem [resolvable:$true] %s219_s29  ;;  %s242_s27 = int_to_ptr.vmem [resolvable:$true] %s241_s27 }
  0x9d   :  { %s7986_s28 = scalar_lea.hbm %s9835_s21, 1024 }
  0x9e   :  { %p7987_p0 = scmp.ne.s32.totalorder %s9835_s21, %s7986_s28  ;;  %p7990_p1 = scmp.lt.u32.totalorder %s7986_s28, %s9835_s21 }
  0xa0   :  { %p7992_p2 = pnand %p7990_p1, %p7987_p0 }
  0xa2   :  { %7995 = shalt.err (!%p7992_p2)
}
  0xa3   :  { %s7996_s19 = scalar_lea.vmem %s220_s29, 1024  ;;  %p8001_p4 = scmp.lt.s32.totalorder %s220_s29, %s220_s29 }
  0xa4   :  { %p7997_p3 = scmp.ne.s32.totalorder %s220_s29, %s7996_s19  ;;  %p8002_p5 = scmp.lt.s32.totalorder %s7996_s19, %s7996_s19 }
  0xa6   :  { %p8003_p6 = por %p8002_p5, %p8001_p4 }
  0xa8   :  { %p8004_p7 = pnand %p8003_p6, %p7997_p3 }
  0xaa   :  { %8007 = shalt.err (!%p8004_p7)
}
  0xab   :  { %225 = dma.hbm_to_vmem [thread:$0]  %s9835_s21, 1024, %s220_s29, [#allocation29], %s8279_s7, %s8279_s7, %s8280_s12  }
  0xac   :  { %s8008_s26 = scalar_lea.hbm %s9837_s23, 2048 }
  0xad   :  { %p8009_p8 = scmp.ne.s32.totalorder %s9837_s23, %s8008_s26  ;;  %p8012_p9 = scmp.lt.u32.totalorder %s8008_s26, %s9837_s23 }
  0xaf   :  { %p8014_p10 = pnand %p8012_p9, %p8009_p8 }
  0xb1   :  { %8017 = shalt.err (!%p8014_p10)
}
  0xb2   :  { %s8018_s5 = scalar_lea.vmem %s242_s27, 2048  ;;  %p8023_p12 = scmp.lt.s32.totalorder %s242_s27, %s242_s27 }
  0xb3   :  { %p8019_p11 = scmp.ne.s32.totalorder %s242_s27, %s8018_s5  ;;  %p8024_p13 = scmp.lt.s32.totalorder %s8018_s5, %s8018_s5 }
  0xb5   :  { %p8025_p0 = por %p8024_p13, %p8023_p12 }
  0xb7   :  { %p8026_p1 = pnand %p8025_p0, %p8019_p11 }
  0xb9   :  { %8029 = shalt.err (!%p8026_p1)
}
  0xba   :  { %247 = dma.hbm_to_vmem [thread:$0]  %s9837_s23, 2048, %s242_s27, [#allocation32], %s8279_s7, %s8279_s7, %s8280_s12  }
  0xbb   :  { %s8283_s30 = smov [#allocation5]   ;;  %s8284_s19 = smov [#allocation9]  }
  0xbc   :  { %s52_s15 = sshll.u32 %s8283_s30, 4  ;;  %s71_s6 = sshll.u32 %s8284_s19, 4  ;;  %s53_s15 = int_to_ptr.vmem [resolvable:$true] %s52_s15  ;;  %s72_s6 = int_to_ptr.vmem [resolvable:$true] %s71_s6 }
  0xbd   :  { %s9862_s0 = sld [smem:[#allocation47_spill]] }
  0xc3   :  { %s8030_s26 = scalar_lea.hbm %s9862_s0, 16 }
  0xc4   :  { %p8031_p2 = scmp.ne.s32.totalorder %s9862_s0, %s8030_s26  ;;  %p8034_p3 = scmp.lt.u32.totalorder %s8030_s26, %s9862_s0 }
  0xc6   :  { %p8036_p4 = pnand %p8034_p3, %p8031_p2 }
  0xc8   :  { %8039 = shalt.err (!%p8036_p4)
}
  0xc9   :  { %s8040_s23 = scalar_lea.vmem %s53_s15, 16  ;;  %s8044_s27 = scalar_lea.vmem %s53_s15, 32 }
  0xca   :  { %p8041_p5 = scmp.ne.s32.totalorder %s53_s15, %s8040_s23  ;;  %p8045_p6 = scmp.lt.s32.totalorder %s53_s15, %s53_s15 }
  0xcb   :  { %p8046_p7 = scmp.lt.s32.totalorder %s8044_s27, %s8040_s23 }
  0xcd   :  { %p8047_p8 = por %p8046_p7, %p8045_p6 }
  0xcf   :  { %p8048_p9 = pnand %p8047_p8, %p8041_p5 }
  0xd1   :  { %8051 = shalt.err (!%p8048_p9)
}
  0xd2   :  { %55 = dma.hbm_to_vmem [thread:$0]  %s9862_s0, 16, %s53_s15, [#allocation6]  }
  0xd3   :  { %s9863_s19 = sld [smem:[#allocation49_spill]] }
  0xd9   :  { %s8052_s17 = scalar_lea.hbm %s9863_s19, 3072 }
  0xda   :  { %p8053_p10 = scmp.ne.s32.totalorder %s9863_s19, %s8052_s17  ;;  %p8056_p11 = scmp.lt.u32.totalorder %s8052_s17, %s9863_s19 }
  0xdc   :  { %p8058_p12 = pnand %p8056_p11, %p8053_p10 }
  0xde   :  { %8061 = shalt.err (!%p8058_p12)
}
  0xdf   :  { %s8062_s28 = scalar_lea.vmem %s72_s6, 3072  ;;  %p8067_p0 = scmp.lt.s32.totalorder %s72_s6, %s72_s6 }
  0xe0   :  { %p8063_p13 = scmp.ne.s32.totalorder %s72_s6, %s8062_s28  ;;  %p8068_p1 = scmp.lt.s32.totalorder %s8062_s28, %s8062_s28 }
  0xe2   :  { %p8069_p2 = por %p8068_p1, %p8067_p0 }
  0xe4   :  { %p8070_p3 = pnand %p8069_p2, %p8063_p13 }
  0xe6   :  { %8073 = shalt.err (!%p8070_p3)
}
  0xe7   :  { %77 = dma.hbm_to_vmem [thread:$0]  %s9863_s19, 3072, %s72_s6, [#allocation8], %s8279_s7, %s8279_s7, %s8280_s12  }
  0xe8   :  { %s8285_s9 = smov [#allocation12]   ;;  %s8286_s27 = smov [#allocation15]  }
  0xe9   :  { %s94_s23 = sshll.u32 %s8285_s9, 4  ;;  %s113_s5 = sshll.u32 %s8286_s27, 4  ;;  %s95_s23 = int_to_ptr.vmem [resolvable:$true] %s94_s23  ;;  %s114_s5 = int_to_ptr.vmem [resolvable:$true] %s113_s5 }
  0xea   :  { %s9864_s30 = sld [smem:[#allocation51_spill]] }
  0xf0   :  { %s8074_s17 = scalar_lea.hbm %s9864_s30, 16 }
  0xf1   :  { %p8075_p4 = scmp.ne.s32.totalorder %s9864_s30, %s8074_s17  ;;  %p8078_p5 = scmp.lt.u32.totalorder %s8074_s17, %s9864_s30 }
  0xf3   :  { %p8080_p6 = pnand %p8078_p5, %p8075_p4 }
  0xf5   :  { %8083 = shalt.err (!%p8080_p6)
}
  0xf6   :  { %s8084_s7 = scalar_lea.vmem %s95_s23, 16  ;;  %s8088_s6 = scalar_lea.vmem %s95_s23, 32 }
  0xf7   :  { %p8085_p7 = scmp.ne.s32.totalorder %s95_s23, %s8084_s7  ;;  %p8089_p8 = scmp.lt.s32.totalorder %s95_s23, %s95_s23 }
  0xf8   :  { %p8090_p9 = scmp.lt.s32.totalorder %s8088_s6, %s8084_s7 }
  0xfa   :  { %p8091_p10 = por %p8090_p9, %p8089_p8 }
  0xfc   :  { %p8092_p11 = pnand %p8091_p10, %p8085_p7 }
  0xfe   :  { %8095 = shalt.err (!%p8092_p11)
}
  0xff   :  { %97 = dma.hbm_to_vmem [thread:$0]  %s9864_s30, 16, %s95_s23, [#allocation11]  }
 0x100   :  { %s9865_s9 = sld [smem:[#allocation53_spill]] }
 0x106   :  { %s8096_s27 = scalar_lea.hbm %s9865_s9, 4096 }
 0x107   :  { %p8097_p12 = scmp.ne.s32.totalorder %s9865_s9, %s8096_s27  ;;  %p8100_p13 = scmp.lt.u32.totalorder %s8096_s27, %s9865_s9 }
 0x109   :  { %p8102_p0 = pnand %p8100_p13, %p8097_p12 }
 0x10b   :  { %8105 = shalt.err (!%p8102_p0)
}
 0x10c   :  { %s8106_s26 = scalar_lea.vmem %s114_s5, 4096  ;;  %p8111_p2 = scmp.lt.s32.totalorder %s114_s5, %s114_s5 }
 0x10d   :  { %p8107_p1 = scmp.ne.s32.totalorder %s114_s5, %s8106_s26  ;;  %p8112_p3 = scmp.lt.s32.totalorder %s8106_s26, %s8106_s26 }
 0x10f   :  { %p8113_p4 = por %p8112_p3, %p8111_p2 }
 0x111   :  { %p8114_p5 = pnand %p8113_p4, %p8107_p1 }
 0x113   :  { %8117 = shalt.err (!%p8114_p5)
}
 0x114   :  { %119 = dma.hbm_to_vmem [thread:$0]  %s9865_s9, 4096, %s114_s5, [#allocation14], %s8275_s8, %s8275_s8, %s8276_s3  }
 0x115   :  { %s8287_s1 = smov [#allocation18]   ;;  %s8288_s7 = smov [#allocation21]  }
 0x116   :  { %s141_s4 = sshll.u32 %s8287_s1, 4  ;;  %s168_s6 = sshll.u32 %s8288_s7, 4  ;;  %s142_s4 = int_to_ptr.vmem [resolvable:$true] %s141_s4  ;;  %s169_s6 = int_to_ptr.vmem [resolvable:$true] %s168_s6 }
 0x117   :  { %s8118_s15 = scalar_lea.hbm %s9827_s13, 1024 }
 0x118   :  { %p8119_p6 = scmp.ne.s32.totalorder %s9827_s13, %s8118_s15  ;;  %p8122_p7 = scmp.lt.u32.totalorder %s8118_s15, %s9827_s13 }
 0x11a   :  { %p8124_p8 = pnand %p8122_p7, %p8119_p6 }
 0x11c   :  { %8127 = shalt.err (!%p8124_p8)
}
 0x11d   :  { %s8128_s5 = scalar_lea.vmem %s142_s4, 1024  ;;  %p8133_p10 = scmp.lt.s32.totalorder %s142_s4, %s142_s4 }
 0x11e   :  { %p8129_p9 = scmp.ne.s32.totalorder %s142_s4, %s8128_s5  ;;  %p8134_p11 = scmp.lt.s32.totalorder %s8128_s5, %s8128_s5 }
 0x120   :  { %p8135_p12 = por %p8134_p11, %p8133_p10 }
 0x122   :  { %p8136_p13 = pnand %p8135_p12, %p8129_p9 }
 0x124   :  { %8139 = shalt.err (!%p8136_p13)
}
 0x125   :  { %147 = dma.hbm_to_vmem [thread:$0]  %s9827_s13, 1024, %s142_s4, [#allocation17], %s8275_s8, %s8275_s8, %s8276_s3  }
 0x126   :  { %s8140_s23 = scalar_lea.hbm %s9830_s16, 32 }
 0x127   :  { %p8141_p0 = scmp.ne.s32.totalorder %s9830_s16, %s8140_s23  ;;  %p8144_p1 = scmp.lt.u32.totalorder %s8140_s23, %s9830_s16 }
 0x129   :  { %p8146_p2 = pnand %p8144_p1, %p8141_p0 }
 0x12b   :  { %8149 = shalt.err (!%p8146_p2)
}
 0x12c   :  { %s8150_s28 = scalar_lea.vmem %s169_s6, 32  ;;  %p8155_p4 = scmp.lt.s32.totalorder %s169_s6, %s169_s6 }
 0x12d   :  { %p8151_p3 = scmp.ne.s32.totalorder %s169_s6, %s8150_s28  ;;  %p8156_p5 = scmp.lt.s32.totalorder %s8150_s28, %s8150_s28 }
 0x12f   :  { %p8157_p6 = por %p8156_p5, %p8155_p4 }
 0x131   :  { %p8158_p7 = pnand %p8157_p6, %p8151_p3 }
 0x133   :  { %8161 = shalt.err (!%p8158_p7)
}
 0x134   :  { %171 = dma.hbm_to_vmem [thread:$0]  %s9830_s16, 32, %s169_s6, [#allocation20]  }
 0x135   :  { %s8289_s4 = smov [#allocation24]   ;;  %s8290_s0 = smov [#allocation27]  }
 0x136   :  { %s190_s15 = sshll.u32 %s8289_s4, 4  ;;  %s210_s27 = sshll.u32 %s8290_s0, 4  ;;  %s191_s15 = int_to_ptr.vmem [resolvable:$true] %s190_s15  ;;  %s211_s27 = int_to_ptr.vmem [resolvable:$true] %s210_s27 }
 0x137   :  { %s8162_s5 = scalar_lea.hbm %s9832_s18, 16 }
 0x138   :  { %p8163_p8 = scmp.ne.s32.totalorder %s9832_s18, %s8162_s5  ;;  %p8166_p9 = scmp.lt.u32.totalorder %s8162_s5, %s9832_s18 }
 0x13a   :  { %p8168_p10 = pnand %p8166_p9, %p8163_p8 }
 0x13c   :  { %8171 = shalt.err (!%p8168_p10)
}
 0x13d   :  { %s8172_s16 = scalar_lea.vmem %s191_s15, 16  ;;  %s8176_s6 = scalar_lea.vmem %s191_s15, 32 }
 0x13e   :  { %p8173_p11 = scmp.ne.s32.totalorder %s191_s15, %s8172_s16  ;;  %p8177_p12 = scmp.lt.s32.totalorder %s191_s15, %s191_s15 }
 0x13f   :  { %p8178_p13 = scmp.lt.s32.totalorder %s8176_s6, %s8172_s16 }
 0x141   :  { %p8179_p0 = por %p8178_p13, %p8177_p12 }
 0x143   :  { %p8180_p1 = pnand %p8179_p0, %p8173_p11 }
 0x145   :  { %8183 = shalt.err (!%p8180_p1)
}
 0x146   :  { %193 = dma.hbm_to_vmem [thread:$0]  %s9832_s18, 16, %s191_s15, [#allocation23]  }
 0x147   :  { %s8184_s19 = scalar_lea.hbm %s9834_s20, 16 }
 0x148   :  { %p8185_p2 = scmp.ne.s32.totalorder %s9834_s20, %s8184_s19  ;;  %p8188_p3 = scmp.lt.u32.totalorder %s8184_s19, %s9834_s20 }
 0x14a   :  { %p8190_p4 = pnand %p8188_p3, %p8185_p2 }
 0x14c   :  { %8193 = shalt.err (!%p8190_p4)
}
 0x14d   :  { %s8194_s0 = scalar_lea.vmem %s211_s27, 16  ;;  %s8198_s21 = scalar_lea.vmem %s211_s27, 32 }
 0x14e   :  { %p8195_p5 = scmp.ne.s32.totalorder %s211_s27, %s8194_s0  ;;  %p8199_p6 = scmp.lt.s32.totalorder %s211_s27, %s211_s27 }
 0x14f   :  { %p8200_p7 = scmp.lt.s32.totalorder %s8198_s21, %s8194_s0 }
 0x151   :  { %p8201_p8 = por %p8200_p7, %p8199_p6 }
 0x153   :  { %p8202_p9 = pnand %p8201_p8, %p8195_p5 }
 0x155   :  { %8205 = shalt.err (!%p8202_p9)
}
 0x156   :  { %213 = dma.hbm_to_vmem [thread:$0]  %s9834_s20, 16, %s211_s27, [#allocation26]  }
 0x157   :  { %s8291_s29 = smov [#allocation30]   ;;  %s8292_s9 = smov [#allocation33]  }
 0x158   :  { %s232_s5 = sshll.u32 %s8291_s29, 4  ;;  %s254_s17 = sshll.u32 %s8292_s9, 4  ;;  %s233_s5 = int_to_ptr.vmem [resolvable:$true] %s232_s5  ;;  %s255_s17 = int_to_ptr.vmem [resolvable:$true] %s254_s17 }
 0x159   :  { %s8206_s16 = scalar_lea.hbm %s9836_s22, 16 }
 0x15a   :  { %p8207_p10 = scmp.ne.s32.totalorder %s9836_s22, %s8206_s16  ;;  %p8210_p11 = scmp.lt.u32.totalorder %s8206_s16, %s9836_s22 }
 0x15c   :  { %p8212_p12 = pnand %p8210_p11, %p8207_p10 }
 0x15e   :  { %8215 = shalt.err (!%p8212_p12)
}
 0x15f   :  { %s8216_s20 = scalar_lea.vmem %s233_s5, 16  ;;  %s8220_s27 = scalar_lea.vmem %s233_s5, 32 }
 0x160   :  { %p8217_p13 = scmp.ne.s32.totalorder %s233_s5, %s8216_s20  ;;  %p8221_p0 = scmp.lt.s32.totalorder %s233_s5, %s233_s5 }
 0x161   :  { %p8222_p1 = scmp.lt.s32.totalorder %s8220_s27, %s8216_s20 }
 0x163   :  { %p8223_p2 = por %p8222_p1, %p8221_p0 }
 0x165   :  { %p8224_p3 = pnand %p8223_p2, %p8217_p13 }
 0x167   :  { %8227 = shalt.err (!%p8224_p3)
}
 0x168   :  { %235 = dma.hbm_to_vmem [thread:$0]  %s9836_s22, 16, %s233_s5, [#allocation29]  }
 0x169   :  { %s8228_s8 = scalar_lea.hbm %s9838_s24, 16 }
 0x16a   :  { %p8229_p4 = scmp.ne.s32.totalorder %s9838_s24, %s8228_s8  ;;  %p8232_p5 = scmp.lt.u32.totalorder %s8228_s8, %s9838_s24 }
 0x16c   :  { %p8234_p6 = pnand %p8232_p5, %p8229_p4 }
 0x16e   :  { %8237 = shalt.err (!%p8234_p6)
}
 0x16f   :  { %s8238_s15 = scalar_lea.vmem %s255_s17, 16  ;;  %s8242_s29 = scalar_lea.vmem %s255_s17, 32 }
 0x170   :  { %p8239_p7 = scmp.ne.s32.totalorder %s255_s17, %s8238_s15  ;;  %p8243_p8 = scmp.lt.s32.totalorder %s255_s17, %s255_s17 }
 0x171   :  { %p8244_p9 = scmp.lt.s32.totalorder %s8242_s29, %s8238_s15 }
 0x173   :  { %p8245_p10 = por %p8244_p9, %p8243_p8 }
 0x175   :  { %p8246_p11 = pnand %p8245_p10, %p8239_p7 }
 0x177   :  { %8249 = shalt.err (!%p8246_p11)
}
 0x178   :  { %257 = dma.hbm_to_vmem [thread:$0]  %s9838_s24, 16, %s255_s17, [#allocation32]  }
 0x179   :  { %8250 = dma.done.wait [#allocation6], 16  }
 0x17a   :  { %8251 = vsyncadd [#allocation6], 4294967280 }
 0x17b   :  { %8252 = dma.done.wait [#allocation8], 3088  }
 0x17c   :  { %8253 = vsyncadd [#allocation8], 4294964208 }
 0x17d   :  { %8254 = dma.done.wait [#allocation11], 32  }
 0x17e   :  { %8255 = vsyncadd [#allocation11], 4294967264 }
 0x17f   :  { %8256 = dma.done.wait [#allocation14], 4112  }
 0x180   :  { %8257 = vsyncadd [#allocation14], 4294963184 }
 0x181   :  { %8258 = dma.done.wait [#allocation17], 3072  }
 0x182   :  { %8259 = vsyncadd [#allocation17], 4294964224 }
 0x183   :  { %8260 = dma.done.wait [#allocation20], 2080  }
 0x184   :  { %8261 = vsyncadd [#allocation20], 4294965216 }
 0x185   :  { %8262 = dma.done.wait [#allocation23], 1040  }
 0x186   :  { %8263 = vsyncadd [#allocation23], 4294966256 }
 0x187   :  { %8264 = dma.done.wait [#allocation26], 32  }
 0x188   :  { %8265 = vsyncadd [#allocation26], 4294967264 }
 0x189   :  { %8266 = dma.done.wait [#allocation29], 1040  }
 0x18a   :  { %8267 = vsyncadd [#allocation29], 4294966256 }
 0x18b   :  { %8268 = dma.done.wait [#allocation32], 2064  }
 0x18c   :  { %8269 = vsyncadd [#allocation32], 4294965232  ;;  %v8293_v0 = vmov 0.0   ;;  %s8294_s24 = smov 4   ;;  %s9866_s2 = sld [smem:[#allocation44_spill]]  ;;  %vm339_vm0 = vcmask 1041409   ;;  %v510_v54 = vlaneseq }
 0x18d   :  { %362 = vrot.lane.b32.xlu0 %v8293_v0, %s8294_s24  ;;  %s8295_s6 = smov 12   ;;  %s9867_s1 = sld [smem:[#allocation45_spill]]  ;;  %vm544_vm1 = vcmask 1043456   ;;  %v8296_v52 = vmov 1983009808   ;;  %vm455_vm2 = vcmask 31744  }
 0x18e   :  { %v508_v53 = vunpack.c.l.s4 %v8296_v52  ;;  %vm464_vm3 = vcmask 64512   ;;  %v8777_v59 = vshrl.u32 %v510_v54, 7  ;;  %vm473_vm4 = vcmask 97280   ;;  %v688_v52 = vld [vmem:[#allocation9 + $0x20] sm:$0xff]  ;;  %s9868_s8 = sld [smem:[#allocation46_spill]]  ;;  %s8298_s4 = smov 64  }
 0x18f   :  { %vm482_vm5 = vcmask 130048   ;;  %vm539_vm6 = vcmask 162816   ;;  %vm735_vm7 = vcmask 523264   ;;  %vm1244_vm8 = vcmask 1041408   ;;  %s8301_s7 = smov 112   ;;  %s8302_s19 = smov 104  }
 0x190   :  { %v509_v58 = vunpack.c.0.s8 %v508_v53  ;;  %v689_v53 = vld [vmem:[#allocation9 + $0x28] sm:$0xff]  ;;  %vm1274_vm9 = vcmask 254976   ;;  %vm1277_vm10 = vcmask 257026   ;;  %vm1145_vm11 = vcmask 261120   ;;  %s8303_s28 = smov 96   ;;  %s8304_s13 = smov 88  }
 0x191   :  { %v7309_v54 = vpack.c.bf16 %v689_v53, %v688_v52  ;;  %v961_v53 = vld [vmem:[#allocation15 + $0x20] sm:$0xff]  ;;  %vm3635_vm12 = vcmask 1042434   ;;  %vm3638_vm13 = vcmask 1043459   ;;  %vm3641_vm14 = vcmask 1044484   ;;  %s8307_s0 = smov 72   ;;  %s8311_s21 = smov 56  }
 0x192   :  { %v315_v1 = vld [vmem:[%s9866_s2] sm:$0xff]  ;;  %v316_v2 = vld [vmem:[%s9866_s2 + $0x8] sm:$0xff]  ;;  %vm3644_vm15 = vcmask 1045509  }
 0x193   :  { %v332_v3 = vrot.slane %v316_v2, 7  ;;  %v319_v4 = vrot.slane %v315_v1, 1  ;;  %v323_v5 = vrot.slane %v315_v1, 3  ;;  %v6829_v6 = vrot.slane %v316_v2, 10  ;;  %v333_v25 = vld [vmem:[%s9867_s1] sm:$0xff]  ;;  %v334_v26 = vld [vmem:[%s9867_s1 + $0x8] sm:$0xff] }
 0x194   :  { %v321_v7 = vrot.slane %v315_v1, 2  ;;  %v6828_v8 = vrot.slane %v316_v2, 9  ;;  %v327_v11 = vrot.slane %v315_v1, 5  ;;  %v6831_v12 = vrot.slane %v316_v2, 12  ;;  %v335_v28 = vld [vmem:[%s9867_s1 + $0x10] sm:$0xf] }
 0x195   :  { %v8703_v9 = vsel %vm339_vm0, %v332_v3, %v315_v1  ;;  %v8706_v10 = vsel %vm339_vm0, %v316_v2, %v319_v4  ;;  %v8713_v13 = vsel %vm339_vm0, %v6829_v6, %v323_v5  ;;  %v325_v15 = vrot.slane %v315_v1, 4 }
 0x196   :  { %364 = vrot.lane.b32.xlu0 %v8703_v9, %s8294_s24  ;;  %366 = vrot.lane.b32.xlu1 %v8706_v10, %s8294_s24  ;;  %v8716_v14 = vsel %vm339_vm0, %v6828_v8, %v321_v7  ;;  %v6830_v16 = vrot.slane %v316_v2, 11  ;;  %v8723_v17 = vsel %vm339_vm0, %v6831_v12, %v327_v11  ;;  %v329_v19 = vrot.slane %v315_v1, 6 }
 0x197   :  { %v6832_v20 = vrot.slane %v316_v2, 13  ;;  %v331_v22 = vrot.slane %v315_v1, 7  ;;  %v353_v23 = vrot.slane %v332_v3, 7  ;;  %v7298_v27 = vpack.c.bf16 %v334_v26, %v333_v25 }
 0x198   :  { %v8726_v18 = vsel %vm339_vm0, %v6830_v16, %v325_v15  ;;  %v8790_v7 = vsub.s32 %v509_v58, %v8777_v59  ;;  %v692_v58 = vld [vmem:[#allocation9 + $0x40] sm:$0xff] }
 0x199   :  { %v352_v21 = vsel %vm339_vm0, %v6832_v20, %v329_v19  ;;  %v354_v24 = vsel %vm339_vm0, %v353_v23, %v331_v22  ;;  %7299 = vmatprep.subr.bf16.mxu0 %v7298_v27 }
 0x19a   :  { %370 = vrot.lane.b32.xlu0 %v8713_v13, %s8294_s24  ;;  %368 = vrot.lane.b32.xlu1 %v8716_v14, %s8294_s24 }
 0x19b   :  { %7301 = vmatpush3.bf16.msra.mxu0 %v7298_v27 }
 0x19c   :  { %7060 = vmatprep.subr.msk.mxu0 %vm544_vm1, %v335_v28 }
 0x19e   :  { %374 = vrot.lane.b32.xlu0 %v8723_v17, %s8294_s24  ;;  %372 = vrot.lane.b32.xlu1 %v8726_v18, %s8294_s24 }
 0x19f   :  { %7061 = vmatpush3.msk.msra.mxu0 %vm544_vm1, %v335_v28  ;;  %vm3647_vm1 = vcmask 1046534  }
 0x1a2   :  { %386 = vrot.lane.b32.xlu0 %v8703_v9, %s8280_s12  ;;  %376 = vrot.lane.b32.xlu1 %v352_v21, %s8294_s24 }
 0x1a6   :  { %390 = vrot.lane.b32.xlu0 %v8716_v14, %s8280_s12  ;;  %388 = vrot.lane.b32.xlu1 %v8706_v10, %s8280_s12 }
 0x1aa   :  { %394 = vrot.lane.b32.xlu0 %v8726_v18, %s8280_s12  ;;  %392 = vrot.lane.b32.xlu1 %v8713_v13, %s8280_s12 }
 0x1ae   :  { %398 = vrot.lane.b32.xlu0 %v352_v21, %s8280_s12  ;;  %396 = vrot.lane.b32.xlu1 %v8723_v17, %s8280_s12 }
 0x1b2   :  { %410 = vrot.lane.b32.xlu0 %v8706_v10, %s8295_s6  ;;  %400 = vrot.lane.b32.xlu1 %v354_v24, %s8280_s12 }
 0x1b6   :  { %414 = vrot.lane.b32.xlu0 %v8713_v13, %s8295_s6  ;;  %412 = vrot.lane.b32.xlu1 %v8716_v14, %s8295_s6 }
 0x1ba   :  { %418 = vrot.lane.b32.xlu0 %v8723_v17, %s8295_s6  ;;  %416 = vrot.lane.b32.xlu1 %v8726_v18, %s8295_s6 }
 0x1be   :  { %422 = vrot.lane.b32.xlu0 %v354_v24, %s8295_s6  ;;  %420 = vrot.lane.b32.xlu1 %v352_v21, %s8295_s6 }
 0x1c2   :  { %434 = vrot.lane.b32.xlu0 %v8716_v14, %s8276_s3  ;;  %424 = vrot.lane.b32.xlu1 %v8293_v0, %s8295_s6 }
 0x1c6   :  { %438 = vrot.lane.b32.xlu0 %v8726_v18, %s8276_s3  ;;  %436 = vrot.lane.b32.xlu1 %v8713_v13, %s8276_s3 }
 0x1ca   :  { %442 = vrot.lane.b32.xlu0 %v352_v21, %s8276_s3  ;;  %440 = vrot.lane.b32.xlu1 %v8723_v17, %s8276_s3 }
 0x1ce   :  { %446 = vrot.lane.b32.xlu0 %v8293_v0, %s8276_s3  ;;  %444 = vrot.lane.b32.xlu1 %v354_v24, %s8276_s3 }
 0x1ff   :  { %v363_v29 = vpop.permute.xlu0 %362 }
 0x200   :  { %v456_v61 = vsel %vm455_vm2, 0.0, %v363_v29 }
 0x208   :  { %v365_v30 = vpop.permute.xlu0 %364  ;;  %v367_v31 = vpop.permute.xlu1 %366 }
 0x209   :  { %v457_v57 = vsel %vm455_vm2, 0.0, %v365_v30  ;;  %v458_v4 = vsel %vm455_vm2, %v8703_v9, %v367_v31 }
 0x20c   :  { %v371_v32 = vpop.permute.xlu0 %370  ;;  %v369_v33 = vpop.permute.xlu1 %368 }
 0x20d   :  { %v459_v5 = vsel %vm455_vm2, %v8706_v10, %v369_v33  ;;  %v460_v15 = vsel %vm455_vm2, %v8716_v14, %v371_v32 }
 0x210   :  { %v375_v34 = vpop.permute.xlu0 %374  ;;  %v373_v35 = vpop.permute.xlu1 %372 }
 0x211   :  { %v462_v21 = vsel %vm455_vm2, %v8726_v18, %v375_v34  ;;  %v461_v22 = vsel %vm455_vm2, %v8713_v13, %v373_v35 }
 0x214   :  { %v387_v36 = vpop.permute.xlu0 %386  ;;  %v377_v37 = vpop.permute.xlu1 %376 }
 0x215   :  { %v465_v2 = vsel %vm464_vm3, %v456_v61, %v387_v36  ;;  %v463_v14 = vsel %vm455_vm2, %v8723_v17, %v377_v37  ;;  %vm3649_vm2 = vcmask 1047559  }
 0x218   :  { %v391_v38 = vpop.permute.xlu0 %390  ;;  %v389_v39 = vpop.permute.xlu1 %388 }
 0x219   :  { %v466_v60 = vsel %vm464_vm3, %v457_v57, %v389_v39  ;;  %v467_v8 = vsel %vm464_vm3, %v458_v4, %v391_v38 }
 0x21c   :  { %v395_v40 = vpop.permute.xlu0 %394  ;;  %v393_v41 = vpop.permute.xlu1 %392 }
 0x21d   :  { %v468_v11 = vsel %vm464_vm3, %v459_v5, %v393_v41  ;;  %v469_v25 = vsel %vm464_vm3, %v460_v15, %v395_v40  ;;  %v6833_v5 = vld [vmem:[%s9868_s8] ss:$0 sm:$0xff]  ;;  %s8306_s8 = smov 80  }
 0x220   :  { %v399_v42 = vpop.permute.xlu0 %398  ;;  %v397_v43 = vpop.permute.xlu1 %396 }
 0x221   :  { %v471_v26 = vsel %vm464_vm3, %v462_v21, %v399_v42  ;;  %v470_v28 = vsel %vm464_vm3, %v461_v22, %v397_v43  ;;  %v701_v21 = vld [vmem:[#allocation9 + $0x88] sm:$0xff] }
 0x224   :  { %v411_v44 = vpop.permute.xlu0 %410  ;;  %v401_v45 = vpop.permute.xlu1 %400 }
 0x225   :  { %v474_v6 = vsel %vm473_vm4, %v465_v2, %v411_v44  ;;  %v472_v29 = vsel %vm464_vm3, %v463_v14, %v401_v45  ;;  %v684_v45 = vld [vmem:[#allocation9] sm:$0xff] }
 0x226   :  { %v696_v2 = vld [vmem:[#allocation9 + $0x60] sm:$0xff] }
 0x228   :  { %v415_v46 = vpop.permute.xlu0 %414  ;;  %v413_v47 = vpop.permute.xlu1 %412 }
 0x229   :  { %v475_v62 = vsel %vm473_vm4, %v466_v60, %v413_v47  ;;  %v476_v9 = vsel %vm473_vm4, %v467_v8, %v415_v46  ;;  %v685_v46 = vld [vmem:[#allocation9 + $0x8] sm:$0xff]  ;;  %v686_v47 = vld [vmem:[#allocation9 + $0x10] sm:$0xff]  ;;  %v699_v8 = vld [vmem:[#allocation9 + $0x78] sm:$0xff] }
 0x22a   :  { %v693_v60 = vld [vmem:[#allocation9 + $0x48] sm:$0xff] }
 0x22b   :  { %v7315_v61 = vpack.c.bf16 %v693_v60, %v692_v58  ;;  %v965_v60 = vld [vmem:[#allocation15 + $0x40] sm:$0xff] }
 0x22c   :  { %v419_v48 = vpop.permute.xlu0 %418  ;;  %v417_v49 = vpop.permute.xlu1 %416 }
 0x22d   :  { %v477_v16 = vsel %vm473_vm4, %v468_v11, %v417_v49  ;;  %v478_v18 = vsel %vm473_vm4, %v469_v25, %v419_v48  ;;  %v8297_v48 = vmov 0.0|0.0   ;;  %v7303_v49 = vpack.c.bf16 %v685_v46, %v684_v45  ;;  %v960_v45 = vld [vmem:[#allocation15 + $0x18] sm:$0xff]  ;;  %v957_v46 = vld [vmem:[#allocation15] sm:$0xff] }
 0x22e   :  { %7302 = vmatprep.subr.bf16.mxu1 %v8297_v48 }
 0x22f   :  { %7304 = vmatpush1.bf16.msra.mxu1 %v7303_v49  ;;  %v962_v49 = vld [vmem:[#allocation15 + $0x28] sm:$0xff] }
 0x230   :  { %v423_v50 = vpop.permute.xlu0 %422  ;;  %v421_v51 = vpop.permute.xlu1 %420  ;;  %7305 = vmatprep.subr.bf16.mxu1 %v8297_v48 }
 0x231   :  { %v480_v13 = vsel %vm473_vm4, %v471_v26, %v423_v50  ;;  %v479_v30 = vsel %vm473_vm4, %v470_v28, %v421_v51  ;;  %v687_v50 = vld [vmem:[#allocation9 + $0x18] sm:$0xff]  ;;  %v702_v26 = vld [vmem:[#allocation9 + $0x90] sm:$0xff] }
 0x232   :  { %v7306_v51 = vpack.c.bf16 %v687_v50, %v686_v47  ;;  %v964_v50 = vld [vmem:[#allocation15 + $0x38] sm:$0xff] }
 0x233   :  { %v7342_v52 = vpack.c.bf16 %v964_v50, %v962_v49 }
 0x234   :  { %v435_v55 = vpop.permute.xlu0 %434  ;;  %v425_v56 = vpop.permute.xlu1 %424  ;;  %7307 = vmatpush1.bf16.msra.mxu1 %v7306_v51 }
 0x235   :  { %v483_v12 = vsel %vm482_vm5, %v474_v6, %v435_v55  ;;  %v481_v31 = vsel %vm473_vm4, %v472_v29, %v425_v56  ;;  %7308 = vmatprep.subr.bf16.mxu1 %v8297_v48  ;;  %v690_v55 = vld [vmem:[#allocation9 + $0x30] sm:$0xff]  ;;  %v691_v56 = vld [vmem:[#allocation9 + $0x38] sm:$0xff]  ;;  %vm6456_vm4 = vcmask 195584  }
 0x236   :  { %v7312_v57 = vpack.c.bf16 %v691_v56, %v690_v55  ;;  %v698_v6 = vld [vmem:[#allocation9 + $0x70] sm:$0xff]  ;;  %v968_v56 = vld [vmem:[#allocation15 + $0x58] sm:$0xff] }
 0x237   :  { %v7324_v11 = vpack.c.bf16 %v699_v8, %v698_v6  ;;  %v966_v55 = vld [vmem:[#allocation15 + $0x48] sm:$0xff]  ;;  %v976_v6 = vld [vmem:[#allocation15 + $0x98] sm:$0xff] }
 0x238   :  { %v439_v63 = vpop.permute.xlu0 %438  ;;  %v437_v1 = vpop.permute.xlu1 %436  ;;  %7310 = vmatpush1.bf16.msra.mxu1 %v7309_v54  ;;  %v963_v54 = vld [vmem:[#allocation15 + $0x30] sm:$0xff]  ;;  %v7346_v58 = vpack.c.bf16 %v968_v56, %v966_v55 }
 0x239   :  { %v484_v3 = vsel %vm482_vm5, %v475_v62, %v437_v1  ;;  %v485_v23 = vsel %vm482_vm5, %v476_v9, %v439_v63  ;;  %7311 = vmatprep.subr.bf16.mxu1 %v8297_v48  ;;  %v694_v62 = vld [vmem:[#allocation9 + $0x50] sm:$0xff]  ;;  %v695_v63 = vld [vmem:[#allocation9 + $0x58] sm:$0xff] }
 0x23a   :  { %v505_v10 = vcombine.low %v483_v12, %v484_v3  ;;  %v7318_v1 = vpack.c.bf16 %v695_v63, %v694_v62  ;;  %v697_v3 = vld [vmem:[#allocation9 + $0x68] sm:$0xff]  ;;  %v6837_v12 = vld [vmem:[#allocation5] ss:$0 sm:$0xff]  ;;  %v972_v63 = vld [vmem:[#allocation15 + $0x78] sm:$0xff] }
 0x23b   :  { %v7321_v4 = vpack.c.bf16 %v697_v3, %v696_v2  ;;  %v970_v62 = vld [vmem:[#allocation15 + $0x68] sm:$0xff]  ;;  %v969_v3 = vld [vmem:[#allocation15 + $0x60] sm:$0xff] }
 0x23c   :  { %v443_v19 = vpop.permute.xlu0 %442  ;;  %v441_v20 = vpop.permute.xlu1 %440  ;;  %v513_v17 = vrot.slane %v505_v10, %v8790_v7  ;;  %7313 = vmatpush1.bf16.msra.mxu1 %v7312_v57  ;;  %v6838_v10 = vld [vmem:[#allocation7] ss:$0 sm:$0xff]  ;;  %v7344_v57 = vpack.c.bf16 %v963_v54, %v961_v53  ;;  %v7350_v2 = vpack.c.bf16 %v972_v63, %v970_v62 }
 0x23d   :  { %v486_v24 = vsel %vm482_vm5, %v477_v16, %v441_v20  ;;  %v487_v35 = vsel %vm482_vm5, %v478_v18, %v443_v19  ;;  %7314 = vmatprep.subr.bf16.mxu1 %v8297_v48  ;;  %v700_v20 = vld [vmem:[#allocation9 + $0x80] sm:$0xff] }
 0x23e   :  { %v506_v27 = vcombine.low %v485_v23, %v486_v24  ;;  %v7327_v23 = vpack.c.bf16 %v701_v21, %v700_v20  ;;  %v977_v20 = vld [vmem:[#allocation15 + $0xa0] sm:$0xff]  ;;  %v979_v21 = vld [vmem:[#allocation15 + $0xb0] sm:$0xff] }
 0x240   :  { %v447_v32 = vpop.permute.xlu0 %446  ;;  %v445_v33 = vpop.permute.xlu1 %444  ;;  %v520_v34 = vrot.slane %v506_v27, %v8790_v7  ;;  %7316 = vmatpush1.bf16.msra.mxu1 %v7315_v61  ;;  %v703_v27 = vld [vmem:[#allocation9 + $0x98] sm:$0xff] }
 0x241   :  { %v489_v36 = vsel %vm482_vm5, %v480_v13, %v447_v32  ;;  %v490_v37 = vsel %vm482_vm5, %v481_v31, %v447_v32  ;;  %v488_v38 = vsel %vm482_vm5, %v479_v30, %v445_v33  ;;  %7317 = vmatprep.subr.bf16.mxu1 %v8297_v48  ;;  %v7330_v29 = vpack.c.bf16 %v703_v27, %v702_v26  ;;  %v704_v30 = vld [vmem:[#allocation9 + $0xa0] sm:$0xff]  ;;  %v705_v31 = vld [vmem:[#allocation9 + $0xa8] sm:$0xff]  ;;  %v967_v61 = vld [vmem:[#allocation15 + $0x50] sm:$0xff] }
 0x242   :  { %v523_v39 = vcombine.low %v489_v36, %v490_v37  ;;  %v522_v40 = vcombine.low %v487_v35, %v488_v38  ;;  %v521_v41 = vcombine.low %v513_v17, %v520_v34  ;;  %v7333_v34 = vpack.c.bf16 %v705_v31, %v704_v30  ;;  %v706_v35 = vld [vmem:[#allocation9 + $0xb0] sm:$0xff]  ;;  %v707_v36 = vld [vmem:[#allocation9 + $0xb8] sm:$0xff] }
 0x244   :  { %v537_v42 = vrot.slane %v523_v39, %v8790_v7  ;;  %v530_v43 = vrot.slane %v522_v40, %v8790_v7  ;;  %7062 = vmatprep.mubr.msk.f32.mxu0 %vm539_vm6, %v521_v41  ;;  %7319 = vmatpush1.bf16.msra.mxu1 %v7318_v1  ;;  %v7336_v40 = vpack.c.bf16 %v707_v36, %v706_v35 }
 0x245   :  { %7320 = vmatprep.subr.bf16.mxu1 %v8297_v48  ;;  %v7348_v1 = vpack.c.bf16 %v967_v61, %v965_v60 }
 0x246   :  { %v538_v44 = vcombine.low %v530_v43, %v537_v42 }
 0x248   :  { %7063 = vmatmul.mubr.msk.f32.vlgmr.msra.gmra.mrb[0].mxu0 %vm539_vm6, %v538_v44  ;;  %7322 = vmatpush1.bf16.msra.mxu1 %v7321_v4  ;;  %v958_v44 = vld [vmem:[#allocation15 + $0x8] sm:$0xff]  ;;  %v971_v4 = vld [vmem:[#allocation15 + $0x70] sm:$0xff]  ;;  %vm6461_vm6 = vcmask 326656  }
 0x249   :  { %1065 = vmatprep.mubr.f32.mxu0 %v8293_v0  ;;  %7323 = vmatprep.subr.bf16.mxu1 %v8297_v48  ;;  %v7338_v47 = vpack.c.bf16 %v960_v45, %v958_v44  ;;  %v7352_v8 = vpack.c.bf16 %v971_v4, %v969_v3  ;;  %v981_v4 = vld [vmem:[#allocation15 + $0xc0] sm:$0xff] }
 0x24b   :  { %7339 = vmatprep.subr.bf16.mxu0 %v7338_v47 }
 0x24c   :  { %7325 = vmatpush1.bf16.msra.mxu1 %v7324_v11 }
 0x24d   :  { %7326 = vmatprep.subr.bf16.mxu1 %v8297_v48 }
 0x250   :  { %7328 = vmatpush1.bf16.msra.mxu1 %v7327_v23 }
 0x251   :  { %7329 = vmatprep.subr.bf16.mxu1 %v8297_v48 }
 0x254   :  { %7331 = vmatpush1.bf16.msra.mxu1 %v7330_v29 }
 0x255   :  { %7332 = vmatprep.subr.bf16.mxu1 %v8297_v48 }
 0x258   :  { %7334 = vmatpush1.bf16.msra.mxu1 %v7333_v34 }
 0x259   :  { %7335 = vmatprep.subr.bf16.mxu1 %v8297_v48  ;;  %v959_v48 = vld [vmem:[#allocation15 + $0x10] sm:$0xff] }
 0x25a   :  { %v7340_v51 = vpack.c.bf16 %v959_v48, %v957_v46 }
 0x25c   :  { %7337 = vmatpush1.bf16.msra.mxu1 %v7336_v40  ;;  %7341 = vmatpush1.bf16.msra.mxu0 %v7340_v51 }
 0x25d   :  { %7343 = vmatprep.subr.bf16.mxu0 %v7342_v52 }
 0x260   :  { %7345 = vmatpush1.bf16.msra.mxu0 %v7344_v57 }
 0x261   :  { %7347 = vmatprep.subr.bf16.mxu0 %v7346_v58 }
 0x264   :  { %7349 = vmatpush1.bf16.msra.mxu0 %v7348_v1  ;;  %v982_v1 = vld [vmem:[#allocation15 + $0xc8] sm:$0xff] }
 0x265   :  { %7351 = vmatprep.subr.bf16.mxu0 %v7350_v2  ;;  %v984_v2 = vld [vmem:[#allocation15 + $0xd8] sm:$0xff] }
 0x266   :  { %v7362_v3 = vpack.c.bf16 %v984_v2, %v982_v1 }
 0x268   :  { %7353 = vmatpush1.bf16.msra.mxu0 %v7352_v8  ;;  %v986_v8 = vld [vmem:[#allocation15 + $0xe8] sm:$0xff] }
 0x31b   :  { %v7064_v15 = vpop.f32.mrb[0].mxu0 }
 0x31c   :  { %v620_v9 = vadd.f32 %v7064_v15, %v6833_v5  ;;  %v614_v16 = vpop.f32.mrb[1].mxu0  ;;  %v975_v15 = vld [vmem:[#allocation15 + $0x90] sm:$0xff] }
 0x31d   :  { %v615_v19 = vadd.f32 %v6833_v5, %v614_v16  ;;  %v974_v5 = vld [vmem:[#allocation15 + $0x88] sm:$0xff]  ;;  %v980_v16 = vld [vmem:[#allocation15 + $0xb8] sm:$0xff] }
 0x31e   :  { %v630_v22 = vmul.f32 %v6837_v12, %v620_v9  ;;  %v7354_v11 = vpack.c.bf16 %v976_v6, %v974_v5  ;;  %v978_v9 = vld [vmem:[#allocation15 + $0xa8] sm:$0xff]  ;;  %v983_v5 = vld [vmem:[#allocation15 + $0xd0] sm:$0xff] }
 0x31f   :  { %v629_v24 = vmul.f32 %v6837_v12, %v615_v19  ;;  %v973_v12 = vld [vmem:[#allocation15 + $0x80] sm:$0xff]  ;;  %v7358_v19 = vpack.c.bf16 %v980_v16, %v978_v9  ;;  %v7364_v6 = vpack.c.bf16 %v983_v5, %v981_v4  ;;  %v987_v9 = vld [vmem:[#allocation15 + $0xf0] sm:$0xff] }
 0x320   :  { %v638_v14 = vadd.f32 %v6838_v10, %v630_v22  ;;  %7355 = vmatprep.subr.bf16.mxu0 %v7354_v11  ;;  %v7360_v22 = vpack.c.bf16 %v979_v21, %v977_v20  ;;  %v988_v11 = vld [vmem:[#allocation15 + $0xf8] sm:$0xff] }
 0x321   :  { %v637_v25 = vadd.f32 %v6838_v10, %v629_v24  ;;  %v7356_v10 = vpack.c.bf16 %v975_v15, %v973_v12  ;;  %v7366_v12 = vpack.c.bf16 %v988_v11, %v986_v8  ;;  %v985_v15 = vld [vmem:[#allocation15 + $0xe0] sm:$0xff]  ;;  %v1134_v21 = vld [vmem:[%s9824_s10] sm:$0xff] }
 0x322   :  { %v640_v28 = vmax.f32 %v638_v14, 0.0  ;;  %v7368_v16 = vpack.c.bf16 %v987_v9, %v985_v15 }
 0x323   :  { %v639_v18 = vmax.f32 %v637_v25, 0.0  ;;  %7357 = vmatpush1.bf16.msra.mxu0 %v7356_v10  ;;  %v1135_v10 = vld [vmem:[%s9824_s10 + $0x8] sm:$0xff] }
 0x324   :  { %v8840_v13 = vrot.slane %v640_v28, %v8790_v7  ;;  %v660_v37 = vcombine.high %v640_v28, %v640_v28  ;;  %7359 = vmatprep.subr.bf16.mxu0 %v7358_v19  ;;  %v1137_v19 = vld [vmem:[%s9824_s10 + $0x18] sm:$0xff] }
 0x325   :  { %v643_v32 = vcombine.high %v639_v18, %v639_v18  ;;  %v8850_v17 = vrot.slane %v639_v18, %v8790_v7  ;;  %v8929_v20 = vpack.c.bf16 %v1137_v19, %v1135_v10 }
 0x326   :  { %719 = vrot.lane.b32.xlu1 %v8840_v13, %s8298_s4  ;;  %v8847_v33 = vcombine.high %v8840_v13, %v8840_v13  ;;  %v8873_v42 = vrot.slane %v660_v37, %v8790_v7 }
 0x327   :  { %v8859_v38 = vcombine.high %v8850_v17, %v8850_v17  ;;  %v8862_v39 = vrot.slane %v643_v32, %v8790_v7  ;;  %7361 = vmatpush1.bf16.msra.mxu0 %v7360_v22  ;;  %v1136_v22 = vld [vmem:[%s9824_s10 + $0x10] sm:$0xff]  ;;  %7387 = vmatprep.subr.bf16.mxu1 %v8929_v20 }
 0x328   :  { %721 = vrot.lane.b32.xlu0 %v8847_v33, %s8298_s4  ;;  %v8881_v43 = vcombine.high %v8873_v42, %v8873_v42  ;;  %7363 = vmatprep.subr.bf16.mxu0 %v7362_v3 }
 0x329   :  { %v8870_v41 = vcombine.high %v8862_v39, %v8862_v39 }
 0x32a   :  { %711 = vrot.lane.b32.xlu1 %v8850_v17, %s8298_s4 }
 0x32b   :  { %7365 = vmatpush1.bf16.msra.mxu0 %v7364_v6 }
 0x32c   :  { %713 = vrot.lane.b32.xlu0 %v8859_v38, %s8298_s4  ;;  %7367 = vmatprep.subr.bf16.mxu0 %v7366_v12 }
 0x32e   :  { %715 = vrot.lane.b32.xlu1 %v8862_v39, %s8298_s4 }
 0x32f   :  { %7369 = vmatpush1.bf16.msra.mxu0 %v7368_v16 }
 0x330   :  { %717 = vrot.lane.b32.xlu0 %v8870_v41, %s8298_s4  ;;  %7371 = vmatprep.subr.bf16.mxu0 %v8929_v20 }
 0x332   :  { %723 = vrot.lane.b32.xlu1 %v8873_v42, %s8298_s4 }
 0x334   :  { %725 = vrot.lane.b32.xlu0 %v8881_v43, %s8298_s4 }
 0x398   :  { %v720_v23 = vpop.permute.xlu1 %719 }
 0x399   :  { %v740_v29 = vsel %vm735_vm7, %v8870_v41, %v720_v23  ;;  %v8937_v23 = vpack.c.bf16 %v1136_v22, %v1134_v21 }
 0x39a   :  { %v722_v24 = vpop.permute.xlu0 %721 }
 0x39b   :  { %v741_v26 = vsel %vm735_vm7, %v8840_v13, %v722_v24  ;;  %v1139_v24 = vld [vmem:[%s9824_s10 + $0x28] sm:$0xff] }
 0x39c   :  { %v712_v14 = vpop.permute.xlu1 %711  ;;  %v792_v32 = vcombine.low %v741_v26, %v8873_v42  ;;  %v1138_v26 = vld [vmem:[%s9824_s10 + $0x20] sm:$0xff] }
 0x39d   :  { %v736_v25 = vsel %vm735_vm7, 0.0, %v712_v14  ;;  %v1141_v14 = vld [vmem:[%s9824_s10 + $0x38] sm:$0xff] }
 0x39e   :  { %v714_v27 = vpop.permute.xlu0 %713  ;;  %v752_v18 = vcombine.low %v736_v25, %v8859_v38  ;;  %v799_v47 = vrot.slane %v792_v32, %v8790_v7  ;;  %v8946_v25 = vpack.c.bf16 %v1141_v14, %v1139_v24 }
 0x39f   :  { %v737_v28 = vsel %vm735_vm7, %v8850_v17, %v714_v27  ;;  %v784_v17 = vcombine.low %v740_v29, %v8847_v33  ;;  %v1140_v27 = vld [vmem:[%s9824_s10 + $0x30] sm:$0xff]  ;;  %v6839_v29 = vld [vmem:[#allocation10] ss:$0 sm:$0xff] }
 0x3a0   :  { %v760_v30 = vcombine.low %v737_v28, %v8862_v39  ;;  %v716_v31 = vpop.permute.xlu1 %715  ;;  %v759_v44 = vrot.slane %v752_v18, %v8790_v7  ;;  %v8957_v28 = vpack.c.bf16 %v1140_v27, %v1138_v26  ;;  %v6842_v18 = vld [vmem:[#allocation12] ss:$0 sm:$0xff] }
 0x3a1   :  { %v738_v34 = vsel %vm735_vm7, %v8859_v38, %v716_v31 }
 0x3a2   :  { %v767_v35 = vrot.slane %v760_v30, %v8790_v7  ;;  %v768_v36 = vcombine.low %v738_v34, %v8870_v41  ;;  %v718_v37 = vpop.permute.xlu0 %717  ;;  %v6843_v34 = vld [vmem:[#allocation13] ss:$0 sm:$0xff] }
 0x3a3   :  { %v739_v40 = vsel %vm735_vm7, %v8862_v39, %v718_v37  ;;  %v791_v39 = vrot.slane %v784_v17, %v8790_v7 }
 0x3a4   :  { %v776_v45 = vcombine.low %v739_v40, %v8840_v13  ;;  %v724_v46 = vpop.permute.xlu1 %723  ;;  %v775_v48 = vrot.slane %v768_v36, %v8790_v7  ;;  %v822_v51 = vcombine.low %v759_v44, %v767_v35 }
 0x3a5   :  { %v742_v38 = vsel %vm735_vm7, %v8847_v33, %v724_v46  ;;  %v840_v54 = vcombine.low %v791_v39, %v799_v47 }
 0x3a6   :  { %v783_v41 = vrot.slane %v776_v45, %v8790_v7  ;;  %v800_v49 = vcombine.low %v742_v38, %v8881_v43  ;;  %v726_v50 = vpop.permute.xlu0 %725  ;;  %v830_v56 = vrot.slane %v822_v51, %v8790_v7  ;;  %v8974_v38 = vsub.s32 0, %v8777_v59 }
 0x3a7   :  { %v743_v52 = vsel %vm735_vm7, %v8873_v42, %v726_v50  ;;  %v848_v61 = vrot.slane %v840_v54, %v8790_v7 }
 0x3a8   :  { %v808_v13 = vcombine.low %v743_v52, %v8293_v0  ;;  %v823_v53 = vcombine.low %v775_v48, %v783_v41  ;;  %v807_v55 = vrot.slane %v800_v49, %v8790_v7  ;;  %v989_v48 = vld [vmem:[%s9825_s11] sm:$0x3]  ;;  %v8980_v41 = vsub.s32 1, %v8777_v59  ;;  %s8299_s11 = smov 32  }
 0x3a9   :  { %v994_v49 = vrot.slane %v989_v48, %v8974_v38 }
 0x3aa   :  { %v815_v33 = vrot.slane %v808_v13, %v8790_v7  ;;  %v837_v57 = vrot.slane %v823_v53, %v8790_v7  ;;  %v998_v50 = vrot.slane %v989_v48, %v8980_v41 }
 0x3ac   :  { %v841_v43 = vcombine.low %v807_v55, %v815_v33  ;;  %v839_v58 = vcombine.high %v830_v56, %v837_v57  ;;  %v838_v60 = vcombine.low %v830_v56, %v837_v57 }
 0x3ae   :  { %v855_v62 = vrot.slane %v841_v43, %v8790_v7  ;;  %6840 = vmatprep.mubr.msk.f32.mxu1 %vm735_vm7, %v839_v58 }
 0x3af   :  { %929 = vmatmul.mubr.f32.vlgmr.msra.gmra.mrb[0].mxu1 %v838_v60 }
 0x3b0   :  { %v857_v42 = vcombine.high %v848_v61, %v855_v62  ;;  %v856_v63 = vcombine.low %v848_v61, %v855_v62  ;;  %7389 = vmatpush1.bf16.msra.mxu1 %v8937_v23 }
 0x3b1   :  { %7391 = vmatprep.subr.bf16.mxu1 %v8946_v25 }
 0x3b2   :  { %6841 = vmatprep.mubr.msk.f32.mxu1 %vm735_vm7, %v857_v42 }
 0x3b3   :  { %934 = vmatmul.mubr.f32.gmra.mrb[2].mxu1 %v856_v63 }
 0x3b4   :  { %1484 = vmatprep.mubr.f32.mxu1 %v8293_v0  ;;  %7393 = vmatpush1.bf16.msra.mxu1 %v8957_v28 }
 0x3b5   :  { %7403 = vmatprep.subr.bf16.mxu1 %v8929_v20 }
 0x482   :  { %v930_v30 = vpop.f32.mrb[0].mxu1 }
 0x483   :  { %v931_v31 = vadd.f32 %v6839_v29, %v930_v30  ;;  %v932_v32 = vpop.f32.mrb[1].mxu1 }
 0x485   :  { %v945_v35 = vmul.f32 %v6842_v18, %v931_v31 }
 0x486   :  { %v935_v36 = vpop.f32.mrb[2].mxu1 }
 0x487   :  { %v953_v37 = vadd.f32 %v6843_v34, %v945_v35  ;;  %v936_v17 = vadd.f32 %v6839_v29, %v935_v36  ;;  %v937_v40 = vpop.f32.mrb[3].mxu1 }
 0x489   :  { %v955_v44 = vmax.f32 %v953_v37, 0.0  ;;  %v946_v45 = vmul.f32 %v6842_v18, %v936_v17 }
 0x48b   :  { %1066 = vmatmul.mubr.f32.vlgmr.msra.gmra.mrb[2].mxu0 %v955_v44  ;;  %v954_v46 = vadd.f32 %v6843_v34, %v946_v45 }
 0x48c   :  { %1071 = vmatprep.mubr.f32.mxu0 %v8293_v0  ;;  %7373 = vmatpush1.bf16.msra.mxu0 %v8937_v23 }
 0x48d   :  { %v956_v47 = vmax.f32 %v954_v46, 0.0  ;;  %7375 = vmatprep.subr.bf16.mxu0 %v8946_v25 }
 0x48f   :  { %1072 = vmatmul.mubr.f32.gmra.mrb[4].mxu0 %v956_v47 }
 0x490   :  { %7377 = vmatpush1.bf16.msra.mxu0 %v8957_v28  ;;  %1212 = vmatprep.mubr.f32.mxu0 %v8293_v0 }
 0x491   :  { %7379 = vmatprep.subr.bf16.mxu0 %v8929_v20 }
 0x493   :  { %1213 = vmatmul.mubr.f32.vlgmr.msra.gmra.mrb[6].mxu0 %v8293_v0 }
 0x494   :  { %7381 = vmatpush1.bf16.msra.mxu0 %v8937_v23  ;;  %1349 = vmatprep.mubr.f32.mxu0 %v8293_v0 }
 0x495   :  { %7383 = vmatprep.subr.bf16.mxu0 %v8946_v25 }
 0x498   :  { %7385 = vmatpush1.bf16.msra.mxu0 %v8957_v28 }
 0x499   :  { %7395 = vmatprep.subr.bf16.mxu0 %v8929_v20 }
 0x55e   :  { %v1067_v51 = vpop.f32.mrb[2].mxu0 }
 0x55f   :  { %v1068_v39 = vadd.f32 %v1067_v51, %v994_v49  ;;  %v1069_v52 = vpop.f32.mrb[3].mxu0 }
 0x560   :  { %v1070_v13 = vadd.f32 %v1069_v52, %v998_v50 }
 0x562   :  { %v1082_v53 = vcombine.low %v1068_v39, %v1070_v13  ;;  %v1083_v54 = vcombine.high %v1068_v39, %v1070_v13  ;;  %v1073_v55 = vpop.f32.mrb[4].mxu0 }
 0x563   :  { %v1074_v33 = vadd.f32 %v1073_v55, %v994_v49  ;;  %v1075_v56 = vpop.f32.mrb[5].mxu0 }
 0x564   :  { %v1090_v57 = vrot.slane %v1082_v53, %v8790_v7  ;;  %v1097_v43 = vrot.slane %v1083_v54, %v8790_v7  ;;  %6844 = vst.sshfl [vmem:[#allocation2] sm:$0x33 pattern:$0x76325410] %v1082_v53  ;;  %v1076_v59 = vadd.f32 %v1075_v56, %v998_v50 }
 0x565   :  { %6845 = vst.sshfl [vmem:[#allocation2 + $0x8] sm:$0x33 pattern:$0x76325410] %v1083_v54 }
 0x566   :  { %v1098_v58 = vcombine.high %v1090_v57, %v1090_v57  ;;  %v1099_v60 = vcombine.high %v1097_v43, %v1097_v43  ;;  %v1100_v61 = vcombine.low %v1074_v33, %v1076_v59  ;;  %v1101_v62 = vcombine.high %v1074_v33, %v1076_v59  ;;  %v1214_v42 = vpop.f32.mrb[6].mxu0 }
 0x567   :  { %v1216_v63 = vpop.f32.mrb[7].mxu0 }
 0x568   :  { %1127 = vst [vmem:[#allocation2 + $0x4] sm:$0xf] %v1098_v58  ;;  %1129 = vst [vmem:[#allocation2 + $0xc] sm:$0xf] %v1099_v60  ;;  %v1108_v1 = vrot.slane %v1100_v61, %v8790_v7  ;;  %v1115_v2 = vrot.slane %v1101_v62, %v8790_v7  ;;  %v1230_v5 = vrot.slane %v1216_v63, %v8790_v7 }
 0x569   :  { %6846 = vst.sshfl [vmem:[#allocation2 + $0x10] sm:$0x33 pattern:$0x76325410] %v1100_v61 }
 0x56a   :  { %6847 = vst.sshfl [vmem:[#allocation2 + $0x18] sm:$0x33 pattern:$0x76325410] %v1101_v62  ;;  %v1116_v3 = vcombine.high %v1108_v1, %v1108_v1  ;;  %v1117_v4 = vcombine.high %v1115_v2, %v1115_v2  ;;  %v1231_v6 = vcombine.high %v1230_v5, %v1230_v5 }
 0x56b   :  { %v1142_v15 = vld [vmem:[#allocation2] sm:$0xf] }
 0x56c   :  { %1131 = vst [vmem:[#allocation2 + $0x14] sm:$0xf] %v1116_v3  ;;  %1133 = vst [vmem:[#allocation2 + $0x1c] sm:$0xf] %v1117_v4  ;;  %v1219_v16 = vadd.f32 %v1214_v42, %v1142_v15 }
 0x56f   :  { %v1280_v49 = vld [vmem:[#allocation2 + $0x4] sm:$0xf] }
 0x571   :  { %v1282_v17 = vld [vmem:[#allocation2 + $0x18] sm:$0xf] }
 0x572   :  { %v1358_v45 = vrot.slane %v1282_v17, 2 }
 0x573   :  { %v1144_v8 = vld [vmem:[#allocation2 + $0x1c] sm:$0xf]  ;;  %v1417_v63 = vld [vmem:[#allocation2 + $0x14] sm:$0xf] }
 0x574   :  { %v1221_v11 = vrot.slane %v1144_v8, 2  ;;  %v1493_v3 = vrot.slane %v1417_v63, 2  ;;  %v1415_v8 = vld [vmem:[#allocation2 + $0x8] sm:$0xf] }
 0x576   :  { %v1233_v12 = vadd.f32 %v1231_v6, %v1221_v11 }
 0x578   :  { %v1235_v9 = vcombine.low %v1233_v12, %v1233_v12 }
 0x57a   :  { %v1242_v10 = vrot.slane %v1235_v9, %v8790_v7 }
 0x57c   :  { %v1245_v19 = vsel %vm1244_vm8, %v1219_v16, %v1242_v10 }
 0x57d   :  { %7636 = vtanh.f32 %v1245_v19  ;;  %v6848_v22 = vmul.f32 -1.442695, %v1245_v19 }
 0x57f   :  { %7638 = vpow2.f32 %v6848_v22 }
 0x587   :  { %v7637_v21 = vpop.eup %7636 }
 0x588   :  { %1255 = vrot.lane.b32.xlu1 %v7637_v21, %s8298_s4 }
 0x589   :  { %v7639_v24 = vpop.eup %7638 }
 0x58a   :  { %v1249_v14 = vadd.f32 1.0, %v7639_v24 }
 0x58c   :  { %7640 = vrcp.f32 %v1249_v14 }
 0x596   :  { %v7641_v26 = vpop.eup %7640 }
 0x597   :  { %v1253_v18 = vmul.f32 0.0, %v7641_v26 }
 0x5fa   :  { %v1256_v27 = vpop.permute.xlu1 %1255 }
 0x5fb   :  { %v1258_v29 = vmul.f32 %v7641_v26, %v1256_v27 }
 0x5fd   :  { %1260 = vrot.lane.b32.xlu0 %v1258_v29, %s8299_s11 }
 0x66f   :  { %v1261_v30 = vpop.permute.xlu0 %1260 }
 0x670   :  { %v1263_v31 = vadd.f32 %v1261_v30, %v1253_v18 }
 0x672   :  { %7642 = vtanh.f32 %v1263_v31 }
 0x67c   :  { %v7643_v32 = vpop.eup %7642 }
 0x67d   :  { %1266 = vrot.lane.b32.xlu1 %v7643_v32, %s8298_s4 }
 0x6ef   :  { %v1267_v34 = vpop.permute.xlu1 %1266 }
 0x6f0   :  { %v1269_v35 = vmul.f32 %v7641_v26, %v1267_v34  ;;  %v1552_v34 = vld [vmem:[#allocation2 + $0x10] sm:$0xf] }
 0x6f2   :  { %1271 = vrot.lane.b32.xlu0 %v1269_v35, %s8299_s11 }
 0x764   :  { %v1272_v36 = vpop.permute.xlu0 %1271 }
 0x765   :  { %1275 = vst.msk [vmem:[#allocation3] sm:$0x3] %vm1274_vm9, %v1272_v36  ;;  %6849 = vmatmul.mubr.msk.f32.vlgmr.msra.gmra.mrb[8].mxu0 %vm1145_vm11, %v1272_v36 }
 0x766   :  { %1278 = vst.msk [vmem:[#allocation4 + $0xc] sm:$0xc] %vm1277_vm10, %v1272_v36  ;;  %7397 = vmatpush1.bf16.msra.mxu0 %v8937_v23  ;;  %1619 = vmatprep.mubr.f32.mxu0 %v8293_v0 }
 0x767   :  { %7399 = vmatprep.subr.bf16.mxu0 %v8946_v25 }
 0x76a   :  { %7401 = vmatpush1.bf16.msra.mxu0 %v8957_v28 }
 0x76b   :  { %7411 = vmatprep.subr.bf16.mxu0 %v8929_v20 }
 0x838   :  { %v1351_v37 = vpop.f32.mrb[8].mxu0 }
 0x839   :  { %v1353_v40 = vpop.f32.mrb[9].mxu0  ;;  %v1356_v50 = vadd.f32 %v1351_v37, %v1280_v49  ;;  %v1628_v37 = vrot.slane %v1552_v34, 2 }
 0x83a   :  { %v1367_v44 = vrot.slane %v1353_v40, %v8790_v7 }
 0x83c   :  { %v1368_v46 = vcombine.high %v1367_v44, %v1367_v44 }
 0x83e   :  { %v1370_v47 = vadd.f32 %v1368_v46, %v1358_v45  ;;  %v1550_v45 = vld [vmem:[#allocation2 + $0xc] sm:$0xf] }
 0x840   :  { %v1372_v48 = vcombine.low %v1370_v47, %v1370_v47 }
 0x842   :  { %v1379_v51 = vrot.slane %v1372_v48, %v8790_v7 }
 0x844   :  { %v1381_v39 = vsel %vm1244_vm8, %v1356_v50, %v1379_v51 }
 0x845   :  { %7644 = vtanh.f32 %v1381_v39  ;;  %v6850_v13 = vmul.f32 -1.442695, %v1381_v39 }
 0x847   :  { %7646 = vpow2.f32 %v6850_v13 }
 0x84f   :  { %v7645_v52 = vpop.eup %7644 }
 0x850   :  { %1391 = vrot.lane.b32.xlu1 %v7645_v52, %s8298_s4 }
 0x851   :  { %v7647_v53 = vpop.eup %7646 }
 0x852   :  { %v1385_v54 = vadd.f32 1.0, %v7647_v53 }
 0x854   :  { %7648 = vrcp.f32 %v1385_v54 }
 0x85e   :  { %v7649_v55 = vpop.eup %7648 }
 0x85f   :  { %v1389_v57 = vmul.f32 %v7649_v55, %v1263_v31 }
 0x8c2   :  { %v1392_v33 = vpop.permute.xlu1 %1391 }
 0x8c3   :  { %v1394_v56 = vmul.f32 %v7649_v55, %v1392_v33 }
 0x8c5   :  { %1396 = vrot.lane.b32.xlu0 %v1394_v56, %s8299_s11 }
 0x937   :  { %v1397_v43 = vpop.permute.xlu0 %1396 }
 0x938   :  { %v1399_v59 = vadd.f32 %v1397_v43, %v1389_v57 }
 0x93a   :  { %7650 = vtanh.f32 %v1399_v59 }
 0x944   :  { %v7651_v58 = vpop.eup %7650 }
 0x945   :  { %1402 = vrot.lane.b32.xlu1 %v7651_v58, %s8298_s4  ;;  %v1685_v58 = vld [vmem:[#allocation2 + $0xc] sm:$0xf] }
 0x9b7   :  { %v1403_v60 = vpop.permute.xlu1 %1402 }
 0x9b8   :  { %v1405_v61 = vmul.f32 %v7649_v55, %v1403_v60 }
 0x9ba   :  { %1407 = vrot.lane.b32.xlu0 %v1405_v61, %s8299_s11 }
 0xa2c   :  { %v1408_v62 = vpop.permute.xlu0 %1407 }
 0xa2d   :  { %1411 = vst.msk [vmem:[#allocation3 + $0x2] sm:$0x3] %vm1274_vm9, %v1408_v62  ;;  %6851 = vmatmul.mubr.msk.f32.vlgmr.msra.gmra.mrb[4].mxu1 %vm1145_vm11, %v1408_v62 }
 0xa2e   :  { %1413 = vst.msk [vmem:[#allocation4 + $0xa] sm:$0xc] %vm1277_vm10, %v1408_v62  ;;  %7405 = vmatpush1.bf16.msra.mxu1 %v8937_v23  ;;  %1752 = vmatprep.mubr.f32.mxu1 %v8293_v0  ;;  %v1761_v62 = vrot.slane %v1685_v58, 2 }
 0xa2f   :  { %7407 = vmatprep.subr.bf16.mxu1 %v8946_v25 }
 0xa32   :  { %7409 = vmatpush1.bf16.msra.mxu1 %v8957_v28 }
 0xa33   :  { %7419 = vmatprep.subr.bf16.mxu1 %v8929_v20 }
 0xb00   :  { %v1486_v42 = vpop.f32.mrb[4].mxu1 }
 0xb01   :  { %v1488_v1 = vpop.f32.mrb[5].mxu1  ;;  %v1491_v11 = vadd.f32 %v1486_v42, %v1415_v8 }
 0xb02   :  { %v1502_v2 = vrot.slane %v1488_v1, %v8790_v7 }
 0xb04   :  { %v1503_v4 = vcombine.high %v1502_v2, %v1502_v2  ;;  %v1684_v2 = vld [vmem:[#allocation2 + $0x10] sm:$0xf] }
 0xb06   :  { %v1505_v5 = vadd.f32 %v1503_v4, %v1493_v3 }
 0xb08   :  { %v1507_v6 = vcombine.low %v1505_v5, %v1505_v5 }
 0xb0a   :  { %v1514_v12 = vrot.slane %v1507_v6, %v8790_v7 }
 0xb0c   :  { %v1516_v15 = vsel %vm1244_vm8, %v1491_v11, %v1514_v12 }
 0xb0d   :  { %7652 = vtanh.f32 %v1516_v15  ;;  %v6852_v16 = vmul.f32 -1.442695, %v1516_v15 }
 0xb0f   :  { %7654 = vpow2.f32 %v6852_v16 }
 0xb17   :  { %v7653_v9 = vpop.eup %7652 }
 0xb18   :  { %1526 = vrot.lane.b32.xlu1 %v7653_v9, %s8298_s4 }
 0xb19   :  { %v7655_v10 = vpop.eup %7654 }
 0xb1a   :  { %v1520_v19 = vadd.f32 1.0, %v7655_v10 }
 0xb1c   :  { %7656 = vrcp.f32 %v1520_v19 }
 0xb26   :  { %v7657_v21 = vpop.eup %7656 }
 0xb27   :  { %v1524_v14 = vmul.f32 %v7657_v21, %v1399_v59 }
 0xb8a   :  { %v1527_v22 = vpop.permute.xlu1 %1526 }
 0xb8b   :  { %v1529_v24 = vmul.f32 %v7657_v21, %v1527_v22 }
 0xb8d   :  { %1531 = vrot.lane.b32.xlu0 %v1529_v24, %s8299_s11 }
 0xbff   :  { %v1532_v26 = vpop.permute.xlu0 %1531 }
 0xc00   :  { %v1534_v27 = vadd.f32 %v1532_v26, %v1524_v14 }
 0xc02   :  { %7658 = vtanh.f32 %v1534_v27 }
 0xc0c   :  { %v7659_v29 = vpop.eup %7658 }
 0xc0d   :  { %1537 = vrot.lane.b32.xlu1 %v7659_v29, %s8298_s4  ;;  %v1818_v29 = vld [vmem:[#allocation2 + $0x8] sm:$0xf] }
 0xc7f   :  { %v1538_v18 = vpop.permute.xlu1 %1537 }
 0xc80   :  { %v1540_v30 = vmul.f32 %v7657_v21, %v1538_v18 }
 0xc82   :  { %1542 = vrot.lane.b32.xlu0 %v1540_v30, %s8299_s11 }
 0xcf4   :  { %v1543_v31 = vpop.permute.xlu0 %1542 }
 0xcf5   :  { %1546 = vst.msk [vmem:[#allocation3 + $0x4] sm:$0x3] %vm1274_vm9, %v1543_v31  ;;  %6853 = vmatmul.mubr.msk.f32.vlgmr.msra.gmra.mrb[10].mxu0 %vm1145_vm11, %v1543_v31 }
 0xcf6   :  { %1548 = vst.msk [vmem:[#allocation4 + $0x8] sm:$0xc] %vm1277_vm10, %v1543_v31  ;;  %7413 = vmatpush1.bf16.msra.mxu0 %v8937_v23  ;;  %1885 = vmatprep.mubr.f32.mxu0 %v8293_v0  ;;  %v1894_v31 = vrot.slane %v1818_v29, 2 }
 0xcf7   :  { %7415 = vmatprep.subr.bf16.mxu0 %v8946_v25 }
 0xcfa   :  { %7417 = vmatpush1.bf16.msra.mxu0 %v8957_v28 }
 0xcfb   :  { %7427 = vmatprep.subr.bf16.mxu0 %v8929_v20 }
 0xdc8   :  { %v1621_v32 = vpop.f32.mrb[10].mxu0 }
 0xdc9   :  { %v1623_v35 = vpop.f32.mrb[11].mxu0  ;;  %v1626_v46 = vadd.f32 %v1621_v32, %v1550_v45 }
 0xdca   :  { %v1637_v36 = vrot.slane %v1623_v35, %v8790_v7 }
 0xdcc   :  { %v1638_v17 = vcombine.high %v1637_v36, %v1637_v36  ;;  %v1817_v36 = vld [vmem:[#allocation2 + $0x14] sm:$0xf] }
 0xdce   :  { %v1640_v40 = vadd.f32 %v1638_v17, %v1628_v37 }
 0xdd0   :  { %v1642_v44 = vcombine.low %v1640_v40, %v1640_v40 }
 0xdd2   :  { %v1649_v47 = vrot.slane %v1642_v44, %v8790_v7 }
 0xdd4   :  { %v1651_v48 = vsel %vm1244_vm8, %v1626_v46, %v1649_v47 }
 0xdd5   :  { %7660 = vtanh.f32 %v1651_v48  ;;  %v6854_v20 = vmul.f32 -1.442695, %v1651_v48 }
 0xdd7   :  { %7662 = vpow2.f32 %v6854_v20 }
 0xddf   :  { %v7661_v49 = vpop.eup %7660 }
 0xde0   :  { %1661 = vrot.lane.b32.xlu1 %v7661_v49, %s8298_s4 }
 0xde1   :  { %v7663_v50 = vpop.eup %7662 }
 0xde2   :  { %v1655_v51 = vadd.f32 1.0, %v7663_v50 }
 0xde4   :  { %7664 = vrcp.f32 %v1655_v51 }
 0xdee   :  { %v7665_v39 = vpop.eup %7664 }
 0xdef   :  { %v1659_v53 = vmul.f32 %v7665_v39, %v1534_v27 }
 0xe52   :  { %v1662_v52 = vpop.permute.xlu1 %1661 }
 0xe53   :  { %v1664_v13 = vmul.f32 %v7665_v39, %v1662_v52 }
 0xe55   :  { %1666 = vrot.lane.b32.xlu0 %v1664_v13, %s8299_s11 }
 0xec7   :  { %v1667_v54 = vpop.permute.xlu0 %1666 }
 0xec8   :  { %v1669_v55 = vadd.f32 %v1667_v54, %v1659_v53  ;;  %v1951_v53 = vld [vmem:[#allocation2 + $0x4] sm:$0xf] }
 0xeca   :  { %7666 = vtanh.f32 %v1669_v55 }
 0xed4   :  { %v7667_v33 = vpop.eup %7666 }
 0xed5   :  { %1672 = vrot.lane.b32.xlu1 %v7667_v33, %s8298_s4  ;;  %v2027_v33 = vrot.slane %v1951_v53, 2 }
 0xf47   :  { %v1673_v56 = vpop.permute.xlu1 %1672 }
 0xf48   :  { %v1675_v57 = vmul.f32 %v7665_v39, %v1673_v56 }
 0xf4a   :  { %1677 = vrot.lane.b32.xlu0 %v1675_v57, %s8299_s11 }
 0xfbc   :  { %v1678_v43 = vpop.permute.xlu0 %1677 }
 0xfbd   :  { %1681 = vst.msk [vmem:[#allocation3 + $0x6] sm:$0x3] %vm1274_vm9, %v1678_v43  ;;  %6855 = vmatmul.mubr.msk.f32.vlgmr.msra.gmra.mrb[6].mxu1 %vm1145_vm11, %v1678_v43 }
 0xfbe   :  { %1683 = vst.msk [vmem:[#allocation4 + $0x6] sm:$0xc] %vm1277_vm10, %v1678_v43  ;;  %7421 = vmatpush1.bf16.msra.mxu1 %v8937_v23  ;;  %2018 = vmatprep.mubr.f32.mxu1 %v8293_v0 }
 0xfbf   :  { %7423 = vmatprep.subr.bf16.mxu1 %v8946_v25 }
 0xfc2   :  { %7425 = vmatpush1.bf16.msra.mxu1 %v8957_v28 }
0x1090   :  { %v1754_v59 = vpop.f32.mrb[6].mxu1 }
0x1091   :  { %v1756_v60 = vpop.f32.mrb[7].mxu1  ;;  %v1759_v3 = vadd.f32 %v1754_v59, %v1684_v2  ;;  %v1950_v59 = vld [vmem:[#allocation2 + $0x18] sm:$0xf] }
0x1092   :  { %v1770_v61 = vrot.slane %v1756_v60, %v8790_v7 }
0x1094   :  { %v1771_v42 = vcombine.high %v1770_v61, %v1770_v61 }
0x1096   :  { %v1773_v63 = vadd.f32 %v1771_v42, %v1761_v62 }
0x1098   :  { %v1775_v1 = vcombine.low %v1773_v63, %v1773_v63 }
0x109a   :  { %v1782_v4 = vrot.slane %v1775_v1, %v8790_v7 }
0x109c   :  { %v1784_v5 = vsel %vm1244_vm8, %v1759_v3, %v1782_v4 }
0x109d   :  { %7668 = vtanh.f32 %v1784_v5  ;;  %v6856_v8 = vmul.f32 -1.442695, %v1784_v5 }
0x109f   :  { %7670 = vpow2.f32 %v6856_v8 }
0x10a7   :  { %v7669_v6 = vpop.eup %7668 }
0x10a8   :  { %1794 = vrot.lane.b32.xlu1 %v7669_v6, %s8298_s4 }
0x10a9   :  { %v7671_v11 = vpop.eup %7670 }
0x10aa   :  { %v1788_v12 = vadd.f32 1.0, %v7671_v11 }
0x10ac   :  { %7672 = vrcp.f32 %v1788_v12 }
0x10b6   :  { %v7673_v15 = vpop.eup %7672 }
0x10b7   :  { %v1792_v10 = vmul.f32 %v7673_v15, %v1669_v55 }
0x111a   :  { %v1795_v9 = vpop.permute.xlu1 %1794 }
0x111b   :  { %v1797_v16 = vmul.f32 %v7673_v15, %v1795_v9 }
0x111d   :  { %1799 = vrot.lane.b32.xlu0 %v1797_v16, %s8299_s11 }
0x118f   :  { %v1800_v19 = vpop.permute.xlu0 %1799 }
0x1190   :  { %v1802_v21 = vadd.f32 %v1800_v19, %v1792_v10  ;;  %v2084_v10 = vld [vmem:[#allocation2] sm:$0xf] }
0x1192   :  { %7674 = vtanh.f32 %v1802_v21 }
0x119c   :  { %v7675_v22 = vpop.eup %7674 }
0x119d   :  { %1805 = vrot.lane.b32.xlu1 %v7675_v22, %s8298_s4  ;;  %v2160_v22 = vrot.slane %v2084_v10, 2  ;;  %v2480_v10 = vld [vmem:[#allocation18 + $0x10] sm:$0xff] }
0x120f   :  { %v1806_v24 = vpop.permute.xlu1 %1805 }
0x1210   :  { %v1808_v14 = vmul.f32 %v7673_v15, %v1806_v24 }
0x1212   :  { %1810 = vrot.lane.b32.xlu0 %v1808_v14, %s8299_s11 }
0x1284   :  { %v1811_v26 = vpop.permute.xlu0 %1810 }
0x1285   :  { %1814 = vst.msk [vmem:[#allocation3 + $0x8] sm:$0x3] %vm1274_vm9, %v1811_v26  ;;  %6857 = vmatmul.mubr.msk.f32.vlgmr.msra.gmra.mrb[12].mxu0 %vm1145_vm11, %v1811_v26 }
0x1286   :  { %1816 = vst.msk [vmem:[#allocation4 + $0x4] sm:$0xc] %vm1277_vm10, %v1811_v26  ;;  %7429 = vmatpush1.bf16.msra.mxu0 %v8937_v23  ;;  %2151 = vmatprep.mubr.f32.mxu0 %v8293_v0 }
0x1287   :  { %7431 = vmatprep.subr.bf16.mxu0 %v8946_v25 }
0x128a   :  { %7433 = vmatpush1.bf16.msra.mxu0 %v8957_v28 }
0x1358   :  { %v1887_v27 = vpop.f32.mrb[12].mxu0 }
0x1359   :  { %v1889_v18 = vpop.f32.mrb[13].mxu0  ;;  %v1892_v37 = vadd.f32 %v1887_v27, %v1817_v36  ;;  %v2083_v27 = vld [vmem:[#allocation2 + $0x1c] sm:$0xf] }
0x135a   :  { %v1903_v30 = vrot.slane %v1889_v18, %v8790_v7 }
0x135c   :  { %v1904_v32 = vcombine.high %v1903_v30, %v1903_v30 }
0x135e   :  { %v1906_v34 = vadd.f32 %v1904_v32, %v1894_v31 }
0x1360   :  { %v1908_v35 = vcombine.low %v1906_v34, %v1906_v34 }
0x1362   :  { %v1915_v17 = vrot.slane %v1908_v35, %v8790_v7 }
0x1364   :  { %v1917_v23 = vsel %vm1244_vm8, %v1892_v37, %v1915_v17 }
0x1365   :  { %7676 = vtanh.f32 %v1917_v23  ;;  %v6858_v25 = vmul.f32 -1.442695, %v1917_v23 }
0x1367   :  { %7678 = vpow2.f32 %v6858_v25 }
0x136f   :  { %v7677_v40 = vpop.eup %7676 }
0x1370   :  { %1927 = vrot.lane.b32.xlu1 %v7677_v40, %s8298_s4 }
0x1371   :  { %v7679_v28 = vpop.eup %7678 }
0x1372   :  { %v1921_v44 = vadd.f32 1.0, %v7679_v28 }
0x1374   :  { %7680 = vrcp.f32 %v1921_v44 }
0x137e   :  { %v7681_v45 = vpop.eup %7680 }
0x137f   :  { %v1925_v48 = vmul.f32 %v7681_v45, %v1802_v21 }
0x13e2   :  { %v1928_v46 = vpop.permute.xlu1 %1927 }
0x13e3   :  { %v1930_v47 = vmul.f32 %v7681_v45, %v1928_v46 }
0x13e5   :  { %1932 = vrot.lane.b32.xlu0 %v1930_v47, %s8299_s11 }
0x1457   :  { %v1933_v49 = vpop.permute.xlu0 %1932 }
0x1458   :  { %v1935_v20 = vadd.f32 %v1933_v49, %v1925_v48  ;;  %v2272_v49 = vld [vmem:[#allocation16 + $0x8] sm:$0xff] }
0x145a   :  { %7682 = vtanh.f32 %v1935_v20 }
0x1464   :  { %v7683_v50 = vpop.eup %7682 }
0x1465   :  { %1938 = vrot.lane.b32.xlu1 %v7683_v50, %s8298_s4  ;;  %v2271_v50 = vld [vmem:[#allocation16] sm:$0xff] }
0x14d7   :  { %v1939_v51 = vpop.permute.xlu1 %1938 }
0x14d8   :  { %v1941_v39 = vmul.f32 %v7681_v45, %v1939_v51  ;;  %v2227_v45 = vld [vmem:[#allocation4 + $0x8] sm:$0x3] }
0x14da   :  { %1943 = vrot.lane.b32.xlu0 %v1941_v39, %s8299_s11  ;;  %v2273_v39 = vld [vmem:[#allocation16 + $0x10] sm:$0xff] }
0x14db   :  { %v7436_v53 = vpack.c.bf16 %v2273_v39, %v2271_v50 }
0x154c   :  { %v1944_v52 = vpop.permute.xlu0 %1943 }
0x154d   :  { %1947 = vst.msk [vmem:[#allocation3 + $0xa] sm:$0x3] %vm1274_vm9, %v1944_v52  ;;  %6859 = vmatmul.mubr.msk.f32.vlgmr.msra.gmra.mrb[8].mxu1 %vm1145_vm11, %v1944_v52 }
0x154e   :  { %1949 = vst.msk [vmem:[#allocation4 + $0x2] sm:$0xc] %vm1277_vm10, %v1944_v52  ;;  %2814 = vmatprep.mubr.f32.mxu1 %v8293_v0  ;;  %v2276_v52 = vld [vmem:[#allocation16 + $0x28] sm:$0xff] }
0x1555   :  { %v2225_v44 = vld [vmem:[#allocation4 + $0x4] sm:$0x3] }
0x1620   :  { %v2020_v13 = vpop.f32.mrb[8].mxu1 }
0x1621   :  { %v2022_v54 = vpop.f32.mrb[9].mxu1  ;;  %v2025_v58 = vadd.f32 %v2020_v13, %v1950_v59  ;;  %v2278_v13 = vld [vmem:[#allocation16 + $0x38] sm:$0xff] }
0x1622   :  { %v2036_v55 = vrot.slane %v2022_v54, %v8790_v7  ;;  %v7438_v54 = vpack.c.bf16 %v2278_v13, %v2276_v52 }
0x1624   :  { %v2037_v56 = vcombine.high %v2036_v55, %v2036_v55  ;;  %v2275_v55 = vld [vmem:[#allocation16 + $0x20] sm:$0xff] }
0x1626   :  { %v2039_v57 = vadd.f32 %v2037_v56, %v2027_v33  ;;  %v2277_v33 = vld [vmem:[#allocation16 + $0x30] sm:$0xff]  ;;  %v2280_v56 = vld [vmem:[#allocation16 + $0x48] sm:$0xff] }
0x1627   :  { %v7440_v59 = vpack.c.bf16 %v2277_v33, %v2275_v55 }
0x1628   :  { %v2041_v43 = vcombine.low %v2039_v57, %v2039_v57  ;;  %v2282_v57 = vld [vmem:[#allocation16 + $0x58] sm:$0xff] }
0x162a   :  { %v2048_v60 = vrot.slane %v2041_v43, %v8790_v7  ;;  %v2226_v43 = vld [vmem:[#allocation4 + $0x6] sm:$0x3] }
0x162c   :  { %v2050_v61 = vsel %vm1244_vm8, %v2025_v58, %v2048_v60  ;;  %v7442_v58 = vpack.c.bf16 %v2282_v57, %v2280_v56  ;;  %v2228_v60 = vld [vmem:[#allocation4 + $0xa] sm:$0x3] }
0x162d   :  { %7684 = vtanh.f32 %v2050_v61  ;;  %v6860_v42 = vmul.f32 -1.442695, %v2050_v61  ;;  %v2230_v61 = vld [vmem:[#allocation4 + $0xe] sm:$0x3] }
0x162f   :  { %7686 = vpow2.f32 %v6860_v42  ;;  %v2281_v42 = vld [vmem:[#allocation16 + $0x50] sm:$0xff] }
0x1637   :  { %v7685_v62 = vpop.eup %7684 }
0x1638   :  { %2060 = vrot.lane.b32.xlu1 %v7685_v62, %s8298_s4  ;;  %v2279_v62 = vld [vmem:[#allocation16 + $0x40] sm:$0xff] }
0x1639   :  { %v7687_v63 = vpop.eup %7686 }
0x163a   :  { %v2054_v1 = vadd.f32 1.0, %v7687_v63  ;;  %v7444_v63 = vpack.c.bf16 %v2281_v42, %v2279_v62 }
0x163c   :  { %7688 = vrcp.f32 %v2054_v1 }
0x1646   :  { %v7689_v2 = vpop.eup %7688 }
0x1647   :  { %v2058_v5 = vmul.f32 %v7689_v2, %v1935_v20  ;;  %v2274_v20 = vld [vmem:[#allocation16 + $0x18] sm:$0xff] }
0x1648   :  { %v7434_v51 = vpack.c.bf16 %v2274_v20, %v2272_v49 }
0x164a   :  { %7435 = vmatprep.subr.bf16.mxu0 %v7434_v51 }
0x16aa   :  { %v2061_v3 = vpop.permute.xlu1 %2060 }
0x16ab   :  { %v2063_v4 = vmul.f32 %v7689_v2, %v2061_v3  ;;  %v2286_v3 = vld [vmem:[#allocation16 + $0x78] sm:$0xff] }
0x16ad   :  { %2065 = vrot.lane.b32.xlu0 %v2063_v4, %s8299_s11 }
0x171f   :  { %v2066_v6 = vpop.permute.xlu0 %2065 }
0x1720   :  { %v2068_v8 = vadd.f32 %v2066_v6, %v2058_v5  ;;  %v2283_v5 = vld [vmem:[#allocation16 + $0x60] sm:$0xff]  ;;  %v2285_v6 = vld [vmem:[#allocation16 + $0x70] sm:$0xff] }
0x1722   :  { %7690 = vtanh.f32 %v2068_v8 }
0x172c   :  { %v7691_v11 = vpop.eup %7690 }
0x172d   :  { %2071 = vrot.lane.b32.xlu1 %v7691_v11, %s8298_s4  ;;  %v2479_v11 = vld [vmem:[#allocation18 + $0x8] sm:$0xff] }
0x179f   :  { %v2072_v12 = vpop.permute.xlu1 %2071 }
0x17a0   :  { %v2074_v15 = vmul.f32 %v7689_v2, %v2072_v12  ;;  %v2284_v2 = vld [vmem:[#allocation16 + $0x68] sm:$0xff]  ;;  %v2481_v12 = vld [vmem:[#allocation18 + $0x18] sm:$0xff] }
0x17a1   :  { %v7446_v4 = vpack.c.bf16 %v2286_v3, %v2284_v2 }
0x17a2   :  { %2076 = vrot.lane.b32.xlu0 %v2074_v15, %s8299_s11  ;;  %v2478_v15 = vld [vmem:[#allocation18] sm:$0xff] }
0x1814   :  { %v2077_v9 = vpop.permute.xlu0 %2076 }
0x1815   :  { %2080 = vst.msk [vmem:[#allocation3 + $0xc] sm:$0x3] %vm1274_vm9, %v2077_v9  ;;  %6861 = vmatmul.mubr.msk.f32.vlgmr.msra.gmra.mrb[14].mxu0 %vm1145_vm11, %v2077_v9 }
0x1816   :  { %2082 = vst.msk [vmem:[#allocation4] sm:$0xc] %vm1277_vm10, %v2077_v9  ;;  %2409 = vmatprep.mubr.f32.mxu0 %v8293_v0  ;;  %7437 = vmatpush1.bf16.msra.mxu0 %v7436_v53 }
0x1817   :  { %7439 = vmatprep.subr.bf16.mxu0 %v7438_v54 }
0x181a   :  { %7441 = vmatpush1.bf16.msra.mxu0 %v7440_v59 }
0x181b   :  { %7443 = vmatprep.subr.bf16.mxu0 %v7442_v58 }
0x181c   :  { %v2221_v53 = vld [vmem:[#allocation3 + $0xc] sm:$0x3] }
0x181d   :  { %v2224_v48 = vld [vmem:[#allocation4 + $0x2] sm:$0x3] }
0x181e   :  { %7445 = vmatpush1.bf16.msra.mxu0 %v7444_v63 }
0x181f   :  { %7447 = vmatprep.subr.bf16.mxu0 %v7446_v4 }
0x18e8   :  { %v2153_v16 = vpop.f32.mrb[14].mxu0 }
0x18e9   :  { %v2155_v19 = vpop.f32.mrb[15].mxu0  ;;  %v2158_v29 = vadd.f32 %v2153_v16, %v2083_v27  ;;  %v9098_v16 = vpack.c.bf16 %v2481_v12, %v2479_v11  ;;  %v2229_v27 = vld [vmem:[#allocation4 + $0xc] sm:$0x3] }
0x18ea   :  { %v2169_v21 = vrot.slane %v2155_v19, %v8790_v7  ;;  %v9101_v19 = vpack.c.bf16 %v2480_v10, %v2478_v15 }
0x18eb   :  { %7467 = vmatprep.subr.bf16.mxu1 %v9098_v16 }
0x18ec   :  { %v2170_v24 = vcombine.high %v2169_v21, %v2169_v21  ;;  %v2483_v21 = vld [vmem:[#allocation18 + $0x28] sm:$0xff]  ;;  %7469 = vmatpush1.bf16.msra.mxu1 %v9101_v19 }
0x18ee   :  { %v2172_v14 = vadd.f32 %v2170_v24, %v2160_v22  ;;  %v2485_v22 = vld [vmem:[#allocation18 + $0x38] sm:$0xff] }
0x18ef   :  { %v9104_v24 = vpack.c.bf16 %v2485_v22, %v2483_v21 }
0x18f0   :  { %v2174_v26 = vcombine.low %v2172_v14, %v2172_v14  ;;  %v2482_v14 = vld [vmem:[#allocation18 + $0x20] sm:$0xff] }
0x18f1   :  { %7471 = vmatprep.subr.bf16.mxu1 %v9104_v24 }
0x18f2   :  { %v2181_v18 = vrot.slane %v2174_v26, %v8790_v7  ;;  %v2484_v26 = vld [vmem:[#allocation18 + $0x30] sm:$0xff] }
0x18f4   :  { %v2183_v30 = vsel %vm1244_vm8, %v2158_v29, %v2181_v18  ;;  %v9110_v29 = vpack.c.bf16 %v2484_v26, %v2482_v14 }
0x18f5   :  { %7692 = vtanh.f32 %v2183_v30  ;;  %v6862_v32 = vmul.f32 -1.442695, %v2183_v30 }
0x18f6   :  { %7473 = vmatpush1.bf16.msra.mxu1 %v9110_v29 }
0x18f7   :  { %7694 = vpow2.f32 %v6862_v32  ;;  %7483 = vmatprep.subr.bf16.mxu1 %v9098_v16 }
0x18ff   :  { %v7693_v31 = vpop.eup %7692 }
0x1900   :  { %2193 = vrot.lane.b32.xlu1 %v7693_v31, %s8298_s4 }
0x1901   :  { %v7695_v34 = vpop.eup %7694 }
0x1902   :  { %v2187_v35 = vadd.f32 1.0, %v7695_v34  ;;  %v2218_v34 = vld [vmem:[#allocation3 + $0x6] sm:$0x3] }
0x1904   :  { %7696 = vrcp.f32 %v2187_v35 }
0x190e   :  { %v7697_v36 = vpop.eup %7696 }
0x190f   :  { %v2191_v23 = vmul.f32 %v7697_v36, %v2068_v8  ;;  %v7448_v8 = vpack.c.bf16 %v2285_v6, %v2283_v5 }
0x1911   :  { %7449 = vmatpush1.bf16.msra.mxu0 %v7448_v8 }
0x1912   :  { %7451 = vmatprep.subr.bf16.mxu0 %v9098_v16 }
0x1972   :  { %v2194_v37 = vpop.permute.xlu1 %2193 }
0x1973   :  { %v2196_v17 = vmul.f32 %v7697_v36, %v2194_v37  ;;  %v2217_v37 = vld [vmem:[#allocation3 + $0x4] sm:$0x3] }
0x1975   :  { %2198 = vrot.lane.b32.xlu0 %v2196_v17, %s8299_s11 }
0x19e7   :  { %v2199_v40 = vpop.permute.xlu0 %2198 }
0x19e8   :  { %v2201_v25 = vadd.f32 %v2199_v40, %v2191_v23  ;;  %v2216_v23 = vld [vmem:[#allocation3 + $0x2] sm:$0x3] }
0x19ea   :  { %7698 = vtanh.f32 %v2201_v25  ;;  %v2220_v25 = vld [vmem:[#allocation3 + $0xa] sm:$0x3] }
0x19f4   :  { %v7699_v28 = vpop.eup %7698 }
0x19f5   :  { %2204 = vrot.lane.b32.xlu1 %v7699_v28, %s8298_s4  ;;  %v2215_v28 = vld [vmem:[#allocation3] sm:$0x3] }
0x19f9   :  { %2243 = vrot.lane.b32.xlu1 %v2225_v44, %s8299_s11 }
0x19fd   :  { %2247 = vrot.lane.b32.xlu1 %v2227_v45, %s8299_s11 }
0x1a67   :  { %v2205_v46 = vpop.permute.xlu1 %2204 }
0x1a68   :  { %v2207_v47 = vmul.f32 %v7697_v36, %v2205_v46 }
0x1a6a   :  { %2209 = vrot.lane.b32.xlu0 %v2207_v47, %s8299_s11 }
0x1a6b   :  { %v2244_v30 = vpop.permute.xlu1 %2243 }
0x1a6c   :  { %v2265_v17 = vsel %vm1145_vm11, %v2217_v37, %v2244_v30 }
0x1a6e   :  { %2241 = vrot.lane.b32.xlu0 %v2224_v48, %s8299_s11  ;;  %v2219_v48 = vld [vmem:[#allocation3 + $0x8] sm:$0x3] }
0x1a6f   :  { %v2248_v32 = vpop.permute.xlu1 %2247 }
0x1a70   :  { %v2267_v50 = vsel %vm1145_vm11, %v2219_v48, %v2248_v32 }
0x1a72   :  { %2245 = vrot.lane.b32.xlu0 %v2226_v43, %s8299_s11 }
0x1a76   :  { %2249 = vrot.lane.b32.xlu0 %v2228_v60, %s8299_s11  ;;  %v2287_v60 = vld [vmem:[%s9828_s14] sm:$0x3]  ;;  %s8300_s14 = smov 120  }
0x1a77   :  { %v2296_v62 = vrot.slane %v2287_v60, %v8980_v41 }
0x1a7a   :  { %2253 = vrot.lane.b32.xlu0 %v2230_v61, %s8299_s11  ;;  %v2292_v61 = vrot.slane %v2287_v60, %v8974_v38 }
0x1adc   :  { %v2210_v1 = vpop.permute.xlu0 %2209 }
0x1add   :  { %2213 = vst.msk [vmem:[#allocation3 + $0xe] sm:$0x3] %vm1274_vm9, %v2210_v1 }
0x1ade   :  { %2214 = vst.msk [vmem:[#allocation4 - $0x2] sm:$0xc] %vm1277_vm10, %v2210_v1 }
0x1ae0   :  { %v2242_v18 = vpop.permute.xlu0 %2241 }
0x1ae1   :  { %v2264_v45 = vsel %vm1145_vm11, %v2216_v23, %v2242_v18 }
0x1ae4   :  { %v2246_v31 = vpop.permute.xlu0 %2245  ;;  %v2222_v52 = vld [vmem:[#allocation3 + $0xe] sm:$0x3] }
0x1ae5   :  { %v2223_v9 = vld [vmem:[#allocation4] sm:$0x3]  ;;  %v2266_v36 = vsel %vm1145_vm11, %v2218_v34, %v2246_v31 }
0x1ae6   :  { %2239 = vrot.lane.b32.xlu1 %v2223_v9, %s8299_s11  ;;  %v2308_v40 = vcombine.low %v2265_v17, %v2266_v36 }
0x1ae8   :  { %v2250_v35 = vpop.permute.xlu0 %2249  ;;  %v2322_v51 = vrot.slane %v2308_v40, %v8790_v7 }
0x1ae9   :  { %v2268_v46 = vsel %vm1145_vm11, %v2220_v25, %v2250_v35 }
0x1aea   :  { %2251 = vrot.lane.b32.xlu1 %v2229_v27, %s8299_s11  ;;  %v2324_v39 = vcombine.low %v2267_v50, %v2268_v46 }
0x1aec   :  { %v2254_v49 = vpop.permute.xlu0 %2253  ;;  %v2332_v43 = vrot.slane %v2324_v39, %v8790_v7 }
0x1aed   :  { %v2270_v55 = vsel %vm1145_vm11, %v2222_v52, %v2254_v49 }
0x1b58   :  { %v2240_v44 = vpop.permute.xlu1 %2239 }
0x1b59   :  { %v2263_v47 = vsel %vm1145_vm11, %v2215_v28, %v2240_v44 }
0x1b5a   :  { %v2307_v20 = vcombine.low %v2263_v47, %v2264_v45 }
0x1b5c   :  { %v2315_v13 = vrot.slane %v2307_v20, %v8790_v7  ;;  %v2252_v54 = vpop.permute.xlu1 %2251 }
0x1b5d   :  { %v2269_v33 = vsel %vm1145_vm11, %v2221_v53, %v2252_v54 }
0x1b5e   :  { %v2323_v56 = vcombine.low %v2315_v13, %v2322_v51  ;;  %v2325_v57 = vcombine.low %v2269_v33, %v2270_v55 }
0x1b60   :  { %v2339_v59 = vrot.slane %v2325_v57, %v8790_v7  ;;  %6863 = vmatmul.mubr.msk.f32.vlgmr.msra.gmra.mrb[16].mxu0 %vm735_vm7, %v2323_v56 }
0x1b61   :  { %2415 = vmatprep.mubr.f32.mxu0 %v8293_v0  ;;  %7453 = vmatpush1.bf16.msra.mxu0 %v9101_v19 }
0x1b62   :  { %v2340_v58 = vcombine.low %v2332_v43, %v2339_v59  ;;  %7455 = vmatprep.subr.bf16.mxu0 %v9104_v24 }
0x1b64   :  { %6864 = vmatmul.mubr.msk.f32.gmra.mrb[18].mxu0 %vm735_vm7, %v2340_v58 }
0x1b65   :  { %7457 = vmatpush1.bf16.msra.mxu0 %v9110_v29  ;;  %2552 = vmatprep.mubr.f32.mxu0 %v8293_v0 }
0x1b66   :  { %7459 = vmatprep.subr.bf16.mxu0 %v9098_v16 }
0x1b68   :  { %2553 = vmatmul.mubr.f32.vlgmr.msra.gmra.mrb[20].mxu0 %v8293_v0 }
0x1b69   :  { %7461 = vmatpush1.bf16.msra.mxu0 %v9101_v19  ;;  %2683 = vmatprep.mubr.f32.mxu0 %v8293_v0 }
0x1b6a   :  { %7463 = vmatprep.subr.bf16.mxu0 %v9104_v24 }
0x1b6d   :  { %7465 = vmatpush1.bf16.msra.mxu0 %v9110_v29 }
0x1b6e   :  { %7475 = vmatprep.subr.bf16.mxu0 %v9098_v16 }
0x1c33   :  { %v2411_v42 = vpop.f32.mrb[16].mxu0 }
0x1c34   :  { %v2412_v63 = vadd.f32 %v2411_v42, %v2292_v61  ;;  %v2413_v1 = vpop.f32.mrb[17].mxu0 }
0x1c35   :  { %v2414_v2 = vadd.f32 %v2413_v1, %v2296_v62 }
0x1c37   :  { %v2426_v3 = vcombine.low %v2412_v63, %v2414_v2  ;;  %v2427_v4 = vcombine.high %v2412_v63, %v2414_v2  ;;  %v2417_v5 = vpop.f32.mrb[18].mxu0 }
0x1c38   :  { %v2418_v6 = vadd.f32 %v2417_v5, %v2292_v61  ;;  %v2419_v8 = vpop.f32.mrb[19].mxu0 }
0x1c39   :  { %v2434_v11 = vrot.slane %v2426_v3, %v8790_v7  ;;  %v2441_v12 = vrot.slane %v2427_v4, %v8790_v7  ;;  %6865 = vst.sshfl [vmem:[#allocation2] sm:$0x33 pattern:$0x76325410] %v2426_v3  ;;  %v2420_v15 = vadd.f32 %v2419_v8, %v2296_v62 }
0x1c3a   :  { %6866 = vst.sshfl [vmem:[#allocation2 + $0x8] sm:$0x33 pattern:$0x76325410] %v2427_v4 }
0x1c3b   :  { %v2442_v9 = vcombine.high %v2434_v11, %v2434_v11  ;;  %v2443_v10 = vcombine.high %v2441_v12, %v2441_v12  ;;  %v2444_v21 = vcombine.low %v2418_v6, %v2420_v15  ;;  %v2445_v22 = vcombine.high %v2418_v6, %v2420_v15  ;;  %v2554_v14 = vpop.f32.mrb[20].mxu0 }
0x1c3c   :  { %v2556_v26 = vpop.f32.mrb[21].mxu0 }
0x1c3d   :  { %2471 = vst [vmem:[#allocation2 + $0x4] sm:$0xf] %v2442_v9  ;;  %2473 = vst [vmem:[#allocation2 + $0xc] sm:$0xf] %v2443_v10  ;;  %v2452_v27 = vrot.slane %v2444_v21, %v8790_v7  ;;  %v2459_v18 = vrot.slane %v2445_v22, %v8790_v7  ;;  %v2570_v32 = vrot.slane %v2556_v26, %v8790_v7 }
0x1c3e   :  { %6867 = vst.sshfl [vmem:[#allocation2 + $0x10] sm:$0x33 pattern:$0x76325410] %v2444_v21 }
0x1c3f   :  { %6868 = vst.sshfl [vmem:[#allocation2 + $0x18] sm:$0x33 pattern:$0x76325410] %v2445_v22  ;;  %v2460_v30 = vcombine.high %v2452_v27, %v2452_v27  ;;  %v2461_v31 = vcombine.high %v2459_v18, %v2459_v18  ;;  %v2571_v34 = vcombine.high %v2570_v32, %v2570_v32 }
0x1c40   :  { %v2486_v17 = vld [vmem:[#allocation2] sm:$0xf] }
0x1c41   :  { %2475 = vst [vmem:[#allocation2 + $0x14] sm:$0xf] %v2460_v30  ;;  %2477 = vst [vmem:[#allocation2 + $0x1c] sm:$0xf] %v2461_v31  ;;  %v2559_v40 = vadd.f32 %v2554_v14, %v2486_v17 }
0x1c44   :  { %v2615_v61 = vld [vmem:[#allocation2 + $0x4] sm:$0xf] }
0x1c46   :  { %v2616_v33 = vld [vmem:[#allocation2 + $0x18] sm:$0xf] }
0x1c47   :  { %v2692_v43 = vrot.slane %v2616_v33, 2 }
0x1c48   :  { %v2487_v35 = vld [vmem:[#allocation2 + $0x1c] sm:$0xf]  ;;  %v2747_v26 = vld [vmem:[#allocation2 + $0x14] sm:$0xf] }
0x1c49   :  { %v2561_v36 = vrot.slane %v2487_v35, 2  ;;  %v2823_v30 = vrot.slane %v2747_v26, 2  ;;  %v2746_v35 = vld [vmem:[#allocation2 + $0x8] sm:$0xf] }
0x1c4b   :  { %v2573_v37 = vadd.f32 %v2571_v34, %v2561_v36 }
0x1c4d   :  { %v2575_v23 = vcombine.low %v2573_v37, %v2573_v37 }
0x1c4f   :  { %v2582_v25 = vrot.slane %v2575_v23, %v8790_v7 }
0x1c51   :  { %v2584_v28 = vsel %vm1244_vm8, %v2559_v40, %v2582_v25 }
0x1c52   :  { %7700 = vtanh.f32 %v2584_v28  ;;  %v6869_v45 = vmul.f32 -1.442695, %v2584_v28 }
0x1c54   :  { %7702 = vpow2.f32 %v6869_v45 }
0x1c5c   :  { %v7701_v44 = vpop.eup %7700 }
0x1c5d   :  { %2594 = vrot.lane.b32.xlu1 %v7701_v44, %s8298_s4 }
0x1c5e   :  { %v7703_v46 = vpop.eup %7702 }
0x1c5f   :  { %v2588_v47 = vadd.f32 1.0, %v7703_v46 }
0x1c61   :  { %7704 = vrcp.f32 %v2588_v47 }
0x1c6b   :  { %v7705_v48 = vpop.eup %7704 }
0x1c6c   :  { %v2592_v50 = vmul.f32 0.0, %v7705_v48 }
0x1ccf   :  { %v2595_v49 = vpop.permute.xlu1 %2594 }
0x1cd0   :  { %v2597_v20 = vmul.f32 %v7705_v48, %v2595_v49 }
0x1cd2   :  { %2599 = vrot.lane.b32.xlu0 %v2597_v20, %s8299_s11 }
0x1d44   :  { %v2600_v51 = vpop.permute.xlu0 %2599 }
0x1d45   :  { %v2602_v39 = vadd.f32 %v2600_v51, %v2592_v50 }
0x1d47   :  { %7706 = vtanh.f32 %v2602_v39 }
0x1d51   :  { %v7707_v52 = vpop.eup %7706 }
0x1d52   :  { %2605 = vrot.lane.b32.xlu1 %v7707_v52, %s8298_s4 }
0x1dc4   :  { %v2606_v13 = vpop.permute.xlu1 %2605 }
0x1dc5   :  { %v2608_v53 = vmul.f32 %v7705_v48, %v2606_v13  ;;  %v2878_v13 = vld [vmem:[#allocation2 + $0x10] sm:$0xf] }
0x1dc7   :  { %2610 = vrot.lane.b32.xlu0 %v2608_v53, %s8299_s11 }
0x1e39   :  { %v2611_v54 = vpop.permute.xlu0 %2610 }
0x1e3a   :  { %2613 = vst.msk [vmem:[#allocation3] sm:$0x3] %vm1274_vm9, %v2611_v54  ;;  %6870 = vmatmul.mubr.msk.f32.vlgmr.msra.gmra.mrb[22].mxu0 %vm1145_vm11, %v2611_v54 }
0x1e3b   :  { %2614 = vst.msk [vmem:[#allocation4 + $0xc] sm:$0xc] %vm1277_vm10, %v2611_v54  ;;  %7477 = vmatpush1.bf16.msra.mxu0 %v9101_v19  ;;  %2945 = vmatprep.mubr.f32.mxu0 %v8293_v0 }
0x1e3c   :  { %7479 = vmatprep.subr.bf16.mxu0 %v9104_v24 }
0x1e3f   :  { %7481 = vmatpush1.bf16.msra.mxu0 %v9110_v29 }
0x1e40   :  { %7491 = vmatprep.subr.bf16.mxu0 %v9098_v16 }
0x1f0d   :  { %v2685_v55 = vpop.f32.mrb[22].mxu0 }
0x1f0e   :  { %v2687_v56 = vpop.f32.mrb[23].mxu0  ;;  %v2690_v62 = vadd.f32 %v2685_v55, %v2615_v61  ;;  %v2954_v55 = vrot.slane %v2878_v13, 2 }
0x1f0f   :  { %v2701_v57 = vrot.slane %v2687_v56, %v8790_v7 }
0x1f11   :  { %v2702_v59 = vcombine.high %v2701_v57, %v2701_v57 }
0x1f13   :  { %v2704_v58 = vadd.f32 %v2702_v59, %v2692_v43  ;;  %v2877_v43 = vld [vmem:[#allocation2 + $0xc] sm:$0xf] }
0x1f15   :  { %v2706_v60 = vcombine.low %v2704_v58, %v2704_v58 }
0x1f17   :  { %v2713_v42 = vrot.slane %v2706_v60, %v8790_v7 }
0x1f19   :  { %v2715_v63 = vsel %vm1244_vm8, %v2690_v62, %v2713_v42 }
0x1f1a   :  { %7708 = vtanh.f32 %v2715_v63  ;;  %v6871_v2 = vmul.f32 -1.442695, %v2715_v63 }
0x1f1c   :  { %7710 = vpow2.f32 %v6871_v2 }
0x1f24   :  { %v7709_v1 = vpop.eup %7708 }
0x1f25   :  { %2725 = vrot.lane.b32.xlu1 %v7709_v1, %s8298_s4 }
0x1f26   :  { %v7711_v3 = vpop.eup %7710 }
0x1f27   :  { %v2719_v4 = vadd.f32 1.0, %v7711_v3 }
0x1f29   :  { %7712 = vrcp.f32 %v2719_v4 }
0x1f33   :  { %v7713_v5 = vpop.eup %7712 }
0x1f34   :  { %v2723_v11 = vmul.f32 %v7713_v5, %v2602_v39 }
0x1f97   :  { %v2726_v6 = vpop.permute.xlu1 %2725 }
0x1f98   :  { %v2728_v8 = vmul.f32 %v7713_v5, %v2726_v6 }
0x1f9a   :  { %2730 = vrot.lane.b32.xlu0 %v2728_v8, %s8299_s11 }
0x200c   :  { %v2731_v12 = vpop.permute.xlu0 %2730 }
0x200d   :  { %v2733_v15 = vadd.f32 %v2731_v12, %v2723_v11 }
0x200f   :  { %7714 = vtanh.f32 %v2733_v15 }
0x2019   :  { %v7715_v9 = vpop.eup %7714 }
0x201a   :  { %2736 = vrot.lane.b32.xlu1 %v7715_v9, %s8298_s4  ;;  %v3009_v9 = vld [vmem:[#allocation2 + $0xc] sm:$0xf] }
0x208c   :  { %v2737_v10 = vpop.permute.xlu1 %2736 }
0x208d   :  { %v2739_v21 = vmul.f32 %v7713_v5, %v2737_v10 }
0x208f   :  { %2741 = vrot.lane.b32.xlu0 %v2739_v21, %s8299_s11 }
0x2101   :  { %v2742_v22 = vpop.permute.xlu0 %2741 }
0x2102   :  { %2744 = vst.msk [vmem:[#allocation3 + $0x2] sm:$0x3] %vm1274_vm9, %v2742_v22  ;;  %6872 = vmatmul.mubr.msk.f32.vlgmr.msra.gmra.mrb[10].mxu1 %vm1145_vm11, %v2742_v22 }
0x2103   :  { %2745 = vst.msk [vmem:[#allocation4 + $0xa] sm:$0xc] %vm1277_vm10, %v2742_v22  ;;  %7485 = vmatpush1.bf16.msra.mxu1 %v9101_v19  ;;  %3076 = vmatprep.mubr.f32.mxu1 %v8293_v0  ;;  %v3085_v22 = vrot.slane %v3009_v9, 2 }
0x2104   :  { %7487 = vmatprep.subr.bf16.mxu1 %v9104_v24 }
0x2107   :  { %7489 = vmatpush1.bf16.msra.mxu1 %v9110_v29 }
0x2108   :  { %7499 = vmatprep.subr.bf16.mxu1 %v9098_v16 }
0x21d5   :  { %v2816_v14 = vpop.f32.mrb[10].mxu1 }
0x21d6   :  { %v2818_v27 = vpop.f32.mrb[11].mxu1  ;;  %v2821_v36 = vadd.f32 %v2816_v14, %v2746_v35 }
0x21d7   :  { %v2832_v18 = vrot.slane %v2818_v27, %v8790_v7 }
0x21d9   :  { %v2833_v31 = vcombine.high %v2832_v18, %v2832_v18  ;;  %v3008_v18 = vld [vmem:[#allocation2 + $0x10] sm:$0xf] }
0x21db   :  { %v2835_v32 = vadd.f32 %v2833_v31, %v2823_v30 }
0x21dd   :  { %v2837_v34 = vcombine.low %v2835_v32, %v2835_v32 }
0x21df   :  { %v2844_v37 = vrot.slane %v2837_v34, %v8790_v7 }
0x21e1   :  { %v2846_v17 = vsel %vm1244_vm8, %v2821_v36, %v2844_v37 }
0x21e2   :  { %7716 = vtanh.f32 %v2846_v17  ;;  %v6873_v40 = vmul.f32 -1.442695, %v2846_v17 }
0x21e4   :  { %7718 = vpow2.f32 %v6873_v40 }
0x21ec   :  { %v7717_v23 = vpop.eup %7716 }
0x21ed   :  { %2856 = vrot.lane.b32.xlu1 %v7717_v23, %s8298_s4 }
0x21ee   :  { %v7719_v25 = vpop.eup %7718 }
0x21ef   :  { %v2850_v28 = vadd.f32 1.0, %v7719_v25 }
0x21f1   :  { %7720 = vrcp.f32 %v2850_v28 }
0x21fb   :  { %v7721_v44 = vpop.eup %7720 }
0x21fc   :  { %v2854_v47 = vmul.f32 %v7721_v44, %v2733_v15 }
0x225f   :  { %v2857_v45 = vpop.permute.xlu1 %2856 }
0x2260   :  { %v2859_v46 = vmul.f32 %v7721_v44, %v2857_v45 }
0x2262   :  { %2861 = vrot.lane.b32.xlu0 %v2859_v46, %s8299_s11 }
0x22d4   :  { %v2862_v48 = vpop.permute.xlu0 %2861 }
0x22d5   :  { %v2864_v49 = vadd.f32 %v2862_v48, %v2854_v47 }
0x22d7   :  { %7722 = vtanh.f32 %v2864_v49 }
0x22e1   :  { %v7723_v20 = vpop.eup %7722 }
0x22e2   :  { %2867 = vrot.lane.b32.xlu1 %v7723_v20, %s8298_s4  ;;  %v3140_v20 = vld [vmem:[#allocation2 + $0x8] sm:$0xf] }
0x2354   :  { %v2868_v50 = vpop.permute.xlu1 %2867 }
0x2355   :  { %v2870_v51 = vmul.f32 %v7721_v44, %v2868_v50 }
0x2357   :  { %2872 = vrot.lane.b32.xlu0 %v2870_v51, %s8299_s11 }
0x23c9   :  { %v2873_v39 = vpop.permute.xlu0 %2872 }
0x23ca   :  { %2875 = vst.msk [vmem:[#allocation3 + $0x4] sm:$0x3] %vm1274_vm9, %v2873_v39  ;;  %6874 = vmatmul.mubr.msk.f32.vlgmr.msra.gmra.mrb[24].mxu0 %vm1145_vm11, %v2873_v39 }
0x23cb   :  { %2876 = vst.msk [vmem:[#allocation4 + $0x8] sm:$0xc] %vm1277_vm10, %v2873_v39  ;;  %7493 = vmatpush1.bf16.msra.mxu0 %v9101_v19  ;;  %3207 = vmatprep.mubr.f32.mxu0 %v8293_v0  ;;  %v3216_v39 = vrot.slane %v3140_v20, 2 }
0x23cc   :  { %7495 = vmatprep.subr.bf16.mxu0 %v9104_v24 }
0x23cf   :  { %7497 = vmatpush1.bf16.msra.mxu0 %v9110_v29 }
0x23d0   :  { %7507 = vmatprep.subr.bf16.mxu0 %v9098_v16 }
0x249d   :  { %v2947_v52 = vpop.f32.mrb[24].mxu0 }
0x249e   :  { %v2949_v53 = vpop.f32.mrb[25].mxu0  ;;  %v2952_v59 = vadd.f32 %v2947_v52, %v2877_v43 }
0x249f   :  { %v2963_v54 = vrot.slane %v2949_v53, %v8790_v7 }
0x24a1   :  { %v2964_v33 = vcombine.high %v2963_v54, %v2963_v54  ;;  %v3139_v54 = vld [vmem:[#allocation2 + $0x14] sm:$0xf] }
0x24a3   :  { %v2966_v56 = vadd.f32 %v2964_v33, %v2954_v55 }
0x24a5   :  { %v2968_v57 = vcombine.low %v2966_v56, %v2966_v56 }
0x24a7   :  { %v2975_v58 = vrot.slane %v2968_v57, %v8790_v7 }
0x24a9   :  { %v2977_v60 = vsel %vm1244_vm8, %v2952_v59, %v2975_v58 }
0x24aa   :  { %7724 = vtanh.f32 %v2977_v60  ;;  %v6875_v16 = vmul.f32 -1.442695, %v2977_v60 }
0x24ac   :  { %7726 = vpow2.f32 %v6875_v16 }
0x24b4   :  { %v7725_v61 = vpop.eup %7724 }
0x24b5   :  { %2987 = vrot.lane.b32.xlu1 %v7725_v61, %s8298_s4 }
0x24b6   :  { %v7727_v62 = vpop.eup %7726 }
0x24b7   :  { %v2981_v42 = vadd.f32 1.0, %v7727_v62 }
0x24b9   :  { %7728 = vrcp.f32 %v2981_v42 }
0x24c3   :  { %v7729_v63 = vpop.eup %7728 }
0x24c4   :  { %v2985_v3 = vmul.f32 %v7729_v63, %v2864_v49 }
0x2527   :  { %v2988_v1 = vpop.permute.xlu1 %2987 }
0x2528   :  { %v2990_v2 = vmul.f32 %v7729_v63, %v2988_v1 }
0x252a   :  { %2992 = vrot.lane.b32.xlu0 %v2990_v2, %s8299_s11 }
0x259c   :  { %v2993_v4 = vpop.permute.xlu0 %2992 }
0x259d   :  { %v2995_v5 = vadd.f32 %v2993_v4, %v2985_v3  ;;  %v3271_v3 = vld [vmem:[#allocation2 + $0x4] sm:$0xf] }
0x259f   :  { %7730 = vtanh.f32 %v2995_v5 }
0x25a9   :  { %v7731_v6 = vpop.eup %7730 }
0x25aa   :  { %2998 = vrot.lane.b32.xlu1 %v7731_v6, %s8298_s4  ;;  %v3347_v6 = vrot.slane %v3271_v3, 2 }
0x261c   :  { %v2999_v8 = vpop.permute.xlu1 %2998 }
0x261d   :  { %v3001_v11 = vmul.f32 %v7729_v63, %v2999_v8 }
0x261f   :  { %3003 = vrot.lane.b32.xlu0 %v3001_v11, %s8299_s11 }
0x2691   :  { %v3004_v12 = vpop.permute.xlu0 %3003 }
0x2692   :  { %3006 = vst.msk [vmem:[#allocation3 + $0x6] sm:$0x3] %vm1274_vm9, %v3004_v12  ;;  %6876 = vmatmul.mubr.msk.f32.vlgmr.msra.gmra.mrb[12].mxu1 %vm1145_vm11, %v3004_v12 }
0x2693   :  { %3007 = vst.msk [vmem:[#allocation4 + $0x6] sm:$0xc] %vm1277_vm10, %v3004_v12  ;;  %7501 = vmatpush1.bf16.msra.mxu1 %v9101_v19  ;;  %3338 = vmatprep.mubr.f32.mxu1 %v8293_v0 }
0x2694   :  { %7503 = vmatprep.subr.bf16.mxu1 %v9104_v24 }
0x2697   :  { %7505 = vmatpush1.bf16.msra.mxu1 %v9110_v29 }
0x2765   :  { %v3078_v15 = vpop.f32.mrb[12].mxu1 }
0x2766   :  { %v3080_v10 = vpop.f32.mrb[13].mxu1  ;;  %v3083_v30 = vadd.f32 %v3078_v15, %v3008_v18  ;;  %v3270_v15 = vld [vmem:[#allocation2 + $0x18] sm:$0xf] }
0x2767   :  { %v3094_v21 = vrot.slane %v3080_v10, %v8790_v7 }
0x2769   :  { %v3095_v14 = vcombine.high %v3094_v21, %v3094_v21 }
0x276b   :  { %v3097_v26 = vadd.f32 %v3095_v14, %v3085_v22 }
0x276d   :  { %v3099_v27 = vcombine.low %v3097_v26, %v3097_v26 }
0x276f   :  { %v3106_v31 = vrot.slane %v3099_v27, %v8790_v7 }
0x2771   :  { %v3108_v32 = vsel %vm1244_vm8, %v3083_v30, %v3106_v31 }
0x2772   :  { %7732 = vtanh.f32 %v3108_v32  ;;  %v6877_v35 = vmul.f32 -1.442695, %v3108_v32 }
0x2774   :  { %7734 = vpow2.f32 %v6877_v35 }
0x277c   :  { %v7733_v34 = vpop.eup %7732 }
0x277d   :  { %3118 = vrot.lane.b32.xlu1 %v7733_v34, %s8298_s4 }
0x277e   :  { %v7735_v36 = vpop.eup %7734 }
0x277f   :  { %v3112_v37 = vadd.f32 1.0, %v7735_v36 }
0x2781   :  { %7736 = vrcp.f32 %v3112_v37 }
0x278b   :  { %v7737_v17 = vpop.eup %7736 }
0x278c   :  { %v3116_v25 = vmul.f32 %v7737_v17, %v2995_v5 }
0x27ef   :  { %v3119_v23 = vpop.permute.xlu1 %3118 }
0x27f0   :  { %v3121_v40 = vmul.f32 %v7737_v17, %v3119_v23 }
0x27f2   :  { %3123 = vrot.lane.b32.xlu0 %v3121_v40, %s8299_s11 }
0x2864   :  { %v3124_v28 = vpop.permute.xlu0 %3123 }
0x2865   :  { %v3126_v44 = vadd.f32 %v3124_v28, %v3116_v25  ;;  %v3402_v25 = vld [vmem:[#allocation2] sm:$0xf] }
0x2867   :  { %7738 = vtanh.f32 %v3126_v44 }
0x2871   :  { %v7739_v45 = vpop.eup %7738 }
0x2872   :  { %3129 = vrot.lane.b32.xlu1 %v7739_v45, %s8298_s4  ;;  %v3478_v45 = vrot.slane %v3402_v25, 2  ;;  %v3533_v25 = vld [vmem:[#allocation3 + $0x2] sm:$0x3] }
0x28e4   :  { %v3130_v46 = vpop.permute.xlu1 %3129 }
0x28e5   :  { %v3132_v47 = vmul.f32 %v7737_v17, %v3130_v46 }
0x28e7   :  { %3134 = vrot.lane.b32.xlu0 %v3132_v47, %s8299_s11 }
0x2959   :  { %v3135_v48 = vpop.permute.xlu0 %3134 }
0x295a   :  { %3137 = vst.msk [vmem:[#allocation3 + $0x8] sm:$0x3] %vm1274_vm9, %v3135_v48  ;;  %6878 = vmatmul.mubr.msk.f32.vlgmr.msra.gmra.mrb[26].mxu0 %vm1145_vm11, %v3135_v48 }
0x295b   :  { %3138 = vst.msk [vmem:[#allocation4 + $0x4] sm:$0xc] %vm1277_vm10, %v3135_v48  ;;  %7509 = vmatpush1.bf16.msra.mxu0 %v9101_v19  ;;  %3469 = vmatprep.mubr.f32.mxu0 %v8293_v0 }
0x295c   :  { %7511 = vmatprep.subr.bf16.mxu0 %v9104_v24 }
0x295f   :  { %7513 = vmatpush1.bf16.msra.mxu0 %v9110_v29 }
0x2960   :  { %7065 = vmatprep.subr.mxu0 %v8293_v0 }
0x2a2d   :  { %v3209_v49 = vpop.f32.mrb[26].mxu0 }
0x2a2e   :  { %v3211_v50 = vpop.f32.mrb[27].mxu0  ;;  %v3214_v55 = vadd.f32 %v3209_v49, %v3139_v54  ;;  %v3401_v49 = vld [vmem:[#allocation2 + $0x1c] sm:$0xf] }
0x2a2f   :  { %v3225_v51 = vrot.slane %v3211_v50, %v8790_v7 }
0x2a31   :  { %v3226_v52 = vcombine.high %v3225_v51, %v3225_v51 }
0x2a33   :  { %v3228_v13 = vadd.f32 %v3226_v52, %v3216_v39 }
0x2a35   :  { %v3230_v53 = vcombine.low %v3228_v13, %v3228_v13 }
0x2a37   :  { %v3237_v19 = vrot.slane %v3230_v53, %v8790_v7 }
0x2a39   :  { %v3239_v33 = vsel %vm1244_vm8, %v3214_v55, %v3237_v19 }
0x2a3a   :  { %7740 = vtanh.f32 %v3239_v33  ;;  %v6879_v29 = vmul.f32 -1.442695, %v3239_v33 }
0x2a3c   :  { %7742 = vpow2.f32 %v6879_v29 }
0x2a44   :  { %v7741_v24 = vpop.eup %7740 }
0x2a45   :  { %3249 = vrot.lane.b32.xlu1 %v7741_v24, %s8298_s4 }
0x2a46   :  { %v7743_v56 = vpop.eup %7742 }
0x2a47   :  { %v3243_v57 = vadd.f32 1.0, %v7743_v56 }
0x2a49   :  { %7744 = vrcp.f32 %v3243_v57  ;;  %v3544_v57 = vld [vmem:[#allocation4 + $0x8] sm:$0x3] }
0x2a53   :  { %v7745_v43 = vpop.eup %7744 }
0x2a54   :  { %v3247_v60 = vmul.f32 %v7745_v43, %v3126_v44 }
0x2ab7   :  { %v3250_v59 = vpop.permute.xlu1 %3249 }
0x2ab8   :  { %v3252_v58 = vmul.f32 %v7745_v43, %v3250_v59 }
0x2aba   :  { %3254 = vrot.lane.b32.xlu0 %v3252_v58, %s8299_s11 }
0x2b2c   :  { %v3255_v61 = vpop.permute.xlu0 %3254 }
0x2b2d   :  { %v3257_v16 = vadd.f32 %v3255_v61, %v3247_v60  ;;  %v3543_v60 = vld [vmem:[#allocation4 + $0x6] sm:$0x3] }
0x2b2e   :  { %v3605_v61 = vld [vmem:[#allocation19 + $0x8] sm:$0xff] }
0x2b2f   :  { %7746 = vtanh.f32 %v3257_v16 }
0x2b39   :  { %v7747_v62 = vpop.eup %7746 }
0x2b3a   :  { %3260 = vrot.lane.b32.xlu1 %v7747_v62, %s8298_s4  ;;  %v3604_v62 = vld [vmem:[#allocation19] sm:$0xff] }
0x2bac   :  { %v3261_v42 = vpop.permute.xlu1 %3260 }
0x2bad   :  { %v3263_v63 = vmul.f32 %v7745_v43, %v3261_v42 }
0x2baf   :  { %3265 = vrot.lane.b32.xlu0 %v3263_v63, %s8299_s11  ;;  %v3606_v63 = vld [vmem:[#allocation19 + $0x10] sm:$0xff] }
0x2bb0   :  { %v7516_v3 = vpack.c.bf16 %v3606_v63, %v3604_v62 }
0x2c21   :  { %v3266_v1 = vpop.permute.xlu0 %3265 }
0x2c22   :  { %3268 = vst.msk [vmem:[#allocation3 + $0xa] sm:$0x3] %vm1274_vm9, %v3266_v1  ;;  %6880 = vmatmul.mubr.msk.f32.vlgmr.msra.gmra.mrb[14].mxu1 %vm1145_vm11, %v3266_v1 }
0x2c23   :  { %3269 = vst.msk [vmem:[#allocation4 + $0x2] sm:$0xc] %vm1277_vm10, %v3266_v1  ;;  %3733 = vmatprep.mubr.f32.mxu1 %v8293_v0  ;;  %v3609_v1 = vld [vmem:[#allocation19 + $0x28] sm:$0xff] }
0x2c2a   :  { %v3542_v58 = vld [vmem:[#allocation4 + $0x4] sm:$0x3] }
0x2cf5   :  { %v3340_v2 = vpop.f32.mrb[14].mxu1 }
0x2cf6   :  { %v3342_v4 = vpop.f32.mrb[15].mxu1  ;;  %v3345_v9 = vadd.f32 %v3340_v2, %v3270_v15  ;;  %v3611_v2 = vld [vmem:[#allocation19 + $0x38] sm:$0xff]  ;;  %v3613_v15 = vld [vmem:[#allocation19 + $0x48] sm:$0xff] }
0x2cf7   :  { %v3356_v5 = vrot.slane %v3342_v4, %v8790_v7  ;;  %v7518_v4 = vpack.c.bf16 %v3611_v2, %v3609_v1 }
0x2cf9   :  { %v3357_v8 = vcombine.high %v3356_v5, %v3356_v5  ;;  %v3608_v5 = vld [vmem:[#allocation19 + $0x20] sm:$0xff] }
0x2cfb   :  { %v3359_v11 = vadd.f32 %v3357_v8, %v3347_v6  ;;  %v3610_v6 = vld [vmem:[#allocation19 + $0x30] sm:$0xff] }
0x2cfc   :  { %v7520_v8 = vpack.c.bf16 %v3610_v6, %v3608_v5 }
0x2cfd   :  { %v3361_v12 = vcombine.low %v3359_v11, %v3359_v11  ;;  %v3545_v11 = vld [vmem:[#allocation4 + $0xa] sm:$0x3] }
0x2cff   :  { %v3368_v10 = vrot.slane %v3361_v12, %v8790_v7  ;;  %v3547_v12 = vld [vmem:[#allocation4 + $0xe] sm:$0x3] }
0x2d01   :  { %v3370_v21 = vsel %vm1244_vm8, %v3345_v9, %v3368_v10  ;;  %v3615_v9 = vld [vmem:[#allocation19 + $0x58] sm:$0xff] }
0x2d02   :  { %7748 = vtanh.f32 %v3370_v21  ;;  %v6881_v14 = vmul.f32 -1.442695, %v3370_v21  ;;  %v7522_v10 = vpack.c.bf16 %v3615_v9, %v3613_v15  ;;  %v3612_v21 = vld [vmem:[#allocation19 + $0x40] sm:$0xff] }
0x2d04   :  { %7750 = vpow2.f32 %v6881_v14 }
0x2d0c   :  { %v7749_v22 = vpop.eup %7748 }
0x2d0d   :  { %3380 = vrot.lane.b32.xlu1 %v7749_v22, %s8298_s4  ;;  %v3614_v22 = vld [vmem:[#allocation19 + $0x50] sm:$0xff] }
0x2d0e   :  { %v7751_v26 = vpop.eup %7750 }
0x2d0f   :  { %v3374_v27 = vadd.f32 1.0, %v7751_v26  ;;  %v7524_v26 = vpack.c.bf16 %v3614_v22, %v3612_v21 }
0x2d11   :  { %7752 = vrcp.f32 %v3374_v27  ;;  %v3617_v27 = vld [vmem:[#allocation19 + $0x68] sm:$0xff] }
0x2d1b   :  { %v7753_v18 = vpop.eup %7752 }
0x2d1c   :  { %v3378_v32 = vmul.f32 %v7753_v18, %v3257_v16  ;;  %v3607_v16 = vld [vmem:[#allocation19 + $0x18] sm:$0xff] }
0x2d1d   :  { %v7514_v42 = vpack.c.bf16 %v3607_v16, %v3605_v61 }
0x2d1f   :  { %7515 = vmatprep.subr.bf16.mxu1 %v7514_v42 }
0x2d20   :  { %7517 = vmatpush1.bf16.msra.mxu1 %v7516_v3 }
0x2d21   :  { %7519 = vmatprep.subr.bf16.mxu1 %v7518_v4 }
0x2d24   :  { %7521 = vmatpush1.bf16.msra.mxu1 %v7520_v8 }
0x2d25   :  { %7523 = vmatprep.subr.bf16.mxu1 %v7522_v10 }
0x2d28   :  { %7525 = vmatpush1.bf16.msra.mxu1 %v7524_v26  ;;  %v3620_v26 = vld [vmem:[#allocation21] sm:$0x3] }
0x2d7f   :  { %v3381_v30 = vpop.permute.xlu1 %3380 }
0x2d80   :  { %v3383_v31 = vmul.f32 %v7753_v18, %v3381_v30 }
0x2d82   :  { %3385 = vrot.lane.b32.xlu0 %v3383_v31, %s8299_s11  ;;  %v3616_v31 = vld [vmem:[#allocation19 + $0x60] sm:$0xff] }
0x2df4   :  { %v3386_v34 = vpop.permute.xlu0 %3385 }
0x2df5   :  { %v3388_v35 = vadd.f32 %v3386_v34, %v3378_v32  ;;  %v3618_v32 = vld [vmem:[#allocation19 + $0x70] sm:$0xff] }
0x2df6   :  { %v7528_v34 = vpack.c.bf16 %v3618_v32, %v3616_v31 }
0x2df7   :  { %7754 = vtanh.f32 %v3388_v35 }
0x2e01   :  { %v7755_v36 = vpop.eup %7754 }
0x2e02   :  { %3391 = vrot.lane.b32.xlu1 %v7755_v36, %s8298_s4  ;;  %v3546_v36 = vld [vmem:[#allocation4 + $0xc] sm:$0x3] }
0x2e74   :  { %v3392_v37 = vpop.permute.xlu1 %3391 }
0x2e75   :  { %v3394_v17 = vmul.f32 %v7753_v18, %v3392_v37  ;;  %v3619_v18 = vld [vmem:[#allocation19 + $0x78] sm:$0xff] }
0x2e76   :  { %v7526_v30 = vpack.c.bf16 %v3619_v18, %v3617_v27  ;;  %v3625_v27 = vrot.slane %v3620_v26, %v8974_v38 }
0x2e77   :  { %3396 = vrot.lane.b32.xlu0 %v3394_v17, %s8299_s11 }
0x2e78   :  { %7527 = vmatprep.subr.bf16.mxu1 %v7526_v30 }
0x2e79   :  { %7529 = vmatpush1.bf16.msra.mxu1 %v7528_v34 }
0x2e7a   :  { %7085 = vmatprep.subr.mxu1 %v8293_v0 }
0x2ee9   :  { %v3397_v23 = vpop.permute.xlu0 %3396 }
0x2eea   :  { %3399 = vst.msk [vmem:[#allocation3 + $0xc] sm:$0x3] %vm1274_vm9, %v3397_v23  ;;  %6882 = vmatmul.mubr.msk.f32.vlgmr.msra.gmra.mrb[28].mxu0 %vm1145_vm11, %v3397_v23 }
0x2eeb   :  { %3400 = vst.msk [vmem:[#allocation4] sm:$0xc] %vm1277_vm10, %v3397_v23 }
0x2ef1   :  { %v3538_v62 = vld [vmem:[#allocation3 + $0xc] sm:$0x3] }
0x2ef2   :  { %v3541_v56 = vld [vmem:[#allocation4 + $0x2] sm:$0x3] }
0x2fbd   :  { %v3471_v40 = vpop.f32.mrb[28].mxu0 }
0x2fbe   :  { %v3473_v28 = vpop.f32.mrb[29].mxu0  ;;  %v3476_v20 = vadd.f32 %v3471_v40, %v3401_v49  ;;  %v3535_v49 = vld [vmem:[#allocation3 + $0x6] sm:$0x3] }
0x2fbf   :  { %v3487_v44 = vrot.slane %v3473_v28, %v8790_v7 }
0x2fc1   :  { %v3488_v46 = vcombine.high %v3487_v44, %v3487_v44 }
0x2fc3   :  { %v3490_v47 = vadd.f32 %v3488_v46, %v3478_v45  ;;  %v3536_v45 = vld [vmem:[#allocation3 + $0x8] sm:$0x3] }
0x2fc5   :  { %v3492_v48 = vcombine.low %v3490_v47, %v3490_v47  ;;  %v3534_v47 = vld [vmem:[#allocation3 + $0x4] sm:$0x3] }
0x2fc7   :  { %v3499_v50 = vrot.slane %v3492_v48, %v8790_v7 }
0x2fc9   :  { %v3501_v51 = vsel %vm1244_vm8, %v3476_v20, %v3499_v50  ;;  %vm6464_vm8 = vcmask 392192  }
0x2fca   :  { %7756 = vtanh.f32 %v3501_v51  ;;  %v6883_v52 = vmul.f32 -1.442695, %v3501_v51  ;;  %v3532_v51 = vld [vmem:[#allocation3] sm:$0x3] }
0x2fcc   :  { %7758 = vpow2.f32 %v6883_v52 }
0x2fd4   :  { %v7757_v39 = vpop.eup %7756 }
0x2fd5   :  { %3511 = vrot.lane.b32.xlu1 %v7757_v39, %s8298_s4 }
0x2fd6   :  { %v7759_v13 = vpop.eup %7758 }
0x2fd7   :  { %v3505_v53 = vadd.f32 1.0, %v7759_v13  ;;  %v3537_v13 = vld [vmem:[#allocation3 + $0xa] sm:$0x3] }
0x2fd9   :  { %7760 = vrcp.f32 %v3505_v53 }
0x2fe3   :  { %v7761_v54 = vpop.eup %7760 }
0x2fe4   :  { %v3509_v33 = vmul.f32 %v7761_v54, %v3388_v35 }
0x3047   :  { %v3512_v55 = vpop.permute.xlu1 %3511 }
0x3048   :  { %v3514_v19 = vmul.f32 %v7761_v54, %v3512_v55 }
0x304a   :  { %3516 = vrot.lane.b32.xlu0 %v3514_v19, %s8299_s11 }
0x30bc   :  { %v3517_v24 = vpop.permute.xlu0 %3516 }
0x30bd   :  { %v3519_v29 = vadd.f32 %v3517_v24, %v3509_v33 }
0x30bf   :  { %7762 = vtanh.f32 %v3519_v29 }
0x30c9   :  { %v7763_v7 = vpop.eup %7762 }
0x30ca   :  { %3522 = vrot.lane.b32.xlu1 %v7763_v7, %s8298_s4 }
0x30ce   :  { %3558 = vrot.lane.b32.xlu1 %v3541_v56, %s8299_s11 }
0x30d2   :  { %3564 = vrot.lane.b32.xlu1 %v3544_v57, %s8299_s11 }
0x313c   :  { %v3523_v43 = vpop.permute.xlu1 %3522 }
0x313d   :  { %v3525_v59 = vmul.f32 %v7761_v54, %v3523_v43 }
0x313f   :  { %3527 = vrot.lane.b32.xlu0 %v3525_v59, %s8299_s11 }
0x3140   :  { %v3559_v17 = vpop.permute.xlu1 %3558 }
0x3141   :  { %v3581_v44 = vsel %vm1145_vm11, %v3533_v25, %v3559_v17 }
0x3142   :  { %v3632_v20 = vrot.slane %v3581_v44, 7 }
0x3143   :  { %3560 = vrot.lane.b32.xlu0 %v3542_v58, %s8299_s11 }
0x3144   :  { %v3565_v40 = vpop.permute.xlu1 %3564 }
0x3145   :  { %v3584_v46 = vsel %vm1145_vm11, %v3536_v45, %v3565_v40 }
0x3146   :  { %v3640_v39 = vrot.slane %v3584_v46, 4  ;;  %v6887_v52 = vrot.slane %v3584_v46, 5 }
0x3147   :  { %3562 = vrot.lane.b32.xlu0 %v3543_v60, %s8299_s11 }
0x314b   :  { %3566 = vrot.lane.b32.xlu0 %v3545_v11, %s8299_s11 }
0x314f   :  { %3570 = vrot.lane.b32.xlu0 %v3547_v12, %s8299_s11 }
0x31b1   :  { %v3528_v14 = vpop.permute.xlu0 %3527 }
0x31b2   :  { %3530 = vst.msk [vmem:[#allocation3 + $0xe] sm:$0x3] %vm1274_vm9, %v3528_v14  ;;  %vm6467_vm9 = vcmask 457728  }
0x31b3   :  { %3531 = vst.msk [vmem:[#allocation4 - $0x2] sm:$0xc] %vm1277_vm10, %v3528_v14 }
0x31b5   :  { %v3561_v37 = vpop.permute.xlu0 %3560 }
0x31b6   :  { %v3582_v48 = vsel %vm1145_vm11, %v3534_v47, %v3561_v37 }
0x31b7   :  { %v3634_v54 = vrot.slane %v3582_v48, 6  ;;  %v6885_v56 = vrot.slane %v3582_v48, 7 }
0x31b9   :  { %v3563_v23 = vpop.permute.xlu0 %3562  ;;  %v3539_v43 = vld [vmem:[#allocation3 + $0xe] sm:$0x3] }
0x31ba   :  { %v3540_v35 = vld [vmem:[#allocation4] sm:$0x3]  ;;  %v3583_v50 = vsel %vm1145_vm11, %v3535_v49, %v3563_v23  ;;  %v3629_v49 = vrot.slane %v3620_v26, %v8980_v41 }
0x31bb   :  { %3556 = vrot.lane.b32.xlu1 %v3540_v35, %s8299_s11  ;;  %v3637_v24 = vrot.slane %v3583_v50, 5  ;;  %v6886_v57 = vrot.slane %v3583_v50, 6 }
0x31bd   :  { %v3567_v28 = vpop.permute.xlu0 %3566 }
0x31be   :  { %v3585_v55 = vsel %vm1145_vm11, %v3537_v13, %v3567_v28 }
0x31bf   :  { %3568 = vrot.lane.b32.xlu1 %v3546_v36, %s8299_s11  ;;  %v3643_v58 = vrot.slane %v3585_v55, 3  ;;  %v6888_v63 = vrot.slane %v3585_v55, 4 }
0x31c1   :  { %v3571_v19 = vpop.permute.xlu0 %3570 }
0x31c2   :  { %v3587_v60 = vsel %vm1145_vm11, %v3539_v43, %v3571_v19 }
0x31c3   :  { %v3603_v11 = vrot.slane %v3587_v60, 1 }
0x31c5   :  { %v3663_v22 = vrot.slane %v3603_v11, 1 }
0x322d   :  { %v3557_v53 = vpop.permute.xlu1 %3556 }
0x322e   :  { %v3580_v33 = vsel %vm1145_vm11, %v3532_v51, %v3557_v53 }
0x322f   :  { %v3596_v29 = vrot.slane %v3580_v33, 1  ;;  %v3633_v7 = vsel %vm339_vm0, %v3632_v20, %v3580_v33 }
0x3230   :  { %v3636_v59 = vsel %vm3635_vm12, %v3634_v54, %v3633_v7 }
0x3231   :  { %v3639_v61 = vsel %vm3638_vm13, %v3637_v24, %v3636_v59  ;;  %v3652_v16 = vsel %vm339_vm0, %v3581_v44, %v3596_v29  ;;  %v3569_v42 = vpop.permute.xlu1 %3568  ;;  %vm8305_vm0 = vmmov 0  }
0x3232   :  { %v3642_v1 = vsel %vm3641_vm14, %v3640_v39, %v3639_v61  ;;  %v3654_v2 = vsel %vm3635_vm12, %v6885_v56, %v3652_v16  ;;  %v3586_v3 = vsel %vm1145_vm11, %v3538_v62, %v3569_v42  ;;  %7067 = vmatprep.mubr.msk.f32.mxu0 %vm8305_vm0, %v8293_v0 }
0x3233   :  { %v3656_v4 = vsel %vm3638_vm13, %v6886_v57, %v3654_v2  ;;  %v3645_v5 = vsel %vm3644_vm15, %v3643_v58, %v3642_v1  ;;  %v3646_v6 = vrot.slane %v3586_v3, 2  ;;  %v6889_v8 = vrot.slane %v3586_v3, 3 }
0x3234   :  { %v3658_v12 = vsel %vm3641_vm14, %v6887_v52, %v3656_v4 }
0x3235   :  { %v3648_v15 = vsel %vm3647_vm1, %v3646_v6, %v3645_v5  ;;  %v3660_v9 = vsel %vm3644_vm15, %v6888_v63, %v3658_v12 }
0x3236   :  { %v9282_v10 = vsel %vm3649_vm2, %v3603_v11, %v3648_v15  ;;  %v3662_v21 = vsel %vm3647_vm1, %v6889_v8, %v3660_v9 }
0x3237   :  { %6890 = vmatmul.mubr.msk.f32.vlgmr.msra.gmra.mrb[16].mxu1 %vm735_vm7, %v9282_v10  ;;  %v9289_v14 = vsel %vm3649_vm2, %v3663_v22, %v3662_v21 }
0x3238   :  { %3739 = vmatprep.mubr.f32.mxu1 %v8293_v0 }
0x323b   :  { %6891 = vmatmul.mubr.msk.f32.gmra.mrb[18].mxu1 %vm735_vm7, %v9289_v14 }
0x323c   :  { %7087 = vmatprep.mubr.msk.f32.mxu1 %vm8305_vm0, %v8293_v0 }
0x330a   :  { %v3735_v18 = vpop.f32.mrb[16].mxu1 }
0x330b   :  { %v9294_v30 = vadd.f32 %v3735_v18, %v3625_v27  ;;  %v9296_v31 = vpop.f32.mrb[17].mxu1 }
0x330c   :  { %v9390_v41 = vadd.f32 %v9296_v31, %v3629_v49 }
0x330d   :  { %3748 = vrot.lane.b32.xlu1 %v9294_v30, %s8300_s14 }
0x330e   :  { %v3741_v32 = vpop.f32.mrb[18].mxu1 }
0x330f   :  { %v9300_v34 = vadd.f32 %v3741_v32, %v3625_v27  ;;  %v3743_v35 = vpop.f32.mrb[19].mxu1 }
0x3310   :  { %v9380_v20 = vadd.f32 %v3743_v35, %v3629_v49 }
0x3311   :  { %3750 = vrot.lane.b32.xlu0 %v9300_v34, %s8300_s14  ;;  %3752 = vrot.lane.b32.xlu1 %v9294_v30, %s8301_s7 }
0x3315   :  { %3754 = vrot.lane.b32.xlu0 %v9300_v34, %s8301_s7  ;;  %3756 = vrot.lane.b32.xlu1 %v9294_v30, %s8302_s19 }
0x3319   :  { %3758 = vrot.lane.b32.xlu0 %v9300_v34, %s8302_s19  ;;  %3760 = vrot.lane.b32.xlu1 %v9294_v30, %s8303_s28 }
0x331d   :  { %3762 = vrot.lane.b32.xlu0 %v9300_v34, %s8303_s28  ;;  %3764 = vrot.lane.b32.xlu1 %v9294_v30, %s8304_s13 }
0x3321   :  { %3766 = vrot.lane.b32.xlu0 %v9300_v34, %s8304_s13  ;;  %3768 = vrot.lane.b32.xlu1 %v9294_v30, %s8306_s8 }
0x3325   :  { %3770 = vrot.lane.b32.xlu0 %v9300_v34, %s8306_s8  ;;  %3772 = vrot.lane.b32.xlu1 %v9294_v30, %s8307_s0 }
0x3329   :  { %3774 = vrot.lane.b32.xlu0 %v9300_v34, %s8307_s0  ;;  %3820 = vrot.lane.b32.xlu1 %v9294_v30, %s8298_s4 }
0x332d   :  { %3896 = vrot.lane.b32.xlu0 %v9300_v34, %s8298_s4 }
0x337f   :  { %v3749_v38 = vpop.permute.xlu1 %3748 }
0x3380   :  { %3972 = vrot.lane.b32.xlu1 %v3749_v38, %s8298_s4 }
0x3383   :  { %v3751_v36 = vpop.permute.xlu0 %3750  ;;  %v3753_v37 = vpop.permute.xlu1 %3752 }
0x3384   :  { %4048 = vrot.lane.b32.xlu0 %v3751_v36, %s8298_s4  ;;  %4124 = vrot.lane.b32.xlu1 %v3753_v37, %s8298_s4 }
0x3387   :  { %v9339_v17 = vpop.permute.xlu0 %3754  ;;  %v9341_v23 = vpop.permute.xlu1 %3756 }
0x3388   :  { %4200 = vrot.lane.b32.xlu0 %v9339_v17, %s8298_s4  ;;  %4276 = vrot.lane.b32.xlu1 %v9341_v23, %s8298_s4 }
0x338b   :  { %v9347_v40 = vpop.permute.xlu0 %3758  ;;  %v9349_v25 = vpop.permute.xlu1 %3760 }
0x338c   :  { %4352 = vrot.lane.b32.xlu0 %v9347_v40, %s8298_s4  ;;  %4428 = vrot.lane.b32.xlu1 %v9349_v25, %s8298_s4 }
0x338f   :  { %v9355_v28 = vpop.permute.xlu0 %3762  ;;  %v9357_v44 = vpop.permute.xlu1 %3764 }
0x3390   :  { %4504 = vrot.lane.b32.xlu0 %v9355_v28, %s8298_s4  ;;  %4580 = vrot.lane.b32.xlu1 %v9357_v44, %s8298_s4 }
0x3393   :  { %v9363_v45 = vpop.permute.xlu0 %3766  ;;  %v9365_v46 = vpop.permute.xlu1 %3768 }
0x3394   :  { %4656 = vrot.lane.b32.xlu0 %v9363_v45, %s8298_s4  ;;  %4732 = vrot.lane.b32.xlu1 %v9365_v46, %s8298_s4 }
0x3397   :  { %v9371_v47 = vpop.permute.xlu0 %3770  ;;  %v9373_v48 = vpop.permute.xlu1 %3772 }
0x3398   :  { %4808 = vrot.lane.b32.xlu0 %v9371_v47, %s8298_s4  ;;  %4884 = vrot.lane.b32.xlu1 %v9373_v48, %s8298_s4 }
0x339b   :  { %v9382_v50 = vpop.permute.xlu0 %3774  ;;  %v3821_v51 = vpop.permute.xlu1 %3820 }
0x339c   :  { %4960 = vrot.lane.b32.xlu0 %v9382_v50, %s8298_s4  ;;  %3780 = vrot.lane.b32.xlu1 %v9380_v20, %s8300_s14  ;;  %s8308_s4 = smov 24  }
0x339d   :  { %7066 = vmatpush3.xpose.msk.msra.mxu0 %vm464_vm3, %v3821_v51 }
0x339e   :  { %7070 = vmatprep.subr.mxu0 %v8293_v0 }
0x339f   :  { %v3897_v39 = vpop.permute.xlu0 %3896 }
0x33a0   :  { %7068 = vmatmul.mubr.msk.f32.vlgmr.msra.gmra.mrb[30].mxu0 %vm464_vm3, %v9294_v30  ;;  %3778 = vrot.lane.b32.xlu0 %v9390_v41, %s8300_s14 }
0x33a1   :  { %3784 = vrot.lane.b32.xlu1 %v9390_v41, %s8301_s7  ;;  %7071 = vmatpush3.xpose.msk.msra.mxu0 %vm464_vm3, %v3897_v39 }
0x33a2   :  { %7072 = vmatprep.mubr.msk.f32.mxu0 %vm8305_vm0, %v8293_v0  ;;  %7075 = vmatprep.subr.mxu0 %v8293_v0 }
0x33a4   :  { %7073 = vmatmul.mubr.msk.f32.vlgmr.msra.gmra.mrb[32].mxu0 %vm464_vm3, %v9300_v34  ;;  %3786 = vrot.lane.b32.xlu0 %v9380_v20, %s8301_s7 }
0x33a5   :  { %3790 = vrot.lane.b32.xlu1 %v9390_v41, %s8302_s19  ;;  %7077 = vmatprep.mubr.msk.f32.mxu0 %vm8305_vm0, %v8293_v0 }
0x33a8   :  { %3792 = vrot.lane.b32.xlu0 %v9380_v20, %s8302_s19 }
0x33a9   :  { %3796 = vrot.lane.b32.xlu1 %v9390_v41, %s8303_s28 }
0x33ac   :  { %3798 = vrot.lane.b32.xlu0 %v9380_v20, %s8303_s28 }
0x33ad   :  { %3802 = vrot.lane.b32.xlu1 %v9390_v41, %s8304_s13 }
0x33f2   :  { %v3973_v52 = vpop.permute.xlu1 %3972 }
0x33f3   :  { %7076 = vmatpush3.xpose.msk.msra.mxu0 %vm464_vm3, %v3973_v52 }
0x33f4   :  { %7080 = vmatprep.subr.mxu0 %v8293_v0 }
0x33f6   :  { %v4049_v13 = vpop.permute.xlu0 %4048  ;;  %7078 = vmatmul.mubr.msk.f32.vlgmr.msra.gmra.mrb[34].mxu0 %vm464_vm3, %v3749_v38  ;;  %v4125_v53 = vpop.permute.xlu1 %4124 }
0x33f7   :  { %7081 = vmatpush3.xpose.msk.msra.mxu0 %vm464_vm3, %v4049_v13  ;;  %7086 = vmatpush3.xpose.msk.msra.mxu1 %vm464_vm3, %v4125_v53 }
0x33f8   :  { %7082 = vmatprep.mubr.msk.f32.mxu0 %vm8305_vm0, %v8293_v0  ;;  %7090 = vmatprep.subr.mxu0 %v8293_v0 }
0x33f9   :  { %7095 = vmatprep.subr.mxu1 %v8293_v0 }
0x33fa   :  { %v4201_v54 = vpop.permute.xlu0 %4200  ;;  %7083 = vmatmul.mubr.msk.f32.vlgmr.msra.gmra.mrb[36].mxu0 %vm464_vm3, %v3751_v36  ;;  %7088 = vmatmul.mubr.msk.f32.vlgmr.msra.gmra.mrb[20].mxu1 %vm464_vm3, %v3753_v37  ;;  %v4277_v55 = vpop.permute.xlu1 %4276 }
0x33fb   :  { %7091 = vmatpush3.xpose.msk.msra.mxu0 %vm464_vm3, %v4201_v54  ;;  %7096 = vmatpush3.xpose.msk.msra.mxu1 %vm464_vm3, %v4277_v55 }
0x33fc   :  { %7092 = vmatprep.mubr.msk.f32.mxu0 %vm8305_vm0, %v8293_v0  ;;  %7097 = vmatprep.mubr.msk.f32.mxu1 %vm8305_vm0, %v8293_v0 }
0x33fd   :  { %7100 = vmatprep.subr.mxu0 %v8293_v0  ;;  %7105 = vmatprep.subr.mxu1 %v8293_v0 }
0x33fe   :  { %v4353_v19 = vpop.permute.xlu0 %4352  ;;  %7093 = vmatmul.mubr.msk.f32.vlgmr.msra.gmra.mrb[38].mxu0 %vm464_vm3, %v9339_v17  ;;  %7098 = vmatmul.mubr.msk.f32.vlgmr.msra.gmra.mrb[22].mxu1 %vm464_vm3, %v9341_v23  ;;  %v4429_v33 = vpop.permute.xlu1 %4428 }
0x33ff   :  { %7101 = vmatpush3.xpose.msk.msra.mxu0 %vm464_vm3, %v4353_v19  ;;  %7106 = vmatpush3.xpose.msk.msra.mxu1 %vm464_vm3, %v4429_v33 }
0x3400   :  { %7102 = vmatprep.mubr.msk.f32.mxu0 %vm8305_vm0, %v8293_v0  ;;  %7107 = vmatprep.mubr.msk.f32.mxu1 %vm8305_vm0, %v8293_v0 }
0x3401   :  { %7110 = vmatprep.subr.mxu0 %v8293_v0  ;;  %7115 = vmatprep.subr.mxu1 %v8293_v0 }
0x3402   :  { %v4505_v24 = vpop.permute.xlu0 %4504  ;;  %7103 = vmatmul.mubr.msk.f32.vlgmr.msra.gmra.mrb[40].mxu0 %vm464_vm3, %v9347_v40  ;;  %7108 = vmatmul.mubr.msk.f32.vlgmr.msra.gmra.mrb[24].mxu1 %vm464_vm3, %v9349_v25  ;;  %v4581_v29 = vpop.permute.xlu1 %4580 }
0x3403   :  { %7111 = vmatpush3.xpose.msk.msra.mxu0 %vm464_vm3, %v4505_v24  ;;  %7116 = vmatpush3.xpose.msk.msra.mxu1 %vm464_vm3, %v4581_v29 }
0x3404   :  { %7112 = vmatprep.mubr.msk.f32.mxu0 %vm8305_vm0, %v8293_v0  ;;  %7117 = vmatprep.mubr.msk.f32.mxu1 %vm8305_vm0, %v8293_v0 }
0x3405   :  { %7120 = vmatprep.subr.mxu0 %v8293_v0  ;;  %7125 = vmatprep.subr.mxu1 %v8293_v0 }
0x3406   :  { %v4657_v7 = vpop.permute.xlu0 %4656  ;;  %7113 = vmatmul.mubr.msk.f32.vlgmr.msra.gmra.mrb[42].mxu0 %vm464_vm3, %v9355_v28  ;;  %7118 = vmatmul.mubr.msk.f32.vlgmr.msra.gmra.mrb[26].mxu1 %vm464_vm3, %v9357_v44  ;;  %v4733_v56 = vpop.permute.xlu1 %4732 }
0x3407   :  { %7121 = vmatpush3.xpose.msk.msra.mxu0 %vm464_vm3, %v4657_v7  ;;  %7126 = vmatpush3.xpose.msk.msra.mxu1 %vm464_vm3, %v4733_v56 }
0x3408   :  { %7122 = vmatprep.mubr.msk.f32.mxu0 %vm8305_vm0, %v8293_v0  ;;  %7127 = vmatprep.mubr.msk.f32.mxu1 %vm8305_vm0, %v8293_v0 }
0x3409   :  { %7130 = vmatprep.subr.mxu0 %v8293_v0  ;;  %7135 = vmatprep.subr.mxu1 %v8293_v0 }
0x340a   :  { %v4809_v57 = vpop.permute.xlu0 %4808  ;;  %7123 = vmatmul.mubr.msk.f32.vlgmr.msra.gmra.mrb[44].mxu0 %vm464_vm3, %v9363_v45  ;;  %7128 = vmatmul.mubr.msk.f32.vlgmr.msra.gmra.mrb[28].mxu1 %vm464_vm3, %v9365_v46  ;;  %v4885_v43 = vpop.permute.xlu1 %4884 }
0x340b   :  { %7131 = vmatpush3.xpose.msk.msra.mxu0 %vm464_vm3, %v4809_v57  ;;  %7136 = vmatpush3.xpose.msk.msra.mxu1 %vm464_vm3, %v4885_v43 }
0x340c   :  { %7132 = vmatprep.mubr.msk.f32.mxu0 %vm8305_vm0, %v8293_v0  ;;  %7137 = vmatprep.mubr.msk.f32.mxu1 %vm8305_vm0, %v8293_v0 }
0x340d   :  { %7140 = vmatprep.subr.mxu0 %v8293_v0  ;;  %7145 = vmatprep.subr.mxu1 %v8293_v0 }
0x340e   :  { %v4961_v59 = vpop.permute.xlu0 %4960  ;;  %7133 = vmatmul.mubr.msk.f32.vlgmr.msra.gmra.mrb[46].mxu0 %vm464_vm3, %v9371_v47  ;;  %7138 = vmatmul.mubr.msk.f32.vlgmr.msra.gmra.mrb[30].mxu1 %vm464_vm3, %v9373_v48 }
0x340f   :  { %7141 = vmatpush3.xpose.msk.msra.mxu0 %vm464_vm3, %v4961_v59  ;;  %7146 = vmatpush3.msra.mxu1 %v9390_v41 }
0x3410   :  { %7142 = vmatprep.mubr.msk.f32.mxu0 %vm8305_vm0, %v8293_v0  ;;  %7150 = vmatprep.subr.mxu0 %v8293_v0 }
0x3411   :  { %7147 = vmatprep.mubr.msk.f32.mxu1 %vm8305_vm0, %v8293_v0  ;;  %7155 = vmatprep.subr.mxu1 %v8293_v0 }
0x3412   :  { %7143 = vmatmul.mubr.msk.f32.vlgmr.msra.gmra.mrb[48].mxu0 %vm464_vm3, %v9382_v50 }
0x3413   :  { %7151 = vmatpush3.msra.mxu0 %v9380_v20  ;;  %7152 = vmatprep.mubr.msk.f32.mxu0 %vm8305_vm0, %v8293_v0 }
0x3414   :  { %7160 = vmatprep.subr.mxu0 %v8293_v0 }
0x3473   :  { %v3892_v58 = vpop.f32.mrb[30].mxu0 }
0x3474   :  { %v9504_v60 = vmul.f32 0.35355338, %v3892_v58  ;;  %v7069_v61 = vpop.f32.mrb[31].mxu0 }
0x3476   :  { %v5052_v16 = vsel %vm464_vm3, %v9504_v60, -inf }
0x3477   :  { %5053 = vmax.xlane.f32.xlu1 %v5052_v16  ;;  %v3968_v62 = vpop.f32.mrb[32].mxu0 }
0x3478   :  { %v9508_v42 = vmul.f32 0.35355338, %v3968_v62  ;;  %v7074_v63 = vpop.f32.mrb[33].mxu0 }
0x3479   :  { %v9566_v63 = vpop.permute.xlu1 %3780 }
0x347a   :  { %v5055_v1 = vsel %vm464_vm3, %v9508_v42, -inf }
0x347b   :  { %5056 = vmax.xlane.f32.xlu0 %v5055_v1 }
0x34c9   :  { %v4044_v2 = vpop.f32.mrb[34].mxu0 }
0x34ca   :  { %v9512_v3 = vmul.f32 0.35355338, %v4044_v2  ;;  %v7079_v4 = vpop.f32.mrb[35].mxu0  ;;  %v9570_v2 = vpop.permute.xlu1 %3784 }
0x34cb   :  { %v9572_v4 = vpop.permute.xlu0 %3778 }
0x34cc   :  { %v5058_v5 = vsel %vm464_vm3, %v9512_v3, -inf }
0x34cd   :  { %5059 = vmax.xlane.f32.xlu0 %v5058_v5  ;;  %v4120_v6 = vpop.f32.mrb[36].mxu0  ;;  %v4196_v8 = vpop.f32.mrb[20].mxu1 }
0x34ce   :  { %v9516_v11 = vmul.f32 0.35355338, %v4120_v6  ;;  %v9518_v12 = vmul.f32 0.35355338, %v4196_v8  ;;  %v7084_v15 = vpop.f32.mrb[37].mxu0  ;;  %v7089_v9 = vpop.f32.mrb[21].mxu1 }
0x34cf   :  { %v9574_v5 = vpop.permute.xlu1 %3790  ;;  %v9576_v6 = vpop.permute.xlu0 %3786 }
0x34d0   :  { %v5061_v21 = vsel %vm464_vm3, %v9516_v11, -inf  ;;  %v5064_v22 = vsel %vm464_vm3, %v9518_v12, -inf }
0x34d1   :  { %5062 = vmax.xlane.f32.xlu1 %v5061_v21  ;;  %v4272_v26 = vpop.f32.mrb[38].mxu0  ;;  %5065 = vmax.xlane.f32.xlu0 %v5064_v22  ;;  %v4348_v27 = vpop.f32.mrb[22].mxu1 }
0x34d2   :  { %v9524_v18 = vmul.f32 0.35355338, %v4272_v26  ;;  %v9526_v30 = vmul.f32 0.35355338, %v4348_v27  ;;  %v7094_v31 = vpop.f32.mrb[39].mxu0  ;;  %v7099_v32 = vpop.f32.mrb[23].mxu1 }
0x34d3   :  { %v9578_v8 = vpop.permute.xlu1 %3796  ;;  %v9584_v15 = vpop.permute.xlu0 %3792 }
0x34d4   :  { %v5067_v34 = vsel %vm464_vm3, %v9524_v18, -inf  ;;  %v5070_v35 = vsel %vm464_vm3, %v9526_v30, -inf }
0x34d5   :  { %5068 = vmax.xlane.f32.xlu1 %v5067_v34  ;;  %v4424_v38 = vpop.f32.mrb[40].mxu0  ;;  %5071 = vmax.xlane.f32.xlu0 %v5070_v35  ;;  %v4500_v36 = vpop.f32.mrb[24].mxu1 }
0x34d6   :  { %v9532_v37 = vmul.f32 0.35355338, %v4424_v38  ;;  %v9534_v17 = vmul.f32 0.35355338, %v4500_v36  ;;  %v7104_v23 = vpop.f32.mrb[41].mxu0  ;;  %v7109_v40 = vpop.f32.mrb[25].mxu1 }
0x34d7   :  { %v9588_v9 = vpop.permute.xlu1 %3802  ;;  %v9590_v21 = vpop.permute.xlu0 %3798 }
0x34d8   :  { %v5073_v25 = vsel %vm464_vm3, %v9532_v37, -inf  ;;  %v5076_v28 = vsel %vm464_vm3, %v9534_v17, -inf }
0x34d9   :  { %5074 = vmax.xlane.f32.xlu1 %v5073_v25  ;;  %v4576_v44 = vpop.f32.mrb[42].mxu0  ;;  %5077 = vmax.xlane.f32.xlu0 %v5076_v28  ;;  %v4652_v45 = vpop.f32.mrb[26].mxu1 }
0x34da   :  { %v9540_v46 = vmul.f32 0.35355338, %v4576_v44  ;;  %v9542_v47 = vmul.f32 0.35355338, %v4652_v45  ;;  %v7114_v48 = vpop.f32.mrb[43].mxu0  ;;  %v7119_v49 = vpop.f32.mrb[27].mxu1 }
0x34dc   :  { %v5079_v50 = vsel %vm464_vm3, %v9540_v46, -inf  ;;  %v5082_v51 = vsel %vm464_vm3, %v9542_v47, -inf }
0x34dd   :  { %5080 = vmax.xlane.f32.xlu1 %v5079_v50  ;;  %v4728_v39 = vpop.f32.mrb[44].mxu0  ;;  %5083 = vmax.xlane.f32.xlu0 %v5082_v51  ;;  %v4804_v52 = vpop.f32.mrb[28].mxu1 }
0x34de   :  { %v9548_v13 = vmul.f32 0.35355338, %v4728_v39  ;;  %v9550_v53 = vmul.f32 0.35355338, %v4804_v52  ;;  %v7124_v54 = vpop.f32.mrb[45].mxu0  ;;  %v7129_v55 = vpop.f32.mrb[29].mxu1 }
0x34e0   :  { %v5085_v19 = vsel %vm464_vm3, %v9548_v13, -inf  ;;  %v5088_v33 = vsel %vm464_vm3, %v9550_v53, -inf }
0x34e1   :  { %5086 = vmax.xlane.f32.xlu1 %v5085_v19  ;;  %v4880_v24 = vpop.f32.mrb[46].mxu0  ;;  %5089 = vmax.xlane.f32.xlu0 %v5088_v33  ;;  %v4956_v29 = vpop.f32.mrb[30].mxu1 }
0x34e2   :  { %v9556_v7 = vmul.f32 0.35355338, %v4880_v24  ;;  %v9558_v56 = vmul.f32 0.35355338, %v4956_v29  ;;  %v7134_v57 = vpop.f32.mrb[47].mxu0  ;;  %v7139_v43 = vpop.f32.mrb[31].mxu1 }
0x34e4   :  { %v5091_v59 = vsel %vm464_vm3, %v9556_v7, -inf  ;;  %v5094_v58 = vsel %vm464_vm3, %v9558_v56, -inf }
0x34e5   :  { %5092 = vmax.xlane.f32.xlu1 %v5091_v59  ;;  %v5032_v61 = vpop.f32.mrb[48].mxu0  ;;  %5095 = vmax.xlane.f32.xlu0 %v5094_v58 }
0x34e6   :  { %v9564_v16 = vmul.f32 0.35355338, %v5032_v61  ;;  %v7144_v62 = vpop.f32.mrb[49].mxu0 }
0x34e8   :  { %v5097_v1 = vsel %vm464_vm3, %v9564_v16, -inf }
0x34e9   :  { %5098 = vmax.xlane.f32.xlu1 %v5097_v1 }
0x34fa   :  { %3808 = vrot.lane.b32.xlu1 %v9390_v41, %s8306_s8 }
0x34fb   :  { %3804 = vrot.lane.b32.xlu0 %v9380_v20, %s8304_s13 }
0x34ff   :  { %3810 = vrot.lane.b32.xlu0 %v9380_v20, %s8306_s8 }
0x3504   :  { %v5054_v22 = vpop.xlane.xlu1 %5053 }
0x3505   :  { %v5100_v26 = vsub.f32 %v9504_v60, %v5054_v22 }
0x3507   :  { %v5116_v32 = vmul.f32 1.442695, %v5100_v26 }
0x3508   :  { %v5057_v27 = vpop.xlane.xlu0 %5056 }
0x3509   :  { %v5101_v31 = vsub.f32 %v9508_v42, %v5057_v27  ;;  %7764 = vpow2.f32 %v5116_v32 }
0x350b   :  { %v5118_v34 = vmul.f32 1.442695, %v5101_v31 }
0x350d   :  { %7766 = vpow2.f32 %v5118_v34 }
0x3513   :  { %v9594_v35 = vpop.eup %7764 }
0x3514   :  { %v5148_v23 = vsel %vm464_vm3, %v9594_v35, 0.0 }
0x3517   :  { %v9596_v38 = vpop.eup %7766 }
0x3518   :  { %v5151_v36 = vsel %vm464_vm3, %v9596_v38, 0.0 }
0x351e   :  { %5152 = vadd.xlane.f32.xlu1 %v5151_v36  ;;  %5149 = vadd.xlane.f32.xlu0 %v5148_v23 }
0x355a   :  { %v5060_v60 = vpop.xlane.xlu0 %5059 }
0x355b   :  { %v5102_v40 = vsub.f32 %v9512_v3, %v5060_v60 }
0x355d   :  { %v5120_v42 = vmul.f32 1.442695, %v5102_v40 }
0x355e   :  { %v5066_v25 = vpop.xlane.xlu0 %5065  ;;  %v5063_v28 = vpop.xlane.xlu1 %5062 }
0x355f   :  { %7768 = vpow2.f32 %v5120_v42  ;;  %v5104_v44 = vsub.f32 %v9518_v12, %v5066_v25  ;;  %v5103_v45 = vsub.f32 %v9516_v11, %v5063_v28 }
0x3561   :  { %v5124_v48 = vmul.f32 1.442695, %v5104_v44  ;;  %v5122_v49 = vmul.f32 1.442695, %v5103_v45 }
0x3562   :  { %v5072_v50 = vpop.xlane.xlu0 %5071  ;;  %v5069_v51 = vpop.xlane.xlu1 %5068 }
0x3563   :  { %7770 = vpow2.f32 %v5124_v48  ;;  %v5106_v39 = vsub.f32 %v9526_v30, %v5072_v50  ;;  %v5105_v52 = vsub.f32 %v9524_v18, %v5069_v51 }
0x3564   :  { %7772 = vpow2.f32 %v5122_v49 }
0x3565   :  { %v5128_v54 = vmul.f32 1.442695, %v5106_v39  ;;  %v5126_v3 = vmul.f32 1.442695, %v5105_v52 }
0x3566   :  { %v5078_v55 = vpop.xlane.xlu0 %5077  ;;  %v5075_v19 = vpop.xlane.xlu1 %5074 }
0x3567   :  { %7774 = vpow2.f32 %v5128_v54  ;;  %v5108_v33 = vsub.f32 %v9534_v17, %v5078_v55  ;;  %v5107_v12 = vsub.f32 %v9532_v37, %v5075_v19 }
0x3568   :  { %7776 = vpow2.f32 %v5126_v3 }
0x3569   :  { %v9609_v11 = vpop.eup %7768  ;;  %v5132_v24 = vmul.f32 1.442695, %v5108_v33  ;;  %v5130_v29 = vmul.f32 1.442695, %v5107_v12 }
0x356a   :  { %v5084_v57 = vpop.xlane.xlu0 %5083  ;;  %v5081_v43 = vpop.xlane.xlu1 %5080  ;;  %v5154_v18 = vsel %vm464_vm3, %v9609_v11, 0.0 }
0x356b   :  { %7778 = vpow2.f32 %v5132_v24  ;;  %v5110_v30 = vsub.f32 %v9542_v47, %v5084_v57  ;;  %v5109_v59 = vsub.f32 %v9540_v46, %v5081_v43  ;;  %5155 = vadd.xlane.f32.xlu0 %v5154_v18 }
0x356c   :  { %7780 = vpow2.f32 %v5130_v29 }
0x356d   :  { %v9615_v17 = vpop.eup %7770  ;;  %v5136_v37 = vmul.f32 1.442695, %v5110_v30  ;;  %v5134_v58 = vmul.f32 1.442695, %v5109_v59 }
0x356e   :  { %v9617_v61 = vpop.eup %7772  ;;  %v5090_v62 = vpop.xlane.xlu0 %5089  ;;  %v5160_v22 = vsel %vm464_vm3, %v9615_v17, 0.0 }
0x356f   :  { %v5087_v1 = vpop.xlane.xlu1 %5086  ;;  %7782 = vpow2.f32 %v5136_v37  ;;  %v5112_v26 = vsub.f32 %v9550_v53, %v5090_v62  ;;  %5161 = vadd.xlane.f32.xlu0 %v5160_v22  ;;  %v5157_v46 = vsel %vm464_vm3, %v9617_v61, 0.0 }
0x3570   :  { %v5111_v47 = vsub.f32 %v9548_v13, %v5087_v1  ;;  %7784 = vpow2.f32 %v5134_v58  ;;  %5158 = vadd.xlane.f32.xlu1 %v5157_v46 }
0x3571   :  { %v9625_v27 = vpop.eup %7774  ;;  %v5140_v31 = vmul.f32 1.442695, %v5112_v26 }
0x3572   :  { %v5138_v32 = vmul.f32 1.442695, %v5111_v47  ;;  %v9627_v34 = vpop.eup %7776  ;;  %v5096_v36 = vpop.xlane.xlu0 %5095  ;;  %v5166_v60 = vsel %vm464_vm3, %v9625_v27, 0.0 }
0x3573   :  { %v5093_v23 = vpop.xlane.xlu1 %5092  ;;  %7786 = vpow2.f32 %v5140_v31  ;;  %v5114_v13 = vsub.f32 %v9558_v56, %v5096_v36  ;;  %5167 = vadd.xlane.f32.xlu0 %v5166_v60  ;;  %v5163_v40 = vsel %vm464_vm3, %v9627_v34, 0.0 }
0x3574   :  { %v5113_v53 = vsub.f32 %v9556_v7, %v5093_v23  ;;  %7788 = vpow2.f32 %v5138_v32  ;;  %5164 = vadd.xlane.f32.xlu1 %v5163_v40 }
0x3575   :  { %v9635_v42 = vpop.eup %7778  ;;  %v5144_v25 = vmul.f32 1.442695, %v5114_v13 }
0x3576   :  { %v5142_v28 = vmul.f32 1.442695, %v5113_v53  ;;  %v9637_v44 = vpop.eup %7780  ;;  %v5172_v48 = vsel %vm464_vm3, %v9635_v42, 0.0  ;;  %v9676_v43 = vpop.permute.xlu0 %3804 }
0x3577   :  { %v5099_v45 = vpop.xlane.xlu1 %5098  ;;  %7790 = vpow2.f32 %v5144_v25  ;;  %5173 = vadd.xlane.f32.xlu0 %v5172_v48  ;;  %v5169_v7 = vsel %vm464_vm3, %v9637_v44, 0.0 }
0x3578   :  { %v5115_v56 = vsub.f32 %v9564_v16, %v5099_v45  ;;  %7792 = vpow2.f32 %v5142_v28  ;;  %5170 = vadd.xlane.f32.xlu1 %v5169_v7 }
0x3579   :  { %v9644_v49 = vpop.eup %7782 }
0x357a   :  { %v5146_v50 = vmul.f32 1.442695, %v5115_v56  ;;  %v9646_v51 = vpop.eup %7784  ;;  %v5178_v39 = vsel %vm464_vm3, %v9644_v49, 0.0  ;;  %v9678_v18 = vpop.permute.xlu0 %3810 }
0x357b   :  { %5179 = vadd.xlane.f32.xlu0 %v5178_v39  ;;  %v5175_v52 = vsel %vm464_vm3, %v9646_v51, 0.0  ;;  %v9680_v30 = vpop.permute.xlu1 %3808 }
0x357c   :  { %7794 = vpow2.f32 %v5146_v50  ;;  %5176 = vadd.xlane.f32.xlu1 %v5175_v52 }
0x357d   :  { %v9652_v16 = vpop.eup %7786 }
0x357e   :  { %v9654_v54 = vpop.eup %7788  ;;  %v5184_v3 = vsel %vm464_vm3, %v9652_v16, 0.0 }
0x357f   :  { %5185 = vadd.xlane.f32.xlu0 %v5184_v3  ;;  %v5181_v55 = vsel %vm464_vm3, %v9654_v54, 0.0 }
0x3580   :  { %5182 = vadd.xlane.f32.xlu1 %v5181_v55 }
0x3581   :  { %v9660_v19 = vpop.eup %7790 }
0x3582   :  { %v9662_v33 = vpop.eup %7792  ;;  %v5190_v12 = vsel %vm464_vm3, %v9660_v19, 0.0 }
0x3583   :  { %5191 = vadd.xlane.f32.xlu0 %v5190_v12  ;;  %v5187_v24 = vsel %vm464_vm3, %v9662_v33, 0.0 }
0x3584   :  { %5188 = vadd.xlane.f32.xlu1 %v5187_v24 }
0x3586   :  { %v9668_v29 = vpop.eup %7794 }
0x3587   :  { %v5193_v57 = vsel %vm464_vm3, %v9668_v29, 0.0 }
0x3588   :  { %5194 = vadd.xlane.f32.xlu1 %v5193_v57  ;;  %v6470_v57 = vld [vmem:[#allocation22] sm:$0xff] }
0x3599   :  { %3814 = vrot.lane.b32.xlu1 %v9390_v41, %s8307_s0  ;;  %3816 = vrot.lane.b32.xlu0 %v9380_v20, %s8307_s0 }
0x35ab   :  { %v5150_v59 = vpop.xlane.xlu0 %5149  ;;  %v5153_v37 = vpop.xlane.xlu1 %5152 }
0x35ac   :  { %7796 = vrcp.f32 %v5150_v59 }
0x35ad   :  { %7798 = vrcp.f32 %v5153_v37  ;;  %v6473_v37 = vld [vmem:[#allocation22 + $0x18] sm:$0xff] }
0x35b6   :  { %v7797_v58 = vpop.eup %7796 }
0x35b7   :  { %v7799_v62 = vpop.eup %7798  ;;  %v5197_v1 = vmul.f32 %v7797_v58, %v9594_v35 }
0x35b8   :  { %v5199_v22 = vmul.f32 %v7799_v62, %v9596_v38 }
0x35b9   :  { %7148 = vmatmul.mubr.msk.f32.vlgmr.msra.gmra.mrb[32].mxu1 %vm464_vm3, %v5197_v1 }
0x35ba   :  { %7153 = vmatmul.mubr.msk.f32.vlgmr.msra.gmra.mrb[50].mxu0 %vm464_vm3, %v5199_v22  ;;  %7156 = vmatpush3.msra.mxu1 %v9572_v4 }
0x35bb   :  { %7161 = vmatpush3.msra.mxu0 %v9566_v63  ;;  %7157 = vmatprep.mubr.msk.f32.mxu1 %vm8305_vm0, %v8293_v0 }
0x35bc   :  { %7165 = vmatprep.subr.mxu1 %v8293_v0  ;;  %7162 = vmatprep.mubr.msk.f32.mxu0 %vm8305_vm0, %v8293_v0 }
0x35bd   :  { %7170 = vmatprep.subr.mxu0 %v8293_v0 }
0x35f8   :  { %v5156_v20 = vpop.xlane.xlu0 %5155 }
0x35f9   :  { %7800 = vrcp.f32 %v5156_v20 }
0x35fc   :  { %v5162_v41 = vpop.xlane.xlu0 %5161 }
0x35fd   :  { %7802 = vrcp.f32 %v5162_v41  ;;  %v5159_v35 = vpop.xlane.xlu1 %5158  ;;  %v6474_v41 = vld [vmem:[#allocation22 + $0x20] sm:$0xff] }
0x35fe   :  { %7804 = vrcp.f32 %v5159_v35  ;;  %v6475_v35 = vld [vmem:[#allocation22 + $0x28] sm:$0xff] }
0x3600   :  { %v5168_v38 = vpop.xlane.xlu0 %5167 }
0x3601   :  { %7806 = vrcp.f32 %v5168_v38  ;;  %v5165_v4 = vpop.xlane.xlu1 %5164 }
0x3602   :  { %7808 = vrcp.f32 %v5165_v4  ;;  %v7538_v4 = vpack.c.bf16 %v6475_v35, %v6474_v41 }
0x3603   :  { %v7801_v63 = vpop.eup %7800 }
0x3604   :  { %v5201_v26 = vmul.f32 %v7801_v63, %v9609_v11  ;;  %v5174_v47 = vpop.xlane.xlu0 %5173 }
0x3605   :  { %7810 = vrcp.f32 %v5174_v47  ;;  %v5171_v46 = vpop.xlane.xlu1 %5170 }
0x3606   :  { %7812 = vrcp.f32 %v5171_v46  ;;  %7158 = vmatmul.mubr.msk.f32.vlgmr.msra.gmra.mrb[34].mxu1 %vm464_vm3, %v5201_v26  ;;  %v6476_v46 = vld [vmem:[#allocation22 + $0x30] sm:$0xff] }
0x3607   :  { %v7803_v31 = vpop.eup %7802  ;;  %7166 = vmatpush3.msra.mxu1 %v9570_v2  ;;  %7167 = vmatprep.mubr.msk.f32.mxu1 %vm8305_vm0, %v8293_v0 }
0x3608   :  { %v7805_v32 = vpop.eup %7804  ;;  %v5205_v36 = vmul.f32 %v7803_v31, %v9615_v17  ;;  %v5180_v23 = vpop.xlane.xlu0 %5179  ;;  %7175 = vmatprep.subr.mxu1 %v8293_v0  ;;  %v6477_v31 = vld [vmem:[#allocation22 + $0x38] sm:$0xff] }
0x3609   :  { %v5203_v11 = vmul.f32 %v7805_v32, %v9617_v61  ;;  %7814 = vrcp.f32 %v5180_v23  ;;  %v5177_v60 = vpop.xlane.xlu1 %5176 }
0x360a   :  { %7816 = vrcp.f32 %v5177_v60  ;;  %7168 = vmatmul.mubr.msk.f32.vlgmr.msra.gmra.mrb[36].mxu1 %vm464_vm3, %v5205_v36  ;;  %v7542_v36 = vpack.c.bf16 %v6477_v31, %v6476_v46  ;;  %v6615_v31 = vld [vmem:[#allocation28] sm:$0xff] }
0x360b   :  { %v7807_v13 = vpop.eup %7806  ;;  %7163 = vmatmul.mubr.msk.f32.vlgmr.msra.gmra.mrb[52].mxu0 %vm464_vm3, %v5203_v11  ;;  %7176 = vmatpush3.msra.mxu1 %v9574_v5 }
0x360c   :  { %v7809_v2 = vpop.eup %7808  ;;  %v5209_v53 = vmul.f32 %v7807_v13, %v9625_v27  ;;  %7171 = vmatpush3.msra.mxu0 %v9576_v6  ;;  %v5186_v17 = vpop.xlane.xlu0 %5185  ;;  %7172 = vmatprep.mubr.msk.f32.mxu0 %vm8305_vm0, %v8293_v0 }
0x360d   :  { %v5207_v61 = vmul.f32 %v7809_v2, %v9627_v34  ;;  %7818 = vrcp.f32 %v5186_v17  ;;  %v5183_v40 = vpop.xlane.xlu1 %5182  ;;  %7177 = vmatprep.mubr.msk.f32.mxu1 %vm8305_vm0, %v8293_v0  ;;  %7180 = vmatprep.subr.mxu0 %v8293_v0 }
0x360e   :  { %7820 = vrcp.f32 %v5183_v40  ;;  %7185 = vmatprep.subr.mxu1 %v8293_v0  ;;  %7178 = vmatmul.mubr.msk.f32.vlgmr.msra.gmra.mrb[38].mxu1 %vm464_vm3, %v5209_v53 }
0x360f   :  { %v7811_v5 = vpop.eup %7810  ;;  %7173 = vmatmul.mubr.msk.f32.vlgmr.msra.gmra.mrb[54].mxu0 %vm464_vm3, %v5207_v61  ;;  %7186 = vmatpush3.msra.mxu1 %v9578_v8 }
0x3610   :  { %v7813_v6 = vpop.eup %7812  ;;  %v5213_v27 = vmul.f32 %v7811_v5, %v9635_v42  ;;  %7181 = vmatpush3.msra.mxu0 %v9584_v15  ;;  %v5192_v34 = vpop.xlane.xlu0 %5191  ;;  %7182 = vmatprep.mubr.msk.f32.mxu0 %vm8305_vm0, %v8293_v0 }
0x3611   :  { %v5211_v25 = vmul.f32 %v7813_v6, %v9637_v44  ;;  %7822 = vrcp.f32 %v5192_v34  ;;  %v5189_v28 = vpop.xlane.xlu1 %5188  ;;  %7187 = vmatprep.mubr.msk.f32.mxu1 %vm8305_vm0, %v8293_v0  ;;  %7190 = vmatprep.subr.mxu0 %v8293_v0 }
0x3612   :  { %7824 = vrcp.f32 %v5189_v28  ;;  %7195 = vmatprep.subr.mxu1 %v8293_v0  ;;  %7188 = vmatmul.mubr.msk.f32.vlgmr.msra.gmra.mrb[40].mxu1 %vm464_vm3, %v5213_v27 }
0x3613   :  { %v7815_v8 = vpop.eup %7814  ;;  %7183 = vmatmul.mubr.msk.f32.vlgmr.msra.gmra.mrb[56].mxu0 %vm464_vm3, %v5211_v25  ;;  %7196 = vmatpush3.msra.mxu1 %v9588_v9 }
0x3614   :  { %v7817_v15 = vpop.eup %7816  ;;  %v5217_v42 = vmul.f32 %v7815_v8, %v9644_v49  ;;  %7191 = vmatpush3.msra.mxu0 %v9590_v21  ;;  %7192 = vmatprep.mubr.msk.f32.mxu0 %vm8305_vm0, %v8293_v0  ;;  %v3817_v52 = vpop.permute.xlu0 %3816 }
0x3615   :  { %v5215_v44 = vmul.f32 %v7817_v15, %v9646_v51  ;;  %v5195_v45 = vpop.xlane.xlu1 %5194  ;;  %7197 = vmatprep.mubr.msk.f32.mxu1 %vm8305_vm0, %v8293_v0  ;;  %7200 = vmatprep.subr.mxu0 %v8293_v0 }
0x3616   :  { %7826 = vrcp.f32 %v5195_v45  ;;  %7205 = vmatprep.subr.mxu1 %v8293_v0  ;;  %7198 = vmatmul.mubr.msk.f32.vlgmr.msra.gmra.mrb[42].mxu1 %vm464_vm3, %v5217_v42 }
0x3617   :  { %v7819_v9 = vpop.eup %7818  ;;  %7193 = vmatmul.mubr.msk.f32.vlgmr.msra.gmra.mrb[58].mxu0 %vm464_vm3, %v5215_v44  ;;  %7206 = vmatpush3.msra.mxu1 %v9680_v30 }
0x3618   :  { %v7821_v21 = vpop.eup %7820  ;;  %v5221_v48 = vmul.f32 %v7819_v9, %v9652_v16  ;;  %7201 = vmatpush3.msra.mxu0 %v9676_v43  ;;  %7202 = vmatprep.mubr.msk.f32.mxu0 %vm8305_vm0, %v8293_v0  ;;  %v6471_v43 = vld [vmem:[#allocation22 + $0x8] sm:$0xff] }
0x3619   :  { %v5219_v56 = vmul.f32 %v7821_v21, %v9654_v54  ;;  %v3815_v7 = vpop.permute.xlu1 %3814  ;;  %7207 = vmatprep.mubr.msk.f32.mxu1 %vm8305_vm0, %v8293_v0  ;;  %7210 = vmatprep.subr.mxu0 %v8293_v0 }
0x361a   :  { %7215 = vmatprep.subr.mxu1 %v8293_v0  ;;  %7208 = vmatmul.mubr.msk.f32.vlgmr.msra.gmra.mrb[44].mxu1 %vm464_vm3, %v5221_v48 }
0x361b   :  { %v7823_v49 = vpop.eup %7822  ;;  %7203 = vmatmul.mubr.msk.f32.vlgmr.msra.gmra.mrb[60].mxu0 %vm464_vm3, %v5219_v56  ;;  %7216 = vmatpush3.msra.mxu1 %v3815_v7 }
0x361c   :  { %v7825_v50 = vpop.eup %7824  ;;  %v5225_v51 = vmul.f32 %v7823_v49, %v9660_v19  ;;  %7211 = vmatpush3.msra.mxu0 %v9678_v18  ;;  %7212 = vmatprep.mubr.msk.f32.mxu0 %vm8305_vm0, %v8293_v0  ;;  %v7530_v18 = vpack.c.bf16 %v6471_v43, %v6470_v57 }
0x361d   :  { %v5223_v39 = vmul.f32 %v7825_v50, %v9662_v33  ;;  %7217 = vmatprep.mubr.msk.f32.mxu1 %vm8305_vm0, %v8293_v0  ;;  %7220 = vmatprep.subr.mxu0 %v8293_v0 }
0x361e   :  { %7218 = vmatmul.mubr.msk.f32.vlgmr.msra.gmra.mrb[46].mxu1 %vm464_vm3, %v5225_v51  ;;  %7531 = vmatprep.subr.bf16.mxu1 %v7530_v18 }
0x361f   :  { %7213 = vmatmul.mubr.msk.f32.vlgmr.msra.gmra.mrb[62].mxu0 %vm464_vm3, %v5223_v39  ;;  %7533 = vmatpush3.bf16.msra.mxu1 %v7530_v18 }
0x3620   :  { %v7827_v16 = vpop.eup %7826  ;;  %7221 = vmatpush3.msra.mxu0 %v3817_v52  ;;  %7222 = vmatprep.mubr.msk.f32.mxu0 %vm8305_vm0, %v8293_v0 }
0x3621   :  { %v5227_v54 = vmul.f32 %v7827_v16, %v9668_v29  ;;  %v6472_v29 = vld [vmem:[#allocation22 + $0x10] sm:$0xff] }
0x3622   :  { %v7534_v62 = vpack.c.bf16 %v6473_v37, %v6472_v29 }
0x3623   :  { %7223 = vmatmul.mubr.msk.f32.vlgmr.msra.gmra.mrb[64].mxu0 %vm464_vm3, %v5227_v54 }
0x3624   :  { %7535 = vmatprep.subr.bf16.mxu1 %v7534_v62 }
0x3625   :  { %7537 = vmatpush3.bf16.msra.mxu1 %v7534_v62 }
0x3626   :  { %7539 = vmatprep.subr.bf16.mxu1 %v7538_v4 }
0x3629   :  { %7541 = vmatpush3.bf16.msra.mxu1 %v7538_v4 }
0x362a   :  { %7543 = vmatprep.subr.bf16.mxu1 %v7542_v36 }
0x362d   :  { %7545 = vmatpush3.bf16.msra.mxu1 %v7542_v36 }
0x368c   :  { %v9766_v3 = vpop.f32.mrb[32].mxu1 }
0x368d   :  { %v9768_v55 = vpop.f32.mrb[50].mxu0  ;;  %v7149_v19 = vpop.f32.mrb[33].mxu1 }
0x368e   :  { %v7154_v33 = vpop.f32.mrb[51].mxu0 }
0x36d9   :  { %v5443_v12 = vpop.f32.mrb[34].mxu1 }
0x36da   :  { %v7159_v24 = vpop.f32.mrb[35].mxu1  ;;  %6398 = vrot.lane.b32.xlu1 %v5443_v12, %s8280_s12 }
0x36dd   :  { %v5589_v30 = vpop.f32.mrb[36].mxu1 }
0x36de   :  { %v5516_v0 = vpop.f32.mrb[52].mxu0  ;;  %v7169_v59 = vpop.f32.mrb[37].mxu1  ;;  %6406 = vrot.lane.b32.xlu1 %v5589_v30, %s8276_s3 }
0x36df   :  { %6400 = vrot.lane.b32.xlu0 %v5516_v0, %s8280_s12  ;;  %v7164_v58 = vpop.f32.mrb[53].mxu0  ;;  %s8309_s12 = smov 40  }
0x36e1   :  { %v5735_v1 = vpop.f32.mrb[38].mxu1 }
0x36e2   :  { %v5662_v22 = vpop.f32.mrb[54].mxu0  ;;  %v7179_v20 = vpop.f32.mrb[39].mxu1  ;;  %6414 = vrot.lane.b32.xlu1 %v5735_v1, %s8308_s4 }
0x36e3   :  { %6408 = vrot.lane.b32.xlu0 %v5662_v22, %s8276_s3  ;;  %v7174_v38 = vpop.f32.mrb[55].mxu0  ;;  %s8310_s3 = smov 48  }
0x36e5   :  { %v5881_v63 = vpop.f32.mrb[40].mxu1 }
0x36e6   :  { %v5808_v26 = vpop.f32.mrb[56].mxu0  ;;  %v7189_v47 = vpop.f32.mrb[41].mxu1  ;;  %6422 = vrot.lane.b32.xlu1 %v5881_v63, %s8299_s11 }
0x36e7   :  { %6416 = vrot.lane.b32.xlu0 %v5808_v26, %s8308_s4  ;;  %v7184_v32 = vpop.f32.mrb[57].mxu0 }
0x36e8   :  { %v6616_v32 = vld [vmem:[#allocation28 + $0x8] sm:$0xff] }
0x36e9   :  { %v6027_v23 = vpop.f32.mrb[42].mxu1  ;;  %v7546_v36 = vpack.c.bf16 %v6616_v32, %v6615_v31 }
0x36ea   :  { %v5954_v11 = vpop.f32.mrb[58].mxu0  ;;  %v7199_v60 = vpop.f32.mrb[43].mxu1  ;;  %6430 = vrot.lane.b32.xlu1 %v6027_v23, %s8309_s12  ;;  %v6617_v23 = vld [vmem:[#allocation28 + $0x10] sm:$0xff] }
0x36eb   :  { %6424 = vrot.lane.b32.xlu0 %v5954_v11, %s8299_s11  ;;  %v7194_v13 = vpop.f32.mrb[59].mxu0  ;;  %7547 = vmatprep.subr.bf16.mxu0 %v7546_v36  ;;  %v6618_v11 = vld [vmem:[#allocation28 + $0x18] sm:$0xff] }
0x36ec   :  { %7549 = vmatpush3.bf16.msra.mxu0 %v7546_v36  ;;  %v7550_v60 = vpack.c.bf16 %v6618_v11, %v6617_v23  ;;  %v6619_v13 = vld [vmem:[#allocation28 + $0x20] sm:$0xff] }
0x36ed   :  { %v6173_v2 = vpop.f32.mrb[44].mxu1 }
0x36ee   :  { %v6100_v53 = vpop.f32.mrb[60].mxu0  ;;  %6438 = vrot.lane.b32.xlu1 %v6173_v2, %s8310_s3  ;;  %v7209_v17 = vpop.f32.mrb[45].mxu1  ;;  %7551 = vmatprep.subr.bf16.mxu0 %v7550_v60  ;;  %v6620_v2 = vld [vmem:[#allocation28 + $0x28] sm:$0xff] }
0x36ef   :  { %6432 = vrot.lane.b32.xlu0 %v6100_v53, %s8309_s12  ;;  %v7204_v61 = vpop.f32.mrb[61].mxu0  ;;  %v6621_v53 = vld [vmem:[#allocation28 + $0x30] sm:$0xff]  ;;  %v7554_v17 = vpack.c.bf16 %v6620_v2, %v6619_v13 }
0x36f0   :  { %7553 = vmatpush3.bf16.msra.mxu0 %v7550_v60  ;;  %v6622_v61 = vld [vmem:[#allocation28 + $0x38] sm:$0xff] }
0x36f1   :  { %v6319_v40 = vpop.f32.mrb[46].mxu1  ;;  %7555 = vmatprep.subr.bf16.mxu0 %v7554_v17 }
0x36f2   :  { %v6246_v5 = vpop.f32.mrb[62].mxu0  ;;  %6446 = vrot.lane.b32.xlu1 %v6319_v40, %s8311_s21  ;;  %v7219_v6 = vpop.f32.mrb[47].mxu1  ;;  %v7558_v40 = vpack.c.bf16 %v6622_v61, %v6621_v53 }
0x36f3   :  { %6440 = vrot.lane.b32.xlu0 %v6246_v5, %s8310_s3  ;;  %v7214_v27 = vpop.f32.mrb[63].mxu0  ;;  %v6713_v5 = vld [vmem:[#allocation31] sm:$0xff]  ;;  %v6714_v6 = vld [vmem:[#allocation31 + $0x8] sm:$0xff] }
0x36f4   :  { %7557 = vmatpush3.bf16.msra.mxu0 %v7554_v17  ;;  %v6715_v27 = vld [vmem:[#allocation31 + $0x10] sm:$0xff] }
0x36f5   :  { %7559 = vmatprep.subr.bf16.mxu0 %v7558_v40 }
0x36f6   :  { %v6392_v34 = vpop.f32.mrb[64].mxu0 }
0x36f7   :  { %6448 = vrot.lane.b32.xlu0 %v6392_v34, %s8311_s21  ;;  %v7224_v25 = vpop.f32.mrb[65].mxu0  ;;  %v7562_v34 = vpack.c.bf16 %v6714_v6, %v6713_v5 }
0x36f8   :  { %7561 = vmatpush3.bf16.msra.mxu0 %v7558_v40  ;;  %v6716_v25 = vld [vmem:[#allocation31 + $0x18] sm:$0xff] }
0x36f9   :  { %7563 = vmatprep.subr.bf16.mxu1 %v7562_v34 }
0x374c   :  { %v6399_v28 = vpop.permute.xlu1 %6398 }
0x374d   :  { %v6452_v56 = vsel %vm464_vm3, %v9766_v3, %v6399_v28  ;;  %v7566_v28 = vpack.c.bf16 %v6716_v25, %v6715_v27 }
0x3750   :  { %v6407_v8 = vpop.permute.xlu1 %6406 }
0x3751   :  { %v6401_v15 = vpop.permute.xlu0 %6400  ;;  %v6454_v7 = vsel %vm482_vm5, %v6452_v56, %v6407_v8  ;;  %v6717_v8 = vld [vmem:[#allocation31 + $0x20] sm:$0xff] }
0x3752   :  { %v6453_v16 = vsel %vm464_vm3, %v9768_v55, %v6401_v15  ;;  %v6940_v55 = vld [vmem:[#allocation24] ss:$0 sm:$0xff]  ;;  %v6718_v15 = vld [vmem:[#allocation31 + $0x28] sm:$0xff] }
0x3754   :  { %v6415_v42 = vpop.permute.xlu1 %6414 }
0x3755   :  { %v6409_v44 = vpop.permute.xlu0 %6408  ;;  %v6457_v50 = vsel %vm6456_vm4, %v6454_v7, %v6415_v42  ;;  %v7570_v42 = vpack.c.bf16 %v6718_v15, %v6717_v8  ;;  %v6723_v7 = vld [vmem:[#allocation31 + $0x50] sm:$0xff] }
0x3756   :  { %v6455_v3 = vsel %vm482_vm5, %v6453_v16, %v6409_v44  ;;  %v6719_v44 = vld [vmem:[#allocation31 + $0x30] sm:$0xff] }
0x3758   :  { %v6423_v45 = vpop.permute.xlu1 %6422 }
0x3759   :  { %v6417_v9 = vpop.permute.xlu0 %6416  ;;  %v6459_v39 = vsel %vm1145_vm11, %v6457_v50, %v6423_v45  ;;  %v6720_v45 = vld [vmem:[#allocation31 + $0x38] sm:$0xff] }
0x375a   :  { %v6458_v24 = vsel %vm6456_vm4, %v6455_v3, %v6417_v9  ;;  %v7574_v9 = vpack.c.bf16 %v6720_v45, %v6719_v44 }
0x375c   :  { %v6431_v21 = vpop.permute.xlu1 %6430 }
0x375d   :  { %v6425_v48 = vpop.permute.xlu0 %6424  ;;  %v6462_v52 = vsel %vm6461_vm6, %v6459_v39, %v6431_v21  ;;  %v6721_v21 = vld [vmem:[#allocation31 + $0x40] sm:$0xff]  ;;  %v6726_v39 = vld [vmem:[#allocation31 + $0x68] sm:$0xff] }
0x375e   :  { %v6460_v57 = vsel %vm1145_vm11, %v6458_v24, %v6425_v48  ;;  %v6722_v48 = vld [vmem:[#allocation31 + $0x48] sm:$0xff] }
0x375f   :  { %v7578_v56 = vpack.c.bf16 %v6722_v48, %v6721_v21 }
0x3760   :  { %v6439_v49 = vpop.permute.xlu1 %6438 }
0x3761   :  { %v6433_v51 = vpop.permute.xlu0 %6432  ;;  %v6465_v54 = vsel %vm6464_vm8, %v6462_v52, %v6439_v49  ;;  %v6724_v49 = vld [vmem:[#allocation31 + $0x58] sm:$0xff] }
0x3762   :  { %v6463_v43 = vsel %vm6461_vm6, %v6460_v57, %v6433_v51  ;;  %v7582_v50 = vpack.c.bf16 %v6724_v49, %v6723_v7  ;;  %v6725_v51 = vld [vmem:[#allocation31 + $0x60] sm:$0xff]  ;;  %v6943_v57 = vld [vmem:[#allocation25] ss:$0 sm:$0xff] }
0x3763   :  { %v7586_v52 = vpack.c.bf16 %v6726_v39, %v6725_v51 }
0x3764   :  { %v6447_v19 = vpop.permute.xlu1 %6446 }
0x3765   :  { %v6441_v33 = vpop.permute.xlu0 %6440  ;;  %v6468_v12 = vsel %vm6467_vm9, %v6465_v54, %v6447_v19 }
0x3766   :  { %7241 = vmatprep.mubr.msk.f32.mxu1 %vm735_vm7, %v6468_v12  ;;  %v6466_v18 = vsel %vm6464_vm8, %v6463_v43, %v6441_v33 }
0x3769   :  { %v6449_v30 = vpop.permute.xlu0 %6448 }
0x376a   :  { %v6469_v0 = vsel %vm6467_vm9, %v6466_v18, %v6449_v30 }
0x376b   :  { %7242 = vmatmul.mubr.msk.f32.vlgmr.msra.gmra.mrb[48].mxu1 %vm735_vm7, %v6469_v0 }
0x376c   :  { %7565 = vmatpush3.bf16.msra.mxu1 %v7562_v34 }
0x376d   :  { %7567 = vmatprep.subr.bf16.mxu1 %v7566_v28 }
0x3770   :  { %7569 = vmatpush3.bf16.msra.mxu1 %v7566_v28 }
0x3771   :  { %7571 = vmatprep.subr.bf16.mxu1 %v7570_v42 }
0x3774   :  { %7573 = vmatpush3.bf16.msra.mxu1 %v7570_v42 }
0x3775   :  { %7575 = vmatprep.subr.bf16.mxu1 %v7574_v9 }
0x3778   :  { %7577 = vmatpush3.bf16.msra.mxu1 %v7574_v9 }
0x3779   :  { %7579 = vmatprep.subr.bf16.mxu1 %v7578_v56 }
0x377c   :  { %7581 = vmatpush3.bf16.msra.mxu1 %v7578_v56 }
0x377d   :  { %7583 = vmatprep.subr.bf16.mxu1 %v7582_v50 }
0x3780   :  { %7585 = vmatpush3.bf16.msra.mxu1 %v7582_v50 }
0x3781   :  { %7587 = vmatprep.subr.bf16.mxu1 %v7586_v52 }
0x3784   :  { %7589 = vmatpush3.bf16.msra.mxu1 %v7586_v52 }
0x383e   :  { %v7243_v59 = vpop.f32.mrb[48].mxu1 }
0x383f   :  { %v6563_v29 = vadd.f32 %v7243_v59, %v6940_v55  ;;  %v6557_v37 = vpop.f32.mrb[49].mxu1 }
0x3840   :  { %v6558_v58 = vadd.f32 %v6940_v55, %v6557_v37  ;;  %v6944_v55 = vld [vmem:[#allocation27] ss:$0 sm:$0xff] }
0x3841   :  { %v6569_v62 = vadd.f32 %v6563_v29, %v9289_v14 }
0x3842   :  { %v6568_v1 = vadd.f32 %v6558_v58, %v9282_v10  ;;  %v6727_v58 = vld [vmem:[#allocation31 + $0x70] sm:$0xff] }
0x3843   :  { %v6573_v22 = vsel %vm735_vm7, %v6569_v62, 0.0 }
0x3844   :  { %6574 = vadd.xlane.f32.xlu0 %v6573_v22  ;;  %v6570_v20 = vsel %vm735_vm7, %v6568_v1, 0.0  ;;  %v6945_v22 = vld [vmem:[#allocation30] ss:$0 sm:$0xff] }
0x3845   :  { %6571 = vadd.xlane.f32.xlu1 %v6570_v20 }
0x38d1   :  { %v6575_v41 = vpop.xlane.xlu0 %6574 }
0x38d2   :  { %v6578_v35 = vmul.f32 0.015625, %v6575_v41  ;;  %v6572_v38 = vpop.xlane.xlu1 %6571 }
0x38d3   :  { %v6577_v4 = vmul.f32 0.015625, %v6572_v38 }
0x38d4   :  { %v9794_v63 = vsub.f32 %v6569_v62, %v6578_v35  ;;  %v6728_v62 = vld [vmem:[#allocation31 + $0x78] sm:$0xff] }
0x38d5   :  { %v9796_v26 = vsub.f32 %v6568_v1, %v6577_v4  ;;  %v7590_v1 = vpack.c.bf16 %v6728_v62, %v6727_v58 }
0x38d6   :  { %v6582_v47 = vmul.f32 %v9794_v63, %v9794_v63 }
0x38d7   :  { %v6581_v10 = vmul.f32 %v9796_v26, %v9796_v26  ;;  %7591 = vmatprep.subr.bf16.mxu1 %v7590_v1 }
0x38d8   :  { %v6586_v14 = vsel %vm735_vm7, %v6582_v47, 0.0  ;;  %7593 = vmatpush3.bf16.msra.mxu1 %v7590_v1 }
0x38d9   :  { %6587 = vadd.xlane.f32.xlu1 %v6586_v14  ;;  %v6583_v46 = vsel %vm735_vm7, %v6581_v10, 0.0 }
0x38da   :  { %6584 = vadd.xlane.f32.xlu0 %v6583_v46 }
0x3966   :  { %v6588_v16 = vpop.xlane.xlu1 %6587 }
0x3967   :  { %v6590_v54 = vmul.f32 0.015625, %v6588_v16  ;;  %v6585_v19 = vpop.xlane.xlu0 %6584 }
0x3968   :  { %v6589_v3 = vmul.f32 0.015625, %v6585_v19 }
0x3969   :  { %v6592_v33 = vadd.f32 1e-05, %v6590_v54 }
0x396a   :  { %v6591_v12 = vadd.f32 1e-05, %v6589_v3 }
0x396b   :  { %7828 = vrsqrt.f32 %v6592_v33 }
0x396c   :  { %7830 = vrsqrt.f32 %v6591_v12 }
0x3975   :  { %v7829_v24 = vpop.eup %7828 }
0x3976   :  { %v7831_v43 = vpop.eup %7830  ;;  %v6596_v18 = vmul.f32 %v7829_v24, %v9794_v63 }
0x3977   :  { %v6595_v30 = vmul.f32 %v7831_v43, %v9796_v26  ;;  %v6948_v26 = vld [vmem:[#allocation33] ss:$0 sm:$0xff] }
0x3978   :  { %v6605_v0 = vmul.f32 %v6943_v57, %v6596_v18 }
0x3979   :  { %v6604_v59 = vmul.f32 %v6943_v57, %v6595_v30 }
0x397a   :  { %v6614_v37 = vadd.f32 %v6944_v55, %v6605_v0 }
0x397b   :  { %v6613_v29 = vadd.f32 %v6944_v55, %v6604_v59 }
0x397d   :  { %7260 = vmatprep.mubr.msk.f32.mxu0 %vm735_vm7, %v6613_v29 }
0x397e   :  { %7261 = vmatmul.mubr.msk.f32.vlgmr.msra.gmra.mrb[66].mxu0 %vm735_vm7, %v6614_v37 }
0x3a51   :  { %v7262_v20 = vpop.f32.mrb[66].mxu0 }
0x3a52   :  { %v6708_v41 = vadd.f32 %v7262_v20, %v6945_v22  ;;  %v6702_v35 = vpop.f32.mrb[67].mxu0 }
0x3a53   :  { %v6703_v38 = vadd.f32 %v6945_v22, %v6702_v35 }
0x3a54   :  { %v6712_v63 = vmax.f32 %v6708_v41, 0.0 }
0x3a55   :  { %v6711_v4 = vmax.f32 %v6703_v38, 0.0 }
0x3a57   :  { %7295 = vmatprep.mubr.f32.mxu1 %v6711_v4 }
0x3a58   :  { %7296 = vmatmul.mubr.f32.vlgmr.msra.gmra.mrb[50].mxu1 %v6712_v63 }
0x3b2b   :  { %v7297_v47 = vpop.f32.mrb[50].mxu1 }
0x3b2c   :  { %v6808_v10 = vadd.f32 %v7297_v47, %v6948_v26  ;;  %v6802_v14 = vpop.f32.mrb[51].mxu1 }
0x3b2d   :  { %v6803_v46 = vadd.f32 %v6948_v26, %v6802_v14 }
0x3b2e   :  { %6812 = vst [vmem:[%s9839_s25 + $0x8] sm:$0xff] %v6808_v10 }
0x3b2f   :  { %6811 = vst [vmem:[%s9839_s25] sm:$0xff] %v6803_v46 }
0x3b30   :  { %6817 = vsyncpa [#allocation6], 1 }
0x3b31   :  { %6818 = vsyncpa [#allocation8], 1 }
0x3b32   :  { %6819 = vsyncpa [#allocation11], 1 }
0x3b33   :  { %6820 = vsyncpa [#allocation14], 1 }
0x3b34   :  { %6821 = vsyncpa [#allocation17], 1 }
0x3b35   :  { %6822 = vsyncpa [#allocation20], 1 }
0x3b36   :  { %6823 = vsyncpa [#allocation23], 1 }
0x3b37   :  { %6824 = vsyncpa [#allocation26], 1 }
0x3b38   :  { %6825 = vsyncpa [#allocation29], 1 }
0x3b39   :  { %6826 = vsyncpa [#allocation32], 1 }

</bundles_post_ra>
